<compile_context>
chip_gen: v5e
topology: v5e:2x2
jax: 0.10.0
libtpu: 0.0.40
codegen_flags: <defaults>
</compile_context>

<pallas_src>
import jax
import jax.numpy as jnp
from jax.experimental import pallas as pl
from jax.experimental.pallas import tpu as pltpu

NEG_SLOPE = 0.01          # PyTorch nn.LeakyReLU default
LAYER_DIMS = [(100, 256), (256, 512), (512, 1024), (1024, 784)]
K1_PAD = 128              # layer-1 contraction dim, padded from 100
OUT_DIM = 784


def _round_up(x, m):
    return ((x + m - 1) // m) * m


def _leaky_relu(x):
    # max(x, a*x) == LeakyReLU(x) for 0 < a < 1; cheaper on the VPU than where().
    return jnp.maximum(x, NEG_SLOPE * x)


def generator_kernel(x_ref,
                     w1_ref, b1_ref,
                     w2_ref, b2_ref,
                     w3_ref, b3_ref,
                     w4_ref, b4_ref,
                     out_ref):
    """One batch tile through the whole MLP; weights are VMEM-resident."""

    def linear(h_bf16, w_ref, b_ref):
        # bf16 x bf16 on the MXU, f32 accumulation, f32 bias add.
        return jnp.dot(h_bf16, w_ref[...],
                       preferred_element_type=jnp.float32) + b_ref[...]

    h = _leaky_relu(linear(x_ref[...], w1_ref, b1_ref))                # (TB, 256)  f32
    h = _leaky_relu(linear(h.astype(jnp.bfloat16), w2_ref, b2_ref))    # (TB, 512)
    h = _leaky_relu(linear(h.astype(jnp.bfloat16), w3_ref, b3_ref))    # (TB, 1024)
    y = jnp.tanh(linear(h.astype(jnp.bfloat16), w4_ref, b4_ref))       # (TB, 784)
    out_ref[...] = y.astype(out_ref.dtype)


def prepare_params(params):
    """Pad layer-1 K (100 -> 128) and cast weights to bf16 (biases stay f32)."""
    (w1, b1), (w2, b2), (w3, b3), (w4, b4) = params
    w1p = jnp.zeros((K1_PAD, w1.shape[1]), jnp.float32).at[: w1.shape[0]].set(w1)
    return [
        (w1p.astype(jnp.bfloat16), b1),
        (w2.astype(jnp.bfloat16), b2),
        (w3.astype(jnp.bfloat16), b3),
        (w4.astype(jnp.bfloat16), b4),
    ]


def _choose_tb(B, max_tb=1024):
    """Pick a batch tile that minimizes padding, prefers >=2 grid steps
    (so v7x's 2 TensorCores both get work) and, on ties, larger tiles."""
    b = _round_up(B, 16)          # bf16 sublane packing is (16, 128)
    if b <= 128:
        return b                  # tiny batch: single tile, weight-DMA bound anyway
    best_tb, best_key = None, None
    for cand in (128, 256, 512, 1024):
        if cand > max_tb:
            continue
        bpad = _round_up(b, cand)
        steps = bpad // cand
        key = (bpad - b, 0 if steps >= 2 else 1, -cand)
        if best_key is None or key < best_key:
            best_key, best_tb = key, cand
    return best_tb


@jax.jit
def generator_forward(x, prepared_params):
    """x: (B, 100) f32 -> (B, 784) f32."""
    (w1, b1), (w2, b2), (w3, b3), (w4, b4) = prepared_params
    B = x.shape[0]

    TB = _choose_tb(B)
    B_pad = _round_up(_round_up(B, 16), TB)

    # Zero-pad batch rows and the K dim (100 -> 128), already in bf16.
    # Padded W1 rows are zero, so the extra K columns contribute nothing.
    x_pad = jnp.zeros((B_pad, K1_PAD), jnp.bfloat16)
    x_pad = x_pad.at[:B, : x.shape[1]].set(x.astype(jnp.bfloat16))

    # Constant index_map => weight/bias tiles stay VMEM-resident across steps.
    resident = lambda arr: pl.BlockSpec(arr.shape, lambda i: (0, 0))

    out = pl.pallas_call(
        generator_kernel,
        out_shape=jax.ShapeDtypeStruct((B_pad, OUT_DIM), jnp.float32),
        grid=(B_pad // TB,),
        in_specs=[
            pl.BlockSpec((TB, K1_PAD), lambda i: (i, 0)),   # x tile streams
            resident(w1), resident(b1),
            resident(w2), resident(b2),
            resident(w3), resident(b3),
            resident(w4), resident(b4),
        ],
        out_specs=pl.BlockSpec((TB, OUT_DIM), lambda i: (i, 0)),
        compiler_params=pltpu.CompilerParams(
            dimension_semantics=("parallel",),   # v7x: shard batch over 2 TCs
            vmem_limit_bytes=48 << 20,           # ~20 MiB worst case << 48 MiB
        ),
    )(x_pad, w1, b1, w2, b2, w3, b3, w4, b4)

    return out if B == B_pad else out[:B]


def init_params(key):
    """Deterministic init mimicking PyTorch nn.Linear defaults
    (uniform(-1/sqrt(fan_in), 1/sqrt(fan_in)) for both W and b)."""
    params = []
    for fan_in, fan_out in LAYER_DIMS:
        key, kw, kb = jax.random.split(key, 3)
        bound = 1.0 / jnp.sqrt(fan_in)
        w = jax.random.uniform(kw, (fan_in, fan_out), jnp.float32, -bound, bound)
        b = jax.random.uniform(kb, (1, fan_out), jnp.float32, -bound, bound)
        params.append((w, b))
    return params


def reference_forward(x, params):
    """Pure-JAX reference mirroring the kernel math (bf16 matmul inputs,
    f32 accumulation, f32 elementwise)."""
    h = x
    for i, (w, b) in enumerate(params):
        h = jnp.dot(h.astype(jnp.bfloat16), w.astype(jnp.bfloat16),
                    preferred_element_type=jnp.float32) + b
        h = _leaky_relu(h) if i < 3 else jnp.tanh(h)
    return h


if __name__ == "__main__":
    key = jax.random.PRNGKey(0)
    k_params, k_x1, k_x2 = jax.random.split(key, 3)

    params = init_params(k_params)
    prepared = prepare_params(params)

    # Small latent batch (single-tile path).
    B = 8
    x = jax.random.normal(k_x1, (B, 100), jnp.float32)
    out = jax.block_until_ready(generator_forward(x, prepared))
    ref = reference_forward(x, params)
    assert out.shape == (B, OUT_DIM), out.shape
    assert bool(jnp.all(jnp.isfinite(out)))
    assert jnp.allclose(out, ref, atol=1e-2, rtol=1e-2), (
        f"mismatch (B=8): max abs err {jnp.max(jnp.abs(out - ref))}")

    # Non-multiple batch (multi-step grid + adaptive tiling + row un-pad).
    B2 = 200
    x2 = jax.random.normal(k_x2, (B2, 100), jnp.float32)
    out2 = jax.block_until_ready(generator_forward(x2, prepared))
    ref2 = reference_forward(x2, params)
    assert out2.shape == (B2, OUT_DIM), out2.shape
    assert bool(jnp.all(jnp.isfinite(out2)))
    assert jnp.allclose(out2, ref2, atol=1e-2, rtol=1e-2), (
        f"mismatch (B=200): max abs err {jnp.max(jnp.abs(out2 - ref2))}")

    print("KERNEL_OK")
</pallas_src>

<mosaic_0001>
module attributes {stable_mosaic.version = 11 : i64} {
  func.func @generator_kernel(%arg0: i32, %arg1: memref<16x128xbf16, #tpu.memory_space<vmem>>, %arg2: memref<128x256xbf16, #tpu.memory_space<vmem>>, %arg3: memref<1x256xf32, #tpu.memory_space<vmem>>, %arg4: memref<256x512xbf16, #tpu.memory_space<vmem>>, %arg5: memref<1x512xf32, #tpu.memory_space<vmem>>, %arg6: memref<512x1024xbf16, #tpu.memory_space<vmem>>, %arg7: memref<1x1024xf32, #tpu.memory_space<vmem>>, %arg8: memref<1024x784xbf16, #tpu.memory_space<vmem>>, %arg9: memref<1x784xf32, #tpu.memory_space<vmem>>, %arg10: memref<16x784xf32, #tpu.memory_space<vmem>>) attributes {dimension_semantics = [#tpu.dimension_semantics<parallel>], iteration_bounds = array<i64: 1>, scalar_prefetch = 0 : i64, scratch_operands = 0 : i64, tpu.core_type = #tpu.core_type<tc>, window_params = [{transform_indices = @transform_0, window_bounds = array<i64: 16, 128>}, {pipeline_mode = #tpu.pipeline_mode<synchronous>, transform_indices = @transform_1, window_bounds = array<i64: 128, 256>}, {pipeline_mode = #tpu.pipeline_mode<synchronous>, transform_indices = @transform_2, window_bounds = array<i64: 1, 256>}, {pipeline_mode = #tpu.pipeline_mode<synchronous>, transform_indices = @transform_3, window_bounds = array<i64: 256, 512>}, {pipeline_mode = #tpu.pipeline_mode<synchronous>, transform_indices = @transform_4, window_bounds = array<i64: 1, 512>}, {pipeline_mode = #tpu.pipeline_mode<synchronous>, transform_indices = @transform_5, window_bounds = array<i64: 512, 1024>}, {pipeline_mode = #tpu.pipeline_mode<synchronous>, transform_indices = @transform_6, window_bounds = array<i64: 1, 1024>}, {pipeline_mode = #tpu.pipeline_mode<synchronous>, transform_indices = @transform_7, window_bounds = array<i64: 1024, 784>}, {pipeline_mode = #tpu.pipeline_mode<synchronous>, transform_indices = @transform_8, window_bounds = array<i64: 1, 784>}, {transform_indices = @transform_9, window_bounds = array<i64: 16, 784>}]} {
    %c0 = arith.constant 0 : index
    %c0_0 = arith.constant 0 : index
    %0 = vector.load %arg1[%c0, %c0_0] : memref<16x128xbf16, #tpu.memory_space<vmem>>, vector<16x128xbf16>
    %c0_1 = arith.constant 0 : index
    %c0_2 = arith.constant 0 : index
    %1 = vector.load %arg2[%c0_1, %c0_2] : memref<128x256xbf16, #tpu.memory_space<vmem>>, vector<128x256xbf16>
    %cst = arith.constant dense<0.000000e+00> : vector<16x256xf32>
    %2 = tpu.matmul %0, %1, %cst {dimension_numbers = #tpu.dot_dimension_numbers<[1], [0], [0], [1], [0, 0, 1, 1], [], []>} : vector<16x128xbf16>, vector<128x256xbf16>, vector<16x256xf32> -> vector<16x256xf32>
    %c0_3 = arith.constant 0 : index
    %c0_4 = arith.constant 0 : index
    %3 = vector.load %arg3[%c0_3, %c0_4] : memref<1x256xf32, #tpu.memory_space<vmem>>, vector<1x256xf32>
    %4 = vector.broadcast %3 : vector<1x256xf32> to vector<16x256xf32>
    %5 = arith.addf %2, %4 : vector<16x256xf32>
    %cst_5 = arith.constant 0.00999999977 : f32
    %6 = vector.broadcast %cst_5 : f32 to vector<16x256xf32>
    %7 = arith.mulf %6, %5 : vector<16x256xf32>
    %8 = arith.maximumf %5, %7 : vector<16x256xf32>
    %9 = arith.truncf %8 : vector<16x256xf32> to vector<16x256xbf16>
    %c0_6 = arith.constant 0 : index
    %c0_7 = arith.constant 0 : index
    %10 = vector.load %arg4[%c0_6, %c0_7] : memref<256x512xbf16, #tpu.memory_space<vmem>>, vector<256x512xbf16>
    %cst_8 = arith.constant dense<0.000000e+00> : vector<16x512xf32>
    %11 = tpu.matmul %9, %10, %cst_8 {dimension_numbers = #tpu.dot_dimension_numbers<[1], [0], [0], [1], [0, 0, 1, 1], [], []>} : vector<16x256xbf16>, vector<256x512xbf16>, vector<16x512xf32> -> vector<16x512xf32>
    %c0_9 = arith.constant 0 : index
    %c0_10 = arith.constant 0 : index
    %12 = vector.load %arg5[%c0_9, %c0_10] : memref<1x512xf32, #tpu.memory_space<vmem>>, vector<1x512xf32>
    %13 = vector.broadcast %12 : vector<1x512xf32> to vector<16x512xf32>
    %14 = arith.addf %11, %13 : vector<16x512xf32>
    %cst_11 = arith.constant 0.00999999977 : f32
    %15 = vector.broadcast %cst_11 : f32 to vector<16x512xf32>
    %16 = arith.mulf %15, %14 : vector<16x512xf32>
    %17 = arith.maximumf %14, %16 : vector<16x512xf32>
    %18 = arith.truncf %17 : vector<16x512xf32> to vector<16x512xbf16>
    %c0_12 = arith.constant 0 : index
    %c0_13 = arith.constant 0 : index
    %19 = vector.load %arg6[%c0_12, %c0_13] : memref<512x1024xbf16, #tpu.memory_space<vmem>>, vector<512x1024xbf16>
    %cst_14 = arith.constant dense<0.000000e+00> : vector<16x1024xf32>
    %20 = tpu.matmul %18, %19, %cst_14 {dimension_numbers = #tpu.dot_dimension_numbers<[1], [0], [0], [1], [0, 0, 1, 1], [], []>} : vector<16x512xbf16>, vector<512x1024xbf16>, vector<16x1024xf32> -> vector<16x1024xf32>
    %c0_15 = arith.constant 0 : index
    %c0_16 = arith.constant 0 : index
    %21 = vector.load %arg7[%c0_15, %c0_16] : memref<1x1024xf32, #tpu.memory_space<vmem>>, vector<1x1024xf32>
    %22 = vector.broadcast %21 : vector<1x1024xf32> to vector<16x1024xf32>
    %23 = arith.addf %20, %22 : vector<16x1024xf32>
    %cst_17 = arith.constant 0.00999999977 : f32
    %24 = vector.broadcast %cst_17 : f32 to vector<16x1024xf32>
    %25 = arith.mulf %24, %23 : vector<16x1024xf32>
    %26 = arith.maximumf %23, %25 : vector<16x1024xf32>
    %27 = arith.truncf %26 : vector<16x1024xf32> to vector<16x1024xbf16>
    %c0_18 = arith.constant 0 : index
    %c0_19 = arith.constant 0 : index
    %28 = vector.load %arg8[%c0_18, %c0_19] : memref<1024x784xbf16, #tpu.memory_space<vmem>>, vector<1024x784xbf16>
    %cst_20 = arith.constant dense<0.000000e+00> : vector<16x784xf32>
    %29 = tpu.matmul %27, %28, %cst_20 {dimension_numbers = #tpu.dot_dimension_numbers<[1], [0], [0], [1], [0, 0, 1, 1], [], []>} : vector<16x1024xbf16>, vector<1024x784xbf16>, vector<16x784xf32> -> vector<16x784xf32>
    %c0_21 = arith.constant 0 : index
    %c0_22 = arith.constant 0 : index
    %30 = vector.load %arg9[%c0_21, %c0_22] : memref<1x784xf32, #tpu.memory_space<vmem>>, vector<1x784xf32>
    %31 = vector.broadcast %30 : vector<1x784xf32> to vector<16x784xf32>
    %32 = arith.addf %29, %31 : vector<16x784xf32>
    %33 = math.tanh %32 : vector<16x784xf32>
    %c0_23 = arith.constant 0 : index
    %c0_24 = arith.constant 0 : index
    %34 = vector.load %arg10[%c0_23, %c0_24] : memref<16x784xf32, #tpu.memory_space<vmem>>, vector<16x784xf32>
    tpu.vector_store %arg10[%c0_23, %c0_24], %33 {strides = array<i32>} : memref<16x784xf32, #tpu.memory_space<vmem>>, vector<16x784xf32>,
    return
  }
  func.func @transform_0(%arg0: i32) -> (i32, i32) {
    %c0_i32 = arith.constant 0 : i32
    %c0_i32_0 = arith.constant 0 : i32
    return %arg0, %c0_i32 : i32, i32
  }
  func.func @transform_1(%arg0: i32) -> (i32, i32) {
    %c0_i32 = arith.constant 0 : i32
    %c0_i32_0 = arith.constant 0 : i32
    %c0_i32_1 = arith.constant 0 : i32
    return %c0_i32, %c0_i32_0 : i32, i32
  }
  func.func @transform_2(%arg0: i32) -> (i32, i32) {
    %c0_i32 = arith.constant 0 : i32
    %c0_i32_0 = arith.constant 0 : i32
    %c0_i32_1 = arith.constant 0 : i32
    return %c0_i32, %c0_i32_0 : i32, i32
  }
  func.func @transform_3(%arg0: i32) -> (i32, i32) {
    %c0_i32 = arith.constant 0 : i32
    %c0_i32_0 = arith.constant 0 : i32
    %c0_i32_1 = arith.constant 0 : i32
    return %c0_i32, %c0_i32_0 : i32, i32
  }
  func.func @transform_4(%arg0: i32) -> (i32, i32) {
    %c0_i32 = arith.constant 0 : i32
    %c0_i32_0 = arith.constant 0 : i32
    %c0_i32_1 = arith.constant 0 : i32
    return %c0_i32, %c0_i32_0 : i32, i32
  }
  func.func @transform_5(%arg0: i32) -> (i32, i32) {
    %c0_i32 = arith.constant 0 : i32
    %c0_i32_0 = arith.constant 0 : i32
    %c0_i32_1 = arith.constant 0 : i32
    return %c0_i32, %c0_i32_0 : i32, i32
  }
  func.func @transform_6(%arg0: i32) -> (i32, i32) {
    %c0_i32 = arith.constant 0 : i32
    %c0_i32_0 = arith.constant 0 : i32
    %c0_i32_1 = arith.constant 0 : i32
    return %c0_i32, %c0_i32_0 : i32, i32
  }
  func.func @transform_7(%arg0: i32) -> (i32, i32) {
    %c0_i32 = arith.constant 0 : i32
    %c0_i32_0 = arith.constant 0 : i32
    %c0_i32_1 = arith.constant 0 : i32
    return %c0_i32, %c0_i32_0 : i32, i32
  }
  func.func @transform_8(%arg0: i32) -> (i32, i32) {
    %c0_i32 = arith.constant 0 : i32
    %c0_i32_0 = arith.constant 0 : i32
    %c0_i32_1 = arith.constant 0 : i32
    return %c0_i32, %c0_i32_0 : i32, i32
  }
  func.func @transform_9(%arg0: i32) -> (i32, i32) {
    %c0_i32 = arith.constant 0 : i32
    %c0_i32_0 = arith.constant 0 : i32
    return %arg0, %c0_i32 : i32, i32
  }
}

</mosaic_0001>

<bundles_post_ra>
// kernel: generator_forward.1
= control target key start
LH: loop header
LB: loop body
LE: loop exit
PB: predicated region body
PF: predicated region fallthrough
CT: control target
= control target key end

     0   :  { %vm6384_vm0 = vcmask 130048   ;;  %s15454_s1 = inlined_call_operand.vmem [shape: bf16[128,256], index: 1, kind: input, shape index: {}]   ;;  %s15455_s3 = inlined_call_operand.vmem [shape: bf16[256,512], index: 3, kind: input, shape index: {}]   ;;  %s15456_s0 = inlined_call_operand.vmem [shape: bf16[16,128], index: 0, kind: input, shape index: {}]   ;;  %s15457_s2 = inlined_call_operand.vmem [shape: f32[1,256], index: 2, kind: input, shape index: {}]   ;;  %s15458_s5 = inlined_call_operand.vmem [shape: bf16[512,1024], index: 5, kind: input, shape index: {}]   ;;  %s15459_s4 = inlined_call_operand.vmem [shape: f32[1,512], index: 4, kind: input, shape index: {}]   ;;  %s15460_s7 = inlined_call_operand.vmem [shape: bf16[1024,784], index: 7, kind: input, shape index: {}]   ;;  %s15461_s6 = inlined_call_operand.vmem [shape: f32[1,1024], index: 6, kind: input, shape index: {}]   ;;  %s15462_s8 = inlined_call_operand.vmem [shape: f32[1,784], index: 8, kind: input, shape index: {}]   ;;  %s15463_s9 = inlined_call_operand.vmem [shape: f32[16,784], index: 9, kind: output, shape index: {}]  }
   0x1   :  { %v6459_v0 = vld [vmem:[%s15454_s1 + $0x70] sm:$0xf]  ;;  %v9553_v1 = vld [vmem:[%s15454_s1 + $0x74] sm:$0xf0]  ;;  %v9552_v2 = vld [vmem:[%s15454_s1 + $0x74] sm:$0xf] }
   0x2   :  { %v6460_v3 = vor.u32 %v9553_v1, %v6459_v0  ;;  %v6461_v4 = vld [vmem:[%s15454_s1 + $0x78] sm:$0xf0]  ;;  %v6451_v5 = vld [vmem:[%s15454_s1 + $0x60] sm:$0xf]  ;;  %v9551_v6 = vld [vmem:[%s15454_s1 + $0x64] sm:$0xf0] }
   0x3   :  { %v6464_v7 = vor.u32 %v9552_v2, %v6461_v4  ;;  %v9550_v8 = vld [vmem:[%s15454_s1 + $0x64] sm:$0xf]  ;;  %v6453_v9 = vld [vmem:[%s15454_s1 + $0x68] sm:$0xf0]  ;;  %v6452_v10 = vor.u32 %v9551_v6, %v6451_v5  ;;  %v6443_v12 = vld [vmem:[%s15454_s1 + $0x50] sm:$0xf] }
   0x4   :  { %142 = vmatpush.bf16.msra.mxu0 %v6460_v3  ;;  %v6456_v11 = vor.u32 %v9550_v8, %v6453_v9  ;;  %v9549_v13 = vld [vmem:[%s15454_s1 + $0x54] sm:$0xf0]  ;;  %v9548_v14 = vld [vmem:[%s15454_s1 + $0x54] sm:$0xf]  ;;  %v6445_v15 = vld [vmem:[%s15454_s1 + $0x58] sm:$0xf0] }
   0x5   :  { %156 = vmatpush.bf16.msra.mxu1 %v6464_v7  ;;  %v6444_v16 = vor.u32 %v9549_v13, %v6443_v12  ;;  %v6448_v17 = vor.u32 %v9548_v14, %v6445_v15  ;;  %v6435_v18 = vld [vmem:[%s15454_s1 + $0x40] sm:$0xf]  ;;  %v9547_v19 = vld [vmem:[%s15454_s1 + $0x44] sm:$0xf0]  ;;  %v9546_v20 = vld [vmem:[%s15454_s1 + $0x44] sm:$0xf] }
   0x6   :  { %v6437_v21 = vld [vmem:[%s15454_s1 + $0x48] sm:$0xf0]  ;;  %v6436_v22 = vor.u32 %v9547_v19, %v6435_v18  ;;  %v6579_v23 = vld [vmem:[%s15455_s3 + $0xe0] sm:$0xf]  ;;  %v9584_v24 = vld [vmem:[%s15455_s3 + $0xec] sm:$0xf0] }
   0x7   :  { %v6707_v25 = vld [vmem:[%s15455_s3 + $0x1e0] sm:$0xf]  ;;  %v6440_v26 = vor.u32 %v9546_v20, %v6437_v21  ;;  %v6427_v27 = vld [vmem:[%s15454_s1 + $0x30] sm:$0xf]  ;;  %v9545_v28 = vld [vmem:[%s15454_s1 + $0x34] sm:$0xf0]  ;;  %v6580_v29 = vor.u32 %v9584_v24, %v6579_v23 }
   0x8   :  { %143 = vmatpush.bf16.msra.mxu0 %v6452_v10  ;;  %v9616_v30 = vld [vmem:[%s15455_s3 + $0x1ec] sm:$0xf0]  ;;  %v9544_v31 = vld [vmem:[%s15454_s1 + $0x34] sm:$0xf]  ;;  %v6429_v32 = vld [vmem:[%s15454_s1 + $0x38] sm:$0xf0]  ;;  %v6428_v38 = vor.u32 %v9545_v28, %v6427_v27 }
   0x9   :  { %157 = vmatpush.bf16.msra.mxu1 %v6456_v11  ;;  %v6708_v33 = vor.u32 %v9616_v30, %v6707_v25  ;;  %v6563_v34 = vld [vmem:[%s15455_s3 + $0xc0] sm:$0xf]  ;;  %574 = vmatpush.bf16.msra.mxu2 %v6580_v29  ;;  %v9580_v35 = vld [vmem:[%s15455_s3 + $0xcc] sm:$0xf0]  ;;  %v9543_v40 = vld [vmem:[%s15454_s1 + $0x24] sm:$0xf0]  ;;  %v6432_v43 = vor.u32 %v9544_v31, %v6429_v32 }
   0xa   :  { %v6691_v36 = vld [vmem:[%s15455_s3 + $0x1c0] sm:$0xf]  ;;  %v9612_v37 = vld [vmem:[%s15455_s3 + $0x1cc] sm:$0xf0]  ;;  %v6564_v41 = vor.u32 %v9580_v35, %v6563_v34  ;;  %v9542_v44 = vld [vmem:[%s15454_s1 + $0x24] sm:$0xf] }
   0xb   :  { %v6419_v39 = vld [vmem:[%s15454_s1 + $0x20] sm:$0xf]  ;;  %588 = vmatpush.bf16.msra.mxu3 %v6708_v33  ;;  %v6692_v42 = vor.u32 %v9612_v37, %v6691_v36  ;;  %v9576_v46 = vld [vmem:[%s15455_s3 + $0xac] sm:$0xf0]  ;;  %v6421_v47 = vld [vmem:[%s15454_s1 + $0x28] sm:$0xf0] }
   0xc   :  { %144 = vmatpush.bf16.msra.mxu0 %v6444_v16  ;;  %v6547_v45 = vld [vmem:[%s15455_s3 + $0xa0] sm:$0xf]  ;;  %v9608_v49 = vld [vmem:[%s15455_s3 + $0x1ac] sm:$0xf0]  ;;  %v6420_v51 = vor.u32 %v9543_v40, %v6419_v39  ;;  %v6424_v56 = vor.u32 %v9542_v44, %v6421_v47  ;;  %v9541_v57 = vld [vmem:[%s15454_s1 + $0x14] sm:$0xf0] }
   0xd   :  { %158 = vmatpush.bf16.msra.mxu1 %v6448_v17  ;;  %v6675_v48 = vld [vmem:[%s15455_s3 + $0x1a0] sm:$0xf]  ;;  %575 = vmatpush.bf16.msra.mxu2 %v6564_v41  ;;  %v6548_v50 = vor.u32 %v9576_v46, %v6547_v45  ;;  %v6411_v52 = vld [vmem:[%s15454_s1 + $0x10] sm:$0xf]  ;;  %v9540_v60 = vld [vmem:[%s15454_s1 + $0x14] sm:$0xf] }
   0xe   :  { %v6676_v53 = vor.u32 %v9608_v49, %v6675_v48  ;;  %v6531_v54 = vld [vmem:[%s15455_s3 + $0x80] sm:$0xf]  ;;  %v9572_v55 = vld [vmem:[%s15455_s3 + $0x8c] sm:$0xf0]  ;;  %v6413_v61 = vld [vmem:[%s15454_s1 + $0x18] sm:$0xf0]  ;;  %v6412_v0 = vor.u32 %v9541_v57, %v6411_v52 }
   0xf   :  { %589 = vmatpush.bf16.msra.mxu3 %v6692_v42  ;;  %v6659_v58 = vld [vmem:[%s15455_s3 + $0x180] sm:$0xf]  ;;  %v9604_v59 = vld [vmem:[%s15455_s3 + $0x18c] sm:$0xf0]  ;;  %v6532_v63 = vor.u32 %v9572_v55, %v6531_v54  ;;  %v9539_v1 = vld [vmem:[%s15454_s1 + $0x4] sm:$0xf0]  ;;  %v6416_v5 = vor.u32 %v9540_v60, %v6413_v61 }
  0x10   :  { %145 = vmatpush.bf16.msra.mxu0 %v6436_v22  ;;  %v6403_v62 = vld [vmem:[%s15454_s1] sm:$0xf]  ;;  %v6660_v2 = vor.u32 %v9604_v59, %v6659_v58  ;;  %v9568_v4 = vld [vmem:[%s15455_s3 + $0x6c] sm:$0xf0]  ;;  %v9538_v6 = vld [vmem:[%s15454_s1 + $0x4] sm:$0xf] }
  0x11   :  { %159 = vmatpush.bf16.msra.mxu1 %v6440_v26  ;;  %576 = vmatpush.bf16.msra.mxu2 %v6548_v50  ;;  %v6515_v3 = vld [vmem:[%s15455_s3 + $0x60] sm:$0xf]  ;;  %v9600_v8 = vld [vmem:[%s15455_s3 + $0x16c] sm:$0xf0]  ;;  %v6405_v9 = vld [vmem:[%s15454_s1 + $0x8] sm:$0xf0]  ;;  %v6404_v15 = vor.u32 %v9539_v1, %v6403_v62 }
  0x12   :  { %v6643_v7 = vld [vmem:[%s15455_s3 + $0x160] sm:$0xf]  ;;  %v9582_v10 = vld [vmem:[%s15455_s3 + $0xe4] sm:$0xf]  ;;  %v6581_v11 = vld [vmem:[%s15455_s3 + $0xf0] sm:$0xf0]  ;;  %v6516_v14 = vor.u32 %v9568_v4, %v6515_v3  ;;  %v6408_v19 = vor.u32 %v9538_v6, %v6405_v9 }
  0x13   :  { %590 = vmatpush.bf16.msra.mxu3 %v6676_v53  ;;  %v9614_v12 = vld [vmem:[%s15455_s3 + $0x1e4] sm:$0xf]  ;;  %v6709_v13 = vld [vmem:[%s15455_s3 + $0x1f0] sm:$0xf0]  ;;  %v6644_v16 = vor.u32 %v9600_v8, %v6643_v7  ;;  %v6499_v17 = vld [vmem:[%s15455_s3 + $0x40] sm:$0xf]  ;;  %v6584_v20 = vor.u32 %v9582_v10, %v6581_v11 }
  0x14   :  { %146 = vmatpush.bf16.msra.mxu0 %v6428_v38  ;;  %v9564_v18 = vld [vmem:[%s15455_s3 + $0x4c] sm:$0xf0]  ;;  %v6627_v21 = vld [vmem:[%s15455_s3 + $0x140] sm:$0xf]  ;;  %v6712_v23 = vor.u32 %v9614_v12, %v6709_v13  ;;  %v9578_v24 = vld [vmem:[%s15455_s3 + $0xc4] sm:$0xf] }
  0x15   :  { %160 = vmatpush.bf16.msra.mxu1 %v6432_v43  ;;  %577 = vmatpush.bf16.msra.mxu2 %v6532_v63  ;;  %v9596_v22 = vld [vmem:[%s15455_s3 + $0x14c] sm:$0xf0]  ;;  %v6565_v25 = vld [vmem:[%s15455_s3 + $0xd0] sm:$0xf0]  ;;  %v9537_v26 = vld [vmem:[%s15456_s0] sm:$0xff]  ;;  %v6500_v29 = vor.u32 %v9564_v18, %v6499_v17 }
  0x16   :  { %v9610_v27 = vld [vmem:[%s15455_s3 + $0x1c4] sm:$0xf]  ;;  %v6693_v28 = vld [vmem:[%s15455_s3 + $0x1d0] sm:$0xf0]  ;;  %v6628_v30 = vor.u32 %v9596_v22, %v6627_v21  ;;  %v6483_v31 = vld [vmem:[%s15455_s3 + $0x20] sm:$0xf]  ;;  %v6568_v33 = vor.u32 %v9578_v24, %v6565_v25 }
  0x17   :  { %591 = vmatpush.bf16.msra.mxu3 %v6660_v2  ;;  %v9560_v32 = vld [vmem:[%s15455_s3 + $0x2c] sm:$0xf0]  ;;  %v6611_v34 = vld [vmem:[%s15455_s3 + $0x120] sm:$0xf]  ;;  %v6696_v36 = vor.u32 %v9610_v27, %v6693_v28  ;;  %v9574_v37 = vld [vmem:[%s15455_s3 + $0xa4] sm:$0xf] }
  0x18   :  { %147 = vmatpush.bf16.msra.mxu0 %v6420_v51  ;;  %v9592_v35 = vld [vmem:[%s15455_s3 + $0x12c] sm:$0xf0]  ;;  %v6549_v38 = vld [vmem:[%s15455_s3 + $0xb0] sm:$0xf0]  ;;  %v9606_v39 = vld [vmem:[%s15455_s3 + $0x1a4] sm:$0xf]  ;;  %v6484_v41 = vor.u32 %v9560_v32, %v6483_v31 }
  0x19   :  { %161 = vmatpush.bf16.msra.mxu1 %v6424_v56  ;;  %578 = vmatpush.bf16.msra.mxu2 %v6516_v14  ;;  %v6677_v40 = vld [vmem:[%s15455_s3 + $0x1b0] sm:$0xf0]  ;;  %v6612_v42 = vor.u32 %v9592_v35, %v6611_v34  ;;  %v6552_v43 = vor.u32 %v9574_v37, %v6549_v38  ;;  %v9570_v45 = vld [vmem:[%s15455_s3 + $0x84] sm:$0xf]  ;;  %v9556_v6 = vld [vmem:[%s15455_s3 + $0xc] sm:$0xf0] }
  0x1a   :  { %v6680_v44 = vor.u32 %v9606_v39, %v6677_v40  ;;  %v6533_v46 = vld [vmem:[%s15455_s3 + $0x90] sm:$0xf0]  ;;  %v9602_v47 = vld [vmem:[%s15455_s3 + $0x184] sm:$0xf]  ;;  %v6595_v7 = vld [vmem:[%s15455_s3 + $0x100] sm:$0xf] }
  0x1b   :  { %592 = vmatpush.bf16.msra.mxu3 %v6644_v16  ;;  %v6661_v48 = vld [vmem:[%s15455_s3 + $0x190] sm:$0xf0]  ;;  %v6536_v49 = vor.u32 %v9570_v45, %v6533_v46  ;;  %v9566_v51 = vld [vmem:[%s15455_s3 + $0x64] sm:$0xf]  ;;  %v9588_v9 = vld [vmem:[%s15455_s3 + $0x10c] sm:$0xf0] }
  0x1c   :  { %148 = vmatpush.bf16.msra.mxu0 %v6412_v0  ;;  %v6664_v50 = vor.u32 %v9602_v47, %v6661_v48  ;;  %v6517_v52 = vld [vmem:[%s15455_s3 + $0x70] sm:$0xf0]  ;;  %v9598_v53 = vld [vmem:[%s15455_s3 + $0x164] sm:$0xf]  ;;  %v6596_v11 = vor.u32 %v9588_v9, %v6595_v7  ;;  %v6587_v17 = vld [vmem:[%s15455_s3 + $0xe8] sm:$0xf] }
  0x1d   :  { %162 = vmatpush.bf16.msra.mxu1 %v6416_v5  ;;  %579 = vmatpush.bf16.msra.mxu2 %v6500_v29  ;;  %v6645_v54 = vld [vmem:[%s15455_s3 + $0x170] sm:$0xf0]  ;;  %v6520_v55 = vor.u32 %v9566_v51, %v6517_v52  ;;  %v9562_v57 = vld [vmem:[%s15455_s3 + $0x44] sm:$0xf]  ;;  %v6467_v5 = vld [vmem:[%s15455_s3] sm:$0xf] }
  0x1e   :  { %v6648_v56 = vor.u32 %v9598_v53, %v6645_v54  ;;  %v6501_v58 = vld [vmem:[%s15455_s3 + $0x50] sm:$0xf0]  ;;  %v9594_v59 = vld [vmem:[%s15455_s3 + $0x144] sm:$0xf]  ;;  %v6468_v8 = vor.u32 %v9556_v6, %v6467_v5  ;;  %v9585_v18 = vld [vmem:[%s15455_s3 + $0xf4] sm:$0xf0] }
  0x1f   :  { %593 = vmatpush.bf16.msra.mxu3 %v6628_v30  ;;  %v6629_v60 = vld [vmem:[%s15455_s3 + $0x150] sm:$0xf0]  ;;  %v6504_v61 = vor.u32 %v9562_v57, %v6501_v58  ;;  %v9558_v63 = vld [vmem:[%s15455_s3 + $0x24] sm:$0xf]  ;;  %v9617_v21 = vld [vmem:[%s15455_s3 + $0x1f4] sm:$0xf0] }
  0x20   :  { %149 = vmatpush.bf16.msra.mxu0 %v6404_v15  ;;  %v6632_v62 = vor.u32 %v9594_v59, %v6629_v60  ;;  %v6485_v0 = vld [vmem:[%s15455_s3 + $0x30] sm:$0xf0]  ;;  %v9590_v1 = vld [vmem:[%s15455_s3 + $0x124] sm:$0xf]  ;;  %v9583_v22 = vld [vmem:[%s15455_s3 + $0xec] sm:$0xf] }
  0x21   :  { %163 = vmatpush.bf16.msra.mxu1 %v6408_v19  ;;  %580 = vmatpush.bf16.msra.mxu2 %v6484_v41  ;;  %v6613_v2 = vld [vmem:[%s15455_s3 + $0x130] sm:$0xf0]  ;;  %v6488_v3 = vor.u32 %v9558_v63, %v6485_v0  ;;  %v9554_v10 = vld [vmem:[%s15455_s3 + $0x4] sm:$0xf]  ;;  %v6715_v19 = vld [vmem:[%s15455_s3 + $0x1e8] sm:$0xf] }
  0x22   :  { %v6616_v4 = vor.u32 %v9590_v1, %v6613_v2  ;;  %v6469_v12 = vld [vmem:[%s15455_s3 + $0x10] sm:$0xf0]  ;;  %v9586_v13 = vld [vmem:[%s15455_s3 + $0x104] sm:$0xf]  ;;  %v6716_v24 = vor.u32 %v9617_v21, %v6715_v19  ;;  %v6717_v27 = vld [vmem:[%s15455_s3 + $0x1f8] sm:$0xf0] }
  0x23   :  { %150 = vmatmul.bf16.vlgmr.msra.gmra.mxu0 %v9537_v26  ;;  %594 = vmatpush.bf16.msra.mxu3 %v6612_v42  ;;  %v6597_v14 = vld [vmem:[%s15455_s3 + $0x110] sm:$0xf0]  ;;  %v6472_v15 = vor.u32 %v9554_v10, %v6469_v12  ;;  %v6571_v28 = vld [vmem:[%s15455_s3 + $0xc8] sm:$0xf]  ;;  %v9581_v30 = vld [vmem:[%s15455_s3 + $0xd4] sm:$0xf0] }
  0x24   :  { %602 = vmatpush.bf16.msrb.mxu0 %v6584_v20  ;;  %164 = vmatmul.bf16.vlgmr.msra.gmra.mxu1 %v9537_v26  ;;  %v6600_v16 = vor.u32 %v9586_v13, %v6597_v14  ;;  %v6588_v20 = vor.u32 %v9585_v18, %v6587_v17  ;;  %v9615_v26 = vld [vmem:[%s15455_s3 + $0x1ec] sm:$0xf]  ;;  %v6699_v31 = vld [vmem:[%s15455_s3 + $0x1c8] sm:$0xf]  ;;  %v9613_v32 = vld [vmem:[%s15455_s3 + $0x1d4] sm:$0xf0] }
  0x25   :  { %616 = vmatpush.bf16.msrb.mxu1 %v6712_v23  ;;  %581 = vmatpush.bf16.msra.mxu2 %v6468_v8  ;;  %v6589_v23 = vld [vmem:[%s15455_s3 + $0xf8] sm:$0xf0]  ;;  %v6720_v29 = vor.u32 %v9615_v26, %v6717_v27  ;;  %v6700_v34 = vor.u32 %v9613_v32, %v6699_v31  ;;  %v9579_v35 = vld [vmem:[%s15455_s3 + $0xcc] sm:$0xf]  ;;  %v6555_v41 = vld [vmem:[%s15455_s3 + $0xa8] sm:$0xf] }
  0x26   :  { %v6592_v25 = vor.u32 %v9583_v22, %v6589_v23  ;;  %v9611_v37 = vld [vmem:[%s15455_s3 + $0x1cc] sm:$0xf]  ;;  %v6701_v39 = vld [vmem:[%s15455_s3 + $0x1d8] sm:$0xf0]  ;;  %v9577_v42 = vld [vmem:[%s15455_s3 + $0xb4] sm:$0xf0] }
  0x27   :  { %595 = vmatpush.bf16.msra.mxu3 %v6596_v11  ;;  %v6704_v40 = vor.u32 %v9611_v37, %v6701_v39  ;;  %v9609_v45 = vld [vmem:[%s15455_s3 + $0x1b4] sm:$0xf0]  ;;  %v9575_v46 = vld [vmem:[%s15455_s3 + $0xac] sm:$0xf]  ;;  %v6557_v47 = vld [vmem:[%s15455_s3 + $0xb8] sm:$0xf0] }
  0x28   :  { %603 = vmatpush.bf16.msrb.mxu0 %v6568_v33  ;;  %v6572_v33 = vor.u32 %v9581_v30, %v6571_v28  ;;  %v6685_v51 = vld [vmem:[%s15455_s3 + $0x1b8] sm:$0xf0]  ;;  %v6539_v53 = vld [vmem:[%s15455_s3 + $0x88] sm:$0xf]  ;;  %v9573_v54 = vld [vmem:[%s15455_s3 + $0x94] sm:$0xf0] }
  0x29   :  { %617 = vmatpush.bf16.msrb.mxu1 %v6696_v36  ;;  %630 = vmatpush.bf16.msrb.mxu2 %v6588_v20  ;;  %v6573_v36 = vld [vmem:[%s15455_s3 + $0xd8] sm:$0xf0]  ;;  %v9605_v57 = vld [vmem:[%s15455_s3 + $0x194] sm:$0xf0]  ;;  %v9571_v58 = vld [vmem:[%s15455_s3 + $0x8c] sm:$0xf] }
  0x2a   :  { %v6576_v38 = vor.u32 %v9579_v35, %v6573_v36  ;;  %v6541_v59 = vld [vmem:[%s15455_s3 + $0x98] sm:$0xf0]  ;;  %v6523_v1 = vld [vmem:[%s15455_s3 + $0x68] sm:$0xf]  ;;  %v9569_v2 = vld [vmem:[%s15455_s3 + $0x74] sm:$0xf0] }
  0x2b   :  { %644 = vmatpush.bf16.msrb.mxu3 %v6716_v24  ;;  %v6669_v63 = vld [vmem:[%s15455_s3 + $0x198] sm:$0xf0]  ;;  %v9601_v5 = vld [vmem:[%s15455_s3 + $0x174] sm:$0xf0]  ;;  %v9567_v6 = vld [vmem:[%s15455_s3 + $0x6c] sm:$0xf] }
  0x2c   :  { %604 = vmatpush.bf16.msrb.mxu0 %v6552_v43  ;;  %v6683_v43 = vld [vmem:[%s15455_s3 + $0x1a8] sm:$0xf]  ;;  %v6525_v7 = vld [vmem:[%s15455_s3 + $0x78] sm:$0xf0]  ;;  %v9599_v10 = vld [vmem:[%s15455_s3 + $0x16c] sm:$0xf] }
  0x2d   :  { %618 = vmatpush.bf16.msrb.mxu1 %v6680_v44  ;;  %631 = vmatpush.bf16.msrb.mxu2 %v6572_v33  ;;  %v6556_v44 = vor.u32 %v9577_v42, %v6555_v41  ;;  %v6684_v48 = vor.u32 %v9609_v45, %v6683_v43  ;;  %v6528_v9 = vor.u32 %v9567_v6, %v6525_v7  ;;  %v6653_v11 = vld [vmem:[%s15455_s3 + $0x178] sm:$0xf0]  ;;  %v6507_v12 = vld [vmem:[%s15455_s3 + $0x48] sm:$0xf]  ;;  %v9565_v14 = vld [vmem:[%s15455_s3 + $0x54] sm:$0xf0] }
  0x2e   :  { %v6656_v13 = vor.u32 %v9599_v10, %v6653_v11  ;;  %v9563_v17 = vld [vmem:[%s15455_s3 + $0x4c] sm:$0xf]  ;;  %v6509_v18 = vld [vmem:[%s15455_s3 + $0x58] sm:$0xf0]  ;;  %v6508_v20 = vor.u32 %v9565_v14, %v6507_v12  ;;  %v6491_v24 = vld [vmem:[%s15455_s3 + $0x28] sm:$0xf] }
  0x2f   :  { %645 = vmatpush.bf16.msrb.mxu3 %v6700_v34  ;;  %v9595_v19 = vld [vmem:[%s15455_s3 + $0x14c] sm:$0xf]  ;;  %v6637_v21 = vld [vmem:[%s15455_s3 + $0x158] sm:$0xf0]  ;;  %v6512_v23 = vor.u32 %v9563_v17, %v6509_v18  ;;  %v6619_v26 = vld [vmem:[%s15455_s3 + $0x128] sm:$0xf] }
  0x30   :  { %605 = vmatpush.bf16.msrb.mxu0 %v6536_v49  ;;  %v6560_v49 = vor.u32 %v9575_v46, %v6557_v47  ;;  %v6640_v27 = vor.u32 %v9595_v19, %v6637_v21  ;;  %v9593_v28 = vld [vmem:[%s15455_s3 + $0x134] sm:$0xf0]  ;;  %v6493_v30 = vld [vmem:[%s15455_s3 + $0x38] sm:$0xf0]  ;;  %v9591_v31 = vld [vmem:[%s15455_s3 + $0x12c] sm:$0xf] }
  0x31   :  { %619 = vmatpush.bf16.msrb.mxu1 %v6664_v50  ;;  %v9607_v50 = vld [vmem:[%s15455_s3 + $0x1ac] sm:$0xf]  ;;  %632 = vmatpush.bf16.msrb.mxu2 %v6556_v44  ;;  %v6621_v32 = vld [vmem:[%s15455_s3 + $0x138] sm:$0xf0]  ;;  %v6620_v34 = vor.u32 %v9593_v28, %v6619_v26  ;;  %v6475_v36 = vld [vmem:[%s15455_s3 + $0x8] sm:$0xf] }
  0x32   :  { %v6688_v52 = vor.u32 %v9607_v50, %v6685_v51  ;;  %v9557_v37 = vld [vmem:[%s15455_s3 + $0x14] sm:$0xf0]  ;;  %v6624_v39 = vor.u32 %v9591_v31, %v6621_v32  ;;  %v9555_v41 = vld [vmem:[%s15455_s3 + $0xc] sm:$0xf]  ;;  %v6477_v42 = vld [vmem:[%s15455_s3 + $0x18] sm:$0xf0] }
  0x33   :  { %646 = vmatpush.bf16.msrb.mxu3 %v6684_v48  ;;  %v9587_v43 = vld [vmem:[%s15455_s3 + $0x10c] sm:$0xf]  ;;  %v6605_v44 = vld [vmem:[%s15455_s3 + $0x118] sm:$0xf0]  ;;  %v6476_v45 = vor.u32 %v9557_v37, %v6475_v36  ;;  %v50_v46 = vld [vmem:[%s15457_s2] sm:$0x3]  ;;  %v6480_v48 = vor.u32 %v9555_v41, %v6477_v42 }
  0x34   :  { %606 = vmatpush.bf16.msrb.mxu0 %v6520_v55  ;;  %v6667_v55 = vld [vmem:[%s15455_s3 + $0x188] sm:$0xf]  ;;  %v52_v51 = vperm.slane %v50_v46, 0  ;;  %v9870_v7 = vld [vmem:[%s15458_s5 + $0x7dc] sm:$0xf0] }
  0x35   :  { %620 = vmatpush.bf16.msrb.mxu1 %v6648_v56  ;;  %v6540_v56 = vor.u32 %v9573_v54, %v6539_v53  ;;  %v6668_v60 = vor.u32 %v9605_v57, %v6667_v55  ;;  %v53_v53 = vperm.slane %v50_v46, 1  ;;  %v7171_v14 = vld [vmem:[%s15458_s5 + $0x380] sm:$0xf] }
  0x36   :  { %v6915_v18 = vld [vmem:[%s15458_s5 + $0x180] sm:$0xf] }
  0x37   :  { %633 = vmatpush.bf16.msrb.mxu2 %v6540_v56  ;;  %647 = vmatpush.bf16.msrb.mxu3 %v6668_v60  ;;  %v9670_v19 = vld [vmem:[%s15458_s5 + $0x19c] sm:$0xf0] }
  0x38   :  { %607 = vmatpush.bf16.msrb.mxu0 %v6504_v61  ;;  %v6544_v61 = vor.u32 %v9571_v58, %v6541_v59  ;;  %v7683_v21 = vld [vmem:[%s15458_s5 + $0x780] sm:$0xf] }
  0x39   :  { %621 = vmatpush.bf16.msrb.mxu1 %v6632_v62  ;;  %v9603_v62 = vld [vmem:[%s15455_s3 + $0x18c] sm:$0xf]  ;;  %v9726_v28 = vld [vmem:[%s15458_s5 + $0x35c] sm:$0xf0] }
  0x3a   :  { %v6672_v0 = vor.u32 %v9603_v62, %v6669_v63  ;;  %v7203_v62 = vld [vmem:[%s15458_s5 + $0x3c0] sm:$0xf] }
  0x3b   :  { %v9662_v31 = vld [vmem:[%s15458_s5 + $0x15c] sm:$0xf0] }
  0x3c   :  { %608 = vmatpush.bf16.msrb.mxu0 %v6488_v3  ;;  %v6651_v3 = vld [vmem:[%s15455_s3 + $0x168] sm:$0xf]  ;;  %v7395_v36 = vld [vmem:[%s15458_s5 + $0x540] sm:$0xf] }
  0x3d   :  { %622 = vmatpush.bf16.msrb.mxu1 %v6616_v4  ;;  %v6524_v4 = vor.u32 %v9569_v2, %v6523_v1  ;;  %v6652_v8 = vor.u32 %v9601_v5, %v6651_v3  ;;  %v6947_v1 = vld [vmem:[%s15458_s5 + $0x1c0] sm:$0xf] }
  0x3e   :  { %v9678_v3 = vld [vmem:[%s15458_s5 + $0x1dc] sm:$0xf0] }
  0x3f   :  { %634 = vmatpush.bf16.msrb.mxu2 %v6524_v4  ;;  %648 = vmatpush.bf16.msrb.mxu3 %v6652_v8  ;;  %v7715_v4 = vld [vmem:[%s15458_s5 + $0x7c0] sm:$0xf] }
  0x40   :  { %609 = vmatpush.bf16.msrb.mxu0 %v6472_v15  ;;  %v6635_v15 = vld [vmem:[%s15455_s3 + $0x148] sm:$0xf]  ;;  %v7459_v8 = vld [vmem:[%s15458_s5 + $0x5c0] sm:$0xf] }
  0x41   :  { %623 = vmatpush.bf16.msrb.mxu1 %v6600_v16  ;;  %v9597_v16 = vld [vmem:[%s15455_s3 + $0x154] sm:$0xf0]  ;;  %v9790_v37 = vld [vmem:[%s15458_s5 + $0x55c] sm:$0xf0] }
  0x42   :  { %v6636_v22 = vor.u32 %v9597_v16, %v6635_v15  ;;  %v9734_v15 = vld [vmem:[%s15458_s5 + $0x39c] sm:$0xf0]  ;;  %v6948_v16 = vor.u32 %v9678_v3, %v6947_v1  ;;  %v7396_v46 = vor.u32 %v9790_v37, %v7395_v36  ;;  %v6917_v36 = vld [vmem:[%s15458_s5 + $0x1a0] sm:$0xf0] }
  0x43   :  { %635 = vmatpush.bf16.msrb.mxu2 %v6508_v20  ;;  %v7716_v20 = vor.u32 %v9870_v7, %v7715_v4  ;;  %v7172_v26 = vor.u32 %v9734_v15, %v7171_v14  ;;  %v6851_v42 = vld [vmem:[%s15458_s5 + $0x100] sm:$0xf] }
  0x44   :  { %658 = vmatpush.bf16.msra.mxu0 %v6592_v25  ;;  %v9561_v25 = vld [vmem:[%s15455_s3 + $0x34] sm:$0xf0]  ;;  %649 = vmatpush.bf16.msrb.mxu3 %v6636_v22  ;;  %v9702_v1 = vld [vmem:[%s15458_s5 + $0x29c] sm:$0xf0] }
  0x45   :  { %672 = vmatpush.bf16.msra.mxu1 %v6720_v29  ;;  %v9559_v29 = vld [vmem:[%s15455_s3 + $0x2c] sm:$0xf]  ;;  %v6492_v33 = vor.u32 %v9561_v25, %v6491_v24  ;;  %v7427_v24 = vld [vmem:[%s15458_s5 + $0x580] sm:$0xf] }
  0x46   :  { %v6496_v35 = vor.u32 %v9559_v29, %v6493_v30  ;;  %v9798_v25 = vld [vmem:[%s15458_s5 + $0x59c] sm:$0xf0]  ;;  %v6916_v29 = vor.u32 %v9670_v19, %v6915_v18  ;;  %v9738_v19 = vld [vmem:[%s15458_s5 + $0x3c4] sm:$0xf] }
  0x47   :  { %636 = vmatpush.bf16.msrb.mxu2 %v6492_v33  ;;  %v6883_v30 = vld [vmem:[%s15458_s5 + $0x140] sm:$0xf] }
  0x48   :  { %659 = vmatpush.bf16.msra.mxu0 %v6576_v38  ;;  %v6603_v38 = vld [vmem:[%s15455_s3 + $0x108] sm:$0xf]  ;;  %650 = vmatpush.bf16.msrb.mxu3 %v6620_v34  ;;  %v7651_v33 = vld [vmem:[%s15458_s5 + $0x740] sm:$0xf]  ;;  %v7428_v34 = vor.u32 %v9798_v25, %v7427_v24  ;;  %v6884_v41 = vor.u32 %v9662_v31, %v6883_v30  ;;  %v6949_v24 = vld [vmem:[%s15458_s5 + $0x1e0] sm:$0xf0] }
  0x49   :  { %673 = vmatpush.bf16.msra.mxu1 %v6704_v40  ;;  %v9589_v40 = vld [vmem:[%s15455_s3 + $0x114] sm:$0xf0]  ;;  %v9638_v3 = vld [vmem:[%s15458_s5 + $0x9c] sm:$0xf0]  ;;  %v7173_v30 = vld [vmem:[%s15458_s5 + $0x3a0] sm:$0xf0] }
  0x4a   :  { %v6604_v47 = vor.u32 %v9589_v40, %v6603_v38  ;;  %v9718_v40 = vld [vmem:[%s15458_s5 + $0x31c] sm:$0xf0] }
  0x4b   :  { %637 = vmatpush.bf16.msrb.mxu2 %v6476_v45  ;;  %v7619_v45 = vld [vmem:[%s15458_s5 + $0x700] sm:$0xf] }
  0x4c   :  { %660 = vmatpush.bf16.msra.mxu0 %v6560_v49  ;;  %v6608_v49 = vor.u32 %v9587_v43, %v6605_v44  ;;  %651 = vmatpush.bf16.msrb.mxu3 %v6604_v47  ;;  %v9654_v43 = vld [vmem:[%s15458_s5 + $0x11c] sm:$0xf0] }
  0x4d   :  { %674 = vmatpush.bf16.msra.mxu1 %v6688_v52  ;;  %v9846_v47 = vld [vmem:[%s15458_s5 + $0x71c] sm:$0xf0] }
  0x4e   :  { %v9830_v7 = vld [vmem:[%s15458_s5 + $0x69c] sm:$0xf0] }
  0x50   :  { %661 = vmatpush.bf16.msra.mxu0 %v6544_v61 }
  0x51   :  { %675 = vmatpush.bf16.msra.mxu1 %v6672_v0  ;;  %v9742_v0 = vld [vmem:[%s15458_s5 + $0x3dc] sm:$0xf0] }
  0x54   :  { %662 = vmatpush.bf16.msra.mxu0 %v6528_v9  ;;  %v9806_v9 = vld [vmem:[%s15458_s5 + $0x5dc] sm:$0xf0] }
  0x55   :  { %676 = vmatpush.bf16.msra.mxu1 %v6656_v13  ;;  %v7204_v13 = vor.u32 %v9742_v0, %v7203_v62  ;;  %v7460_v22 = vor.u32 %v9806_v9, %v7459_v8  ;;  %v7011_v9 = vld [vmem:[%s15458_s5 + $0x240] sm:$0xf] }
  0x58   :  { %663 = vmatpush.bf16.msra.mxu0 %v6512_v23  ;;  %v9862_v23 = vld [vmem:[%s15458_s5 + $0x79c] sm:$0xf0] }
  0x59   :  { %677 = vmatpush.bf16.msra.mxu1 %v6640_v27  ;;  %v7139_v27 = vld [vmem:[%s15458_s5 + $0x340] sm:$0xf]  ;;  %v7684_v32 = vor.u32 %v9862_v23, %v7683_v21  ;;  %v9674_v23 = vld [vmem:[%s15458_s5 + $0x1c4] sm:$0xf] }
  0x5a   :  { %v7140_v38 = vor.u32 %v9726_v28, %v7139_v27  ;;  %v9622_v21 = vld [vmem:[%s15458_s5 + $0x1c] sm:$0xf0]  ;;  %v6952_v28 = vor.u32 %v9674_v23, %v6949_v24  ;;  %v6789_v23 = vld [vmem:[%s15458_s5 + $0xa0] sm:$0xf0] }
  0x5b   :  { %v9794_v24 = vld [vmem:[%s15458_s5 + $0x584] sm:$0xf] }
  0x5c   :  { %664 = vmatpush.bf16.msra.mxu0 %v6496_v35  ;;  %v9854_v35 = vld [vmem:[%s15458_s5 + $0x75c] sm:$0xf0] }
  0x5d   :  { %678 = vmatpush.bf16.msra.mxu1 %v6624_v39  ;;  %v7107_v39 = vld [vmem:[%s15458_s5 + $0x300] sm:$0xf]  ;;  %v7652_v44 = vor.u32 %v9854_v35, %v7651_v33  ;;  %v7141_v33 = vld [vmem:[%s15458_s5 + $0x360] sm:$0xf0] }
  0x5e   :  { %v9666_v35 = vld [vmem:[%s15458_s5 + $0x184] sm:$0xf] }
  0x5f   :  { %v6920_v37 = vor.u32 %v9666_v35, %v6917_v36  ;;  %v6757_v35 = vld [vmem:[%s15458_s5 + $0x60] sm:$0xf0] }
  0x60   :  { %665 = vmatpush.bf16.msra.mxu0 %v6480_v48  ;;  %v7363_v48 = vld [vmem:[%s15458_s5 + $0x500] sm:$0xf] }
  0x61   :  { %679 = vmatpush.bf16.msra.mxu1 %v6608_v49  ;;  %v9782_v49 = vld [vmem:[%s15458_s5 + $0x51c] sm:$0xf0] }
  0xa0   :  { %v151_v50 = vpop.f32.mrf.mxu0 }
  0xa1   :  { %v165_v52 = vpop.f32.mrf.mxu1  ;;  %v152_v54 = vadd.f32 %v151_v50, %v52_v51  ;;  %v7108_v50 = vor.u32 %v9718_v40, %v7107_v39  ;;  %v9822_v39 = vld [vmem:[%s15458_s5 + $0x65c] sm:$0xf0] }
  0xa2   :  { %v166_v55 = vadd.f32 %v165_v52, %v53_v53  ;;  %v9710_v52 = vld [vmem:[%s15458_s5 + $0x2dc] sm:$0xf0] }
  0xa3   :  { %v170_v57 = vmul.f32 0.01, %v152_v54 }
  0xa4   :  { %v171_v60 = vmul.f32 0.01, %v166_v55 }
  0xa5   :  { %v174_v5 = vmax.f32 %v152_v54, %v170_v57  ;;  %v6819_v54 = vld [vmem:[%s15458_s5 + $0xc0] sm:$0xf] }
  0xa6   :  { %v175_v10 = vmax.f32 %v166_v55, %v171_v60  ;;  %v9646_v55 = vld [vmem:[%s15458_s5 + $0xdc] sm:$0xf0] }
  0xa7   :  { %v7587_v57 = vld [vmem:[%s15458_s5 + $0x6c0] sm:$0xf]  ;;  %v6820_v0 = vor.u32 %v9646_v55, %v6819_v54  ;;  %v7077_v54 = vld [vmem:[%s15458_s5 + $0x2e0] sm:$0xf0] }
  0xa8   :  { %v153_v56 = vpop.f32.mrf.mxu0  ;;  %v7331_v60 = vld [vmem:[%s15458_s5 + $0x4c0] sm:$0xf]  ;;  %v9866_v55 = vld [vmem:[%s15458_s5 + $0x7c4] sm:$0xf] }
  0xa9   :  { %v154_v58 = vadd.f32 %v153_v56, %v52_v51  ;;  %v167_v59 = vpop.f32.mrf.mxu1  ;;  %v7075_v51 = vld [vmem:[%s15458_s5 + $0x2c0] sm:$0xf]  ;;  %v7620_v56 = vor.u32 %v9846_v47, %v7619_v45  ;;  %v9658_v47 = vld [vmem:[%s15458_s5 + $0x144] sm:$0xf] }
  0xaa   :  { %v168_v61 = vadd.f32 %v167_v59, %v53_v53  ;;  %v6852_v53 = vor.u32 %v9654_v43, %v6851_v42  ;;  %v9838_v59 = vld [vmem:[%s15458_s5 + $0x6dc] sm:$0xf0]  ;;  %v7076_v62 = vor.u32 %v9710_v52, %v7075_v51  ;;  %v7109_v42 = vld [vmem:[%s15458_s5 + $0x320] sm:$0xf0] }
  0xab   :  { %v172_v63 = vmul.f32 0.01, %v154_v58  ;;  %v7588_v4 = vor.u32 %v9838_v59, %v7587_v57  ;;  %v9766_v45 = vld [vmem:[%s15458_s5 + $0x49c] sm:$0xf0]  ;;  %v7717_v57 = vld [vmem:[%s15458_s5 + $0x7e0] sm:$0xf0] }
  0xac   :  { %v173_v2 = vmul.f32 0.01, %v168_v61  ;;  %v9814_v51 = vld [vmem:[%s15458_s5 + $0x61c] sm:$0xf0] }
  0xad   :  { %v176_v6 = vmax.f32 %v154_v58, %v172_v63  ;;  %v7364_v58 = vor.u32 %v9782_v49, %v7363_v48  ;;  %v7043_v63 = vld [vmem:[%s15458_s5 + $0x280] sm:$0xf]  ;;  %v6885_v48 = vld [vmem:[%s15458_s5 + $0x160] sm:$0xf0] }
  0xae   :  { %v177_v11 = vmax.f32 %v168_v61, %v173_v2  ;;  %v9774_v61 = vld [vmem:[%s15458_s5 + $0x4dc] sm:$0xf0]  ;;  %v7044_v8 = vor.u32 %v9702_v1, %v7043_v63  ;;  %v6888_v49 = vor.u32 %v9658_v47, %v6885_v48  ;;  %v6853_v63 = vld [vmem:[%s15458_s5 + $0x120] sm:$0xf0] }
  0xaf   :  { %v10912_v12 = vpack.c.bf16 %v176_v6, %v174_v5  ;;  %v6787_v2 = vld [vmem:[%s15458_s5 + $0x80] sm:$0xf]  ;;  %v7332_v5 = vor.u32 %v9774_v61, %v7331_v60  ;;  %v7720_v60 = vor.u32 %v9866_v55, %v7717_v57  ;;  %v9698_v1 = vld [vmem:[%s15458_s5 + $0x284] sm:$0xf] }
  0xb0   :  { %v10920_v17 = vpack.c.bf16 %v177_v11, %v175_v10  ;;  %v7555_v6 = vld [vmem:[%s15458_s5 + $0x680] sm:$0xf]  ;;  %v6788_v10 = vor.u32 %v9638_v3, %v6787_v2  ;;  %v7045_v2 = vld [vmem:[%s15458_s5 + $0x2a0] sm:$0xf0] }
  0xb1   :  { %582 = vmatmul.bf16.vlgmr.msra.gmra.mxu2 %v10912_v12  ;;  %610 = vmatmul.bf16.vlgmr.msrb.gmra.mxu0 %v10912_v12  ;;  %v9694_v11 = vld [vmem:[%s15458_s5 + $0x25c] sm:$0xf0]  ;;  %v7556_v14 = vor.u32 %v9830_v7, %v7555_v6  ;;  %v9858_v3 = vld [vmem:[%s15458_s5 + $0x784] sm:$0xf] }
  0xb2   :  { %596 = vmatmul.bf16.vlgmr.msra.gmra.mxu3 %v10920_v17  ;;  %624 = vmatmul.bf16.vlgmr.msrb.gmra.mxu1 %v10920_v17  ;;  %v7012_v15 = vor.u32 %v9694_v11, %v7011_v9  ;;  %v9758_v59 = vld [vmem:[%s15458_s5 + $0x45c] sm:$0xf0]  ;;  %v6821_v11 = vld [vmem:[%s15458_s5 + $0xe0] sm:$0xf0] }
  0xb3   :  { %2274 = vmatpush.bf16.msra.mxu3 %v7204_v13  ;;  %2260 = vmatpush.bf16.msra.mxu2 %v6948_v16  ;;  %v9630_v13 = vld [vmem:[%s15458_s5 + $0x5c] sm:$0xf0]  ;;  %v7365_v47 = vld [vmem:[%s15458_s5 + $0x520] sm:$0xf0] }
  0xb4   :  { %2302 = vmatpush.bf16.msrb.mxu1 %v7716_v20  ;;  %2288 = vmatpush.bf16.msrb.mxu0 %v7460_v22  ;;  %v6979_v16 = vld [vmem:[%s15458_s5 + $0x200] sm:$0xf]  ;;  %v7205_v22 = vld [vmem:[%s15458_s5 + $0x3e0] sm:$0xf0] }
  0xb5   :  { %v6723_v20 = vld [vmem:[%s15458_s5] sm:$0xf]  ;;  %v7208_v27 = vor.u32 %v9738_v19, %v7205_v22  ;;  %v9634_v22 = vld [vmem:[%s15458_s5 + $0x84] sm:$0xf] }
  0xb6   :  { %v7235_v6 = vld [vmem:[%s15458_s5 + $0x400] sm:$0xf]  ;;  %v7525_v57 = vld [vmem:[%s15458_s5 + $0x660] sm:$0xf0] }
  0xb7   :  { %2275 = vmatpush.bf16.msra.mxu3 %v7172_v26  ;;  %2261 = vmatpush.bf16.msra.mxu2 %v6916_v29  ;;  %v6724_v26 = vor.u32 %v9622_v21, %v6723_v20  ;;  %v9730_v29 = vld [vmem:[%s15458_s5 + $0x384] sm:$0xf]  ;;  %v9750_v7 = vld [vmem:[%s15458_s5 + $0x41c] sm:$0xf0] }
  0xb8   :  { %2303 = vmatpush.bf16.msrb.mxu1 %v7684_v32  ;;  %2289 = vmatpush.bf16.msrb.mxu0 %v7428_v34  ;;  %v7176_v31 = vor.u32 %v9730_v29, %v7173_v30  ;;  %v9722_v32 = vld [vmem:[%s15458_s5 + $0x344] sm:$0xf]  ;;  %v7236_v9 = vor.u32 %v9750_v7, %v7235_v6  ;;  %v11257_v55 = vld [vmem:[%s15459_s4] sm:$0xf] }
  0xb9   :  { %v7144_v34 = vor.u32 %v9722_v32, %v7141_v33  ;;  %v7653_v20 = vld [vmem:[%s15458_s5 + $0x760] sm:$0xf0] }
  0xba   :  { %v6981_v29 = vld [vmem:[%s15458_s5 + $0x220] sm:$0xf0] }
  0xbb   :  { %2276 = vmatpush.bf16.msra.mxu3 %v7140_v38  ;;  %2262 = vmatpush.bf16.msra.mxu2 %v6884_v41  ;;  %v7523_v38 = vld [vmem:[%s15458_s5 + $0x640] sm:$0xf]  ;;  %v9714_v41 = vld [vmem:[%s15458_s5 + $0x304] sm:$0xf] }
  0xbc   :  { %2304 = vmatpush.bf16.msrb.mxu1 %v7652_v44  ;;  %2290 = vmatpush.bf16.msrb.mxu0 %v7396_v46  ;;  %v7524_v40 = vor.u32 %v9822_v39, %v7523_v38  ;;  %v7112_v43 = vor.u32 %v9714_v41, %v7109_v42  ;;  %v7299_v44 = vld [vmem:[%s15458_s5 + $0x480] sm:$0xf]  ;;  %v7621_v32 = vld [vmem:[%s15458_s5 + $0x720] sm:$0xf0] }
  0xbd   :  { %v7300_v46 = vor.u32 %v9766_v45, %v7299_v44  ;;  %v7397_v38 = vld [vmem:[%s15458_s5 + $0x560] sm:$0xf0] }
  0xbe   :  { %v7589_v41 = vld [vmem:[%s15458_s5 + $0x6e0] sm:$0xf0] }
  0xbf   :  { %2277 = vmatpush.bf16.msra.mxu3 %v7108_v50  ;;  %2263 = vmatpush.bf16.msra.mxu2 %v6852_v53  ;;  %v7491_v50 = vld [vmem:[%s15458_s5 + $0x600] sm:$0xf]  ;;  %v9706_v53 = vld [vmem:[%s15458_s5 + $0x2c4] sm:$0xf] }
  0xc0   :  { %2305 = vmatpush.bf16.msrb.mxu1 %v7620_v56  ;;  %2291 = vmatpush.bf16.msrb.mxu0 %v7364_v58  ;;  %v7492_v52 = vor.u32 %v9814_v51, %v7491_v50  ;;  %v7080_v56 = vor.u32 %v9706_v53, %v7077_v54  ;;  %v7267_v58 = vld [vmem:[%s15458_s5 + $0x440] sm:$0xf]  ;;  %v6725_v44 = vld [vmem:[%s15458_s5 + $0x20] sm:$0xf0] }
  0xc1   :  { %638 = vmatmul.bf16.vlgmr.msrb.gmra.mxu2 %v10912_v12  ;;  %666 = vmatmul.bf16.vlgmr.msra.gmra.mxu0 %v10912_v12  ;;  %v6755_v12 = vld [vmem:[%s15458_s5 + $0x40] sm:$0xf]  ;;  %v7268_v61 = vor.u32 %v9758_v59, %v7267_v58  ;;  %v7557_v50 = vld [vmem:[%s15458_s5 + $0x6a0] sm:$0xf0] }
  0xc2   :  { %652 = vmatmul.bf16.vlgmr.msrb.gmra.mxu3 %v10920_v17  ;;  %680 = vmatmul.bf16.vlgmr.msra.gmra.mxu1 %v10920_v17  ;;  %v9686_v17 = vld [vmem:[%s15458_s5 + $0x21c] sm:$0xf0]  ;;  %v6756_v18 = vor.u32 %v9630_v13, %v6755_v12  ;;  %v9802_v12 = vld [vmem:[%s15458_s5 + $0x5c4] sm:$0xf] }
  0xc3   :  { %2278 = vmatpush.bf16.msra.mxu3 %v7076_v62  ;;  %2264 = vmatpush.bf16.msra.mxu2 %v6820_v0  ;;  %v6980_v25 = vor.u32 %v9686_v17, %v6979_v16  ;;  %v9650_v62 = vld [vmem:[%s15458_s5 + $0x104] sm:$0xf] }
  0xc4   :  { %2306 = vmatpush.bf16.msrb.mxu1 %v7588_v4  ;;  %2292 = vmatpush.bf16.msrb.mxu0 %v7332_v5  ;;  %v6856_v0 = vor.u32 %v9650_v62, %v6853_v63  ;;  %v7048_v4 = vor.u32 %v9698_v1, %v7045_v2  ;;  %v7685_v5 = vld [vmem:[%s15458_s5 + $0x7a0] sm:$0xf0] }
  0xc5   :  { %v9690_v16 = vld [vmem:[%s15458_s5 + $0x244] sm:$0xf] }
  0xc6   :  { %v7013_v17 = vld [vmem:[%s15458_s5 + $0x260] sm:$0xf0] }
  0xc7   :  { %2279 = vmatpush.bf16.msra.mxu3 %v7044_v8  ;;  %2265 = vmatpush.bf16.msra.mxu2 %v6788_v10  ;;  %v7688_v8 = vor.u32 %v9858_v3, %v7685_v5  ;;  %v9642_v10 = vld [vmem:[%s15458_s5 + $0xc4] sm:$0xf]  ;;  %v7016_v19 = vor.u32 %v9690_v16, %v7013_v17 }
  0xc8   :  { %2307 = vmatpush.bf16.msrb.mxu1 %v7556_v14  ;;  %2293 = vmatpush.bf16.msrb.mxu0 %v7300_v46  ;;  %v6824_v13 = vor.u32 %v9642_v10, %v6821_v11  ;;  %v7461_v14 = vld [vmem:[%s15458_s5 + $0x5e0] sm:$0xf0] }
  0xc9   :  { %v9778_v46 = vld [vmem:[%s15458_s5 + $0x504] sm:$0xf] }
  0xca   :  { %v7368_v48 = vor.u32 %v9778_v46, %v7365_v47  ;;  %v7333_v53 = vld [vmem:[%s15458_s5 + $0x4e0] sm:$0xf0]  ;;  %v248_v46 = vperm.slane %v11257_v55, 2  ;;  %v7147_v47 = vld [vmem:[%s15458_s5 + $0x348] sm:$0xf] }
  0xcb   :  { %2280 = vmatpush.bf16.msra.mxu3 %v7012_v15  ;;  %2266 = vmatpush.bf16.msra.mxu2 %v6756_v18  ;;  %v7464_v15 = vor.u32 %v9802_v12, %v7461_v14  ;;  %v9850_v18 = vld [vmem:[%s15458_s5 + $0x744] sm:$0xf] }
  0xcc   :  { %2308 = vmatpush.bf16.msrb.mxu1 %v7524_v40  ;;  %2294 = vmatpush.bf16.msrb.mxu0 %v7268_v61  ;;  %v7656_v21 = vor.u32 %v9850_v18, %v7653_v20  ;;  %v9834_v40 = vld [vmem:[%s15458_s5 + $0x6c4] sm:$0xf]  ;;  %v247_v61 = vperm.slane %v11257_v55, 1 }
  0xcd   :  { %v7592_v42 = vor.u32 %v9834_v40, %v7589_v41  ;;  %v9762_v59 = vld [vmem:[%s15458_s5 + $0x484] sm:$0xf]  ;;  %v6955_v41 = vld [vmem:[%s15458_s5 + $0x1c8] sm:$0xf] }
  0xce   :  { %v7493_v1 = vld [vmem:[%s15458_s5 + $0x620] sm:$0xf0] }
  0xcf   :  { %2281 = vmatpush.bf16.msra.mxu3 %v6980_v25  ;;  %2267 = vmatpush.bf16.msra.mxu2 %v6724_v26  ;;  %v6792_v25 = vor.u32 %v9634_v22, %v6789_v23  ;;  %v7429_v26 = vld [vmem:[%s15458_s5 + $0x5a0] sm:$0xf0]  ;;  %v7211_v23 = vld [vmem:[%s15458_s5 + $0x3c8] sm:$0xf] }
  0xd0   :  { %2309 = vmatpush.bf16.msrb.mxu1 %v7492_v52  ;;  %2295 = vmatpush.bf16.msrb.mxu0 %v7236_v9  ;;  %v9770_v52 = vld [vmem:[%s15458_s5 + $0x4c4] sm:$0xf] }
  0xd1   :  { %v7336_v54 = vor.u32 %v9770_v52, %v7333_v53  ;;  %v7269_v5 = vld [vmem:[%s15458_s5 + $0x460] sm:$0xf0] }
  0xd2   :  { %v9746_v10 = vld [vmem:[%s15458_s5 + $0x404] sm:$0xf] }
  0xd3   :  { %2330 = vmatpush.bf16.msrb.mxu3 %v7208_v27  ;;  %2316 = vmatpush.bf16.msrb.mxu2 %v6952_v28  ;;  %v7432_v27 = vor.u32 %v9794_v24, %v7429_v26  ;;  %v9682_v28 = vld [vmem:[%s15458_s5 + $0x204] sm:$0xf]  ;;  %v9743_v24 = vld [vmem:[%s15458_s5 + $0x3e4] sm:$0xf0] }
  0xd4   :  { %2358 = vmatpush.bf16.msra.mxu1 %v7720_v60  ;;  %2344 = vmatpush.bf16.msra.mxu0 %v7464_v15  ;;  %v6984_v30 = vor.u32 %v9682_v28, %v6981_v29  ;;  %v7301_v60 = vld [vmem:[%s15458_s5 + $0x4a0] sm:$0xf0] }
  0xd5   :  { %v7304_v62 = vor.u32 %v9762_v59, %v7301_v60  ;;  %v7115_v60 = vld [vmem:[%s15458_s5 + $0x308] sm:$0xf] }
  0xd7   :  { %2331 = vmatpush.bf16.msrb.mxu3 %v7176_v31  ;;  %2317 = vmatpush.bf16.msrb.mxu2 %v6920_v37  ;;  %v9842_v31 = vld [vmem:[%s15458_s5 + $0x704] sm:$0xf] }
  0xd8   :  { %2359 = vmatpush.bf16.msra.mxu1 %v7688_v8  ;;  %2345 = vmatpush.bf16.msra.mxu0 %v7432_v27  ;;  %v7624_v33 = vor.u32 %v9842_v31, %v7621_v32  ;;  %v9786_v37 = vld [vmem:[%s15458_s5 + $0x544] sm:$0xf]  ;;  %v246_v8 = vperm.slane %v11257_v55, 0  ;;  %v7212_v32 = vor.u32 %v9743_v24, %v7211_v23 }
  0xd9   :  { %v7400_v39 = vor.u32 %v9786_v37, %v7397_v38  ;;  %v7179_v37 = vld [vmem:[%s15458_s5 + $0x388] sm:$0xf] }
  0xda   :  { %v9735_v38 = vld [vmem:[%s15458_s5 + $0x3a4] sm:$0xf0] }
  0xdb   :  { %2332 = vmatpush.bf16.msrb.mxu3 %v7144_v34  ;;  %2318 = vmatpush.bf16.msrb.mxu2 %v6888_v49  ;;  %v9626_v34 = vld [vmem:[%s15458_s5 + $0x44] sm:$0xf] }
  0xdc   :  { %2360 = vmatpush.bf16.msra.mxu1 %v7656_v21  ;;  %v6760_v36 = vor.u32 %v9626_v34, %v6757_v35  ;;  %2346 = vmatpush.bf16.msra.mxu0 %v7400_v39  ;;  %v9826_v49 = vld [vmem:[%s15458_s5 + $0x684] sm:$0xf] }
  0xdd   :  { %v7560_v51 = vor.u32 %v9826_v49, %v7557_v50 }
  0xdf   :  { %2333 = vmatpush.bf16.msrb.mxu3 %v7112_v43  ;;  %2319 = vmatpush.bf16.msrb.mxu2 %v6856_v0  ;;  %v9618_v43 = vld [vmem:[%s15458_s5 + $0x4] sm:$0xf] }
  0xe0   :  { %2361 = vmatpush.bf16.msra.mxu1 %v7624_v33  ;;  %v6728_v45 = vor.u32 %v9618_v43, %v6725_v44  ;;  %2347 = vmatpush.bf16.msra.mxu0 %v7368_v48  ;;  %v9810_v0 = vld [vmem:[%s15458_s5 + $0x604] sm:$0xf]  ;;  %v7180_v43 = vor.u32 %v9735_v38, %v7179_v37  ;;  %v9727_v48 = vld [vmem:[%s15458_s5 + $0x364] sm:$0xf0] }
  0xe1   :  { %v7496_v3 = vor.u32 %v9810_v0, %v7493_v1  ;;  %v7019_v37 = vld [vmem:[%s15458_s5 + $0x248] sm:$0xf] }
  0xe3   :  { %2334 = vmatpush.bf16.msrb.mxu3 %v7080_v56  ;;  %2320 = vmatpush.bf16.msrb.mxu2 %v6824_v13  ;;  %v9818_v56 = vld [vmem:[%s15458_s5 + $0x644] sm:$0xf] }
  0xe4   :  { %2362 = vmatpush.bf16.msra.mxu1 %v7592_v42  ;;  %v7528_v58 = vor.u32 %v9818_v56, %v7525_v57  ;;  %2348 = vmatpush.bf16.msra.mxu0 %v7336_v54  ;;  %v7237_v13 = vld [vmem:[%s15458_s5 + $0x420] sm:$0xf0]  ;;  %v9679_v42 = vld [vmem:[%s15458_s5 + $0x1e4] sm:$0xf0]  ;;  %v7148_v57 = vor.u32 %v9727_v48, %v7147_v47 }
  0xe5   :  { %v7240_v15 = vor.u32 %v9746_v10, %v7237_v13  ;;  %v6956_v50 = vor.u32 %v9679_v42, %v6955_v41  ;;  %v6923_v54 = vld [vmem:[%s15458_s5 + $0x188] sm:$0xf] }
  0xe6   :  { %v9871_v10 = vld [vmem:[%s15458_s5 + $0x7e4] sm:$0xf0] }
  0xe7   :  { %2335 = vmatpush.bf16.msrb.mxu3 %v7048_v4  ;;  %2321 = vmatpush.bf16.msrb.mxu2 %v6792_v25  ;;  %v9754_v4 = vld [vmem:[%s15458_s5 + $0x444] sm:$0xf]  ;;  %v7659_v41 = vld [vmem:[%s15458_s5 + $0x748] sm:$0xf] }
  0xe8   :  { %2363 = vmatpush.bf16.msra.mxu1 %v7560_v51  ;;  %2349 = vmatpush.bf16.msra.mxu0 %v7304_v62  ;;  %v7272_v7 = vor.u32 %v9754_v4, %v7269_v5  ;;  %v7083_v5 = vld [vmem:[%s15458_s5 + $0x2c8] sm:$0xf] }
  0xe9   :  { %v9855_v42 = vld [vmem:[%s15458_s5 + $0x764] sm:$0xf0] }
  0xea   :  { %v9639_v47 = vld [vmem:[%s15458_s5 + $0xa4] sm:$0xf0] }
  0xeb   :  { %2336 = vmatpush.bf16.msrb.mxu3 %v7016_v19  ;;  %2322 = vmatpush.bf16.msrb.mxu2 %v6760_v36  ;;  %v7435_v48 = vld [vmem:[%s15458_s5 + $0x588] sm:$0xf] }
  0xec   :  { %2364 = vmatpush.bf16.msra.mxu1 %v7528_v58  ;;  %2350 = vmatpush.bf16.msra.mxu0 %v7272_v7 }
  0xef   :  { %2337 = vmatpush.bf16.msrb.mxu3 %v6984_v30  ;;  %2323 = vmatpush.bf16.msrb.mxu2 %v6728_v45  ;;  %v249_v30 = vperm.slane %v11257_v55, 3  ;;  %v9671_v55 = vld [vmem:[%s15458_s5 + $0x1a4] sm:$0xf0] }
  0xf0   :  { %2365 = vmatpush.bf16.msra.mxu1 %v7496_v3  ;;  %2351 = vmatpush.bf16.msra.mxu0 %v7240_v15  ;;  %v9663_v3 = vld [vmem:[%s15458_s5 + $0x164] sm:$0xf0] }
 0x12e   :  { %v611_v63 = vpop.f32.mrf.mxu0 }
 0x12f   :  { %v625_v2 = vpop.f32.mrf.mxu1  ;;  %v612_v6 = vadd.f32 %v611_v63, %v247_v61  ;;  %v6924_v63 = vor.u32 %v9671_v55, %v6923_v54  ;;  %v9687_v54 = vld [vmem:[%s15458_s5 + $0x224] sm:$0xf0] }
 0x130   :  { %v7627_v55 = vld [vmem:[%s15458_s5 + $0x708] sm:$0xf] }
 0x131   :  { %v626_v11 = vadd.f32 %v625_v2, %v612_v6  ;;  %v6891_v2 = vld [vmem:[%s15458_s5 + $0x148] sm:$0xf] }
 0x132   :  { %v9711_v6 = vld [vmem:[%s15458_s5 + $0x2e4] sm:$0xf0] }
 0x133   :  { %v687_v19 = vmul.f32 0.01, %v626_v11 }
 0x134   :  { %v583_v9 = vpop.f32.mrf.mxu2 }
 0x135   :  { %v597_v12 = vpop.f32.mrf.mxu3  ;;  %v584_v16 = vadd.f32 %v583_v9, %v246_v8  ;;  %v695_v26 = vmax.f32 %v626_v11, %v687_v19  ;;  %v7723_v9 = vld [vmem:[%s15458_s5 + $0x7c8] sm:$0xf]  ;;  %v7084_v19 = vor.u32 %v9711_v6, %v7083_v5 }
 0x136   :  { %v613_v14 = vpop.f32.mrf.mxu0  ;;  %v9839_v5 = vld [vmem:[%s15458_s5 + $0x6e4] sm:$0xf0] }
 0x137   :  { %v614_v17 = vadd.f32 %v613_v14, %v247_v61  ;;  %v627_v18 = vpop.f32.mrf.mxu1  ;;  %v598_v21 = vadd.f32 %v597_v12, %v584_v16  ;;  %v9719_v61 = vld [vmem:[%s15458_s5 + $0x324] sm:$0xf0]  ;;  %v6892_v12 = vor.u32 %v9663_v3, %v6891_v2 }
 0x138   :  { %v7116_v4 = vor.u32 %v9719_v61, %v7115_v60  ;;  %v6859_v16 = vld [vmem:[%s15458_s5 + $0x108] sm:$0xf]  ;;  %v7213_v60 = vld [vmem:[%s15458_s5 + $0x3e8] sm:$0xf0] }
 0x139   :  { %v628_v20 = vadd.f32 %v627_v18, %v614_v17  ;;  %v686_v33 = vmul.f32 0.01, %v598_v21  ;;  %v9655_v17 = vld [vmem:[%s15458_s5 + $0x124] sm:$0xf0] }
 0x13a   :  { %v6763_v61 = vld [vmem:[%s15458_s5 + $0x48] sm:$0xf] }
 0x13b   :  { %v691_v22 = vmul.f32 0.01, %v628_v20  ;;  %v694_v44 = vmax.f32 %v598_v21, %v686_v33  ;;  %v7051_v21 = vld [vmem:[%s15458_s5 + $0x288] sm:$0xf] }
 0x13c   :  { %v585_v25 = vpop.f32.mrf.mxu2  ;;  %v9807_v33 = vld [vmem:[%s15458_s5 + $0x5e4] sm:$0xf0] }
 0x13d   :  { %v699_v27 = vmax.f32 %v628_v20, %v691_v22  ;;  %v586_v28 = vadd.f32 %v585_v25, %v246_v8  ;;  %v599_v29 = vpop.f32.mrf.mxu3  ;;  %v7724_v20 = vor.u32 %v9871_v10, %v7723_v9  ;;  %v9703_v22 = vld [vmem:[%s15458_s5 + $0x2a4] sm:$0xf0]  ;;  %v7181_v9 = vld [vmem:[%s15458_s5 + $0x3a8] sm:$0xf0] }
 0x13e   :  { %v667_v31 = vpop.f32.mrf.mxu0  ;;  %v6731_v10 = vld [vmem:[%s15458_s5 + $0x8] sm:$0xf] }
 0x13f   :  { %v11298_v34 = vpack.c.bf16 %v699_v27, %v695_v26  ;;  %v600_v35 = vadd.f32 %v599_v29, %v586_v28  ;;  %v681_v36 = vpop.f32.mrf.mxu1  ;;  %v668_v40 = vadd.f32 %v667_v31, %v249_v30  ;;  %v7691_v26 = vld [vmem:[%s15458_s5 + $0x788] sm:$0xf]  ;;  %v6860_v28 = vor.u32 %v9655_v17, %v6859_v16  ;;  %v6957_v16 = vld [vmem:[%s15458_s5 + $0x1e8] sm:$0xf0] }
 0x140   :  { %v9863_v27 = vld [vmem:[%s15458_s5 + $0x7a4] sm:$0xf0] }
 0x141   :  { %v690_v39 = vmul.f32 0.01, %v600_v35  ;;  %2282 = vmatmul.bf16.vlgmr.msra.gmra.mxu3 %v11298_v34  ;;  %v682_v52 = vadd.f32 %v681_v36, %v668_v40  ;;  %v6827_v29 = vld [vmem:[%s15458_s5 + $0xc8] sm:$0xf]  ;;  %v7692_v36 = vor.u32 %v9863_v27, %v7691_v26 }
 0x142   :  { %2386 = vmatpush.bf16.msra.mxu3 %v7212_v32  ;;  %v7467_v32 = vld [vmem:[%s15458_s5 + $0x5c8] sm:$0xf] }
 0x143   :  { %v698_v45 = vmax.f32 %v600_v35, %v690_v39  ;;  %v689_v0 = vmul.f32 0.01, %v682_v52  ;;  %v7052_v35 = vor.u32 %v9703_v22, %v7051_v21  ;;  %v9695_v40 = vld [vmem:[%s15458_s5 + $0x264] sm:$0xf0]  ;;  %v9723_v22 = vld [vmem:[%s15458_s5 + $0x34c] sm:$0xf] }
 0x144   :  { %v639_v49 = vpop.f32.mrf.mxu2  ;;  %v7339_v26 = vld [vmem:[%s15458_s5 + $0x4c8] sm:$0xf] }
 0x145   :  { %v11320_v51 = vpack.c.bf16 %v698_v45, %v694_v44  ;;  %v653_v53 = vpop.f32.mrf.mxu3  ;;  %v640_v58 = vadd.f32 %v639_v49, %v248_v46  ;;  %v697_v13 = vmax.f32 %v682_v52, %v689_v0  ;;  %v7468_v44 = vor.u32 %v9807_v33, %v7467_v32  ;;  %v6795_v45 = vld [vmem:[%s15458_s5 + $0x88] sm:$0xf] }
 0x146   :  { %2387 = vmatpush.bf16.msra.mxu3 %v7180_v43  ;;  %v669_v56 = vpop.f32.mrf.mxu0  ;;  %v9799_v49 = vld [vmem:[%s15458_s5 + $0x5a4] sm:$0xf0]  ;;  %v7660_v52 = vor.u32 %v9855_v42, %v7659_v41  ;;  %v9659_v42 = vld [vmem:[%s15458_s5 + $0x14c] sm:$0xf] }
 0x147   :  { %v670_v59 = vadd.f32 %v669_v56, %v249_v30  ;;  %2268 = vmatmul.bf16.vlgmr.msra.gmra.mxu2 %v11320_v51  ;;  %v683_v62 = vpop.f32.mrf.mxu1  ;;  %v654_v7 = vadd.f32 %v653_v53, %v640_v58  ;;  %v9647_v30 = vld [vmem:[%s15458_s5 + $0xe4] sm:$0xf0]  ;;  %v7436_v58 = vor.u32 %v9799_v49, %v7435_v48  ;;  %v9707_v48 = vld [vmem:[%s15458_s5 + $0x2cc] sm:$0xf] }
 0x148   :  { %2372 = vmatpush.bf16.msra.mxu2 %v6956_v50  ;;  %v6828_v43 = vor.u32 %v9647_v30, %v6827_v29  ;;  %v7020_v50 = vor.u32 %v9695_v40, %v7019_v37  ;;  %v6987_v53 = vld [vmem:[%s15458_s5 + $0x208] sm:$0xf]  ;;  %v9667_v29 = vld [vmem:[%s15458_s5 + $0x18c] sm:$0xf] }
 0x149   :  { %v684_v1 = vadd.f32 %v683_v62, %v670_v59  ;;  %v688_v23 = vmul.f32 0.01, %v654_v7  ;;  %v9847_v56 = vld [vmem:[%s15458_s5 + $0x724] sm:$0xf0]  ;;  %v9739_v59 = vld [vmem:[%s15458_s5 + $0x3cc] sm:$0xf] }
 0x14a   :  { %2388 = vmatpush.bf16.msra.mxu3 %v7148_v57  ;;  %v6796_v57 = vor.u32 %v9639_v47, %v6795_v45  ;;  %v9631_v62 = vld [vmem:[%s15458_s5 + $0x64] sm:$0xf0]  ;;  %v7628_v2 = vor.u32 %v9847_v56, %v7627_v55  ;;  %v7216_v3 = vor.u32 %v9739_v59, %v7213_v60  ;;  %v6925_v30 = vld [vmem:[%s15458_s5 + $0x1a8] sm:$0xf0] }
 0x14b   :  { %v693_v8 = vmul.f32 0.01, %v684_v1  ;;  %v696_v38 = vmax.f32 %v654_v7, %v688_v23  ;;  %v9791_v0 = vld [vmem:[%s15458_s5 + $0x564] sm:$0xf0]  ;;  %v6764_v6 = vor.u32 %v9631_v62, %v6763_v61  ;;  %v7149_v23 = vld [vmem:[%s15458_s5 + $0x368] sm:$0xf0] }
 0x14c   :  { %2373 = vmatpush.bf16.msra.mxu2 %v6924_v63  ;;  %v641_v11 = vpop.f32.mrf.mxu2  ;;  %v7403_v63 = vld [vmem:[%s15458_s5 + $0x548] sm:$0xf]  ;;  %v7117_v37 = vld [vmem:[%s15458_s5 + $0x328] sm:$0xf0] }
 0x14d   :  { %v701_v14 = vmax.f32 %v684_v1, %v693_v8  ;;  %v642_v15 = vadd.f32 %v641_v11, %v248_v46  ;;  %v655_v18 = vpop.f32.mrf.mxu3  ;;  %v6988_v1 = vor.u32 %v9687_v54, %v6987_v53  ;;  %v7404_v7 = vor.u32 %v9791_v0, %v7403_v63  ;;  %v9731_v8 = vld [vmem:[%s15458_s5 + $0x38c] sm:$0xf]  ;;  %v9623_v11 = vld [vmem:[%s15458_s5 + $0x24] sm:$0xf0] }
 0x14e   :  { %2389 = vmatpush.bf16.msra.mxu3 %v7116_v4  ;;  %v7595_v4 = vld [vmem:[%s15458_s5 + $0x6c8] sm:$0xf]  ;;  %v7184_v17 = vor.u32 %v9731_v8, %v7181_v9  ;;  %v7725_v53 = vld [vmem:[%s15458_s5 + $0x7e8] sm:$0xf0] }
 0x14f   :  { %v11365_v24 = vpack.c.bf16 %v701_v14, %v697_v13  ;;  %v656_v25 = vadd.f32 %v655_v18, %v642_v15  ;;  %v9783_v13 = vld [vmem:[%s15458_s5 + $0x524] sm:$0xf0]  ;;  %v7596_v14 = vor.u32 %v9839_v5, %v7595_v4  ;;  %v9675_v15 = vld [vmem:[%s15458_s5 + $0x1cc] sm:$0xf] }
 0x150   :  { %2374 = vmatpush.bf16.msra.mxu2 %v6892_v12  ;;  %v7371_v12 = vld [vmem:[%s15458_s5 + $0x508] sm:$0xf]  ;;  %v6861_v59 = vld [vmem:[%s15458_s5 + $0x128] sm:$0xf0] }
 0x151   :  { %v692_v31 = vmul.f32 0.01, %v656_v25  ;;  %2310 = vmatmul.bf16.vlgmr.msrb.gmra.mxu1 %v11365_v24  ;;  %2338 = vmatmul.bf16.vlgmr.msrb.gmra.mxu3 %v11298_v34  ;;  %v7563_v18 = vld [vmem:[%s15458_s5 + $0x688] sm:$0xf]  ;;  %v7372_v21 = vor.u32 %v9783_v13, %v7371_v12  ;;  %v9699_v62 = vld [vmem:[%s15458_s5 + $0x28c] sm:$0xf] }
 0x152   :  { %2390 = vmatpush.bf16.msra.mxu3 %v7084_v19  ;;  %2414 = vmatpush.bf16.msrb.mxu1 %v7724_v20  ;;  %v9831_v19 = vld [vmem:[%s15458_s5 + $0x6a4] sm:$0xf0]  ;;  %v6732_v20 = vor.u32 %v9623_v11, %v6731_v10  ;;  %v7053_v0 = vld [vmem:[%s15458_s5 + $0x2a8] sm:$0xf0] }
 0x153   :  { %v700_v39 = vmax.f32 %v656_v25, %v692_v31  ;;  %v6960_v25 = vor.u32 %v9675_v15, %v6957_v16  ;;  %v9775_v27 = vld [vmem:[%s15458_s5 + $0x4e4] sm:$0xf0]  ;;  %v7152_v31 = vor.u32 %v9723_v22, %v7149_v23  ;;  %v9803_v8 = vld [vmem:[%s15458_s5 + $0x5cc] sm:$0xf]  ;;  %v7056_v10 = vor.u32 %v9699_v62, %v7053_v0  ;;  %v7155_v62 = vld [vmem:[%s15458_s5 + $0x350] sm:$0xf] }
 0x154   :  { %2375 = vmatpush.bf16.msra.mxu2 %v6860_v28  ;;  %v7564_v28 = vor.u32 %v9831_v19, %v7563_v18  ;;  %v7531_v32 = vld [vmem:[%s15458_s5 + $0x648] sm:$0xf]  ;;  %v7469_v9 = vld [vmem:[%s15458_s5 + $0x5e8] sm:$0xf0] }
 0x155   :  { %v11402_v46 = vpack.c.bf16 %v700_v39, %v696_v38  ;;  %v9823_v33 = vld [vmem:[%s15458_s5 + $0x664] sm:$0xf0]  ;;  %v6928_v38 = vor.u32 %v9667_v29, %v6925_v30  ;;  %v9691_v12 = vld [vmem:[%s15458_s5 + $0x24c] sm:$0xf]  ;;  %v7472_v18 = vor.u32 %v9803_v8, %v7469_v9 }
 0x156   :  { %2391 = vmatpush.bf16.msra.mxu3 %v7052_v35  ;;  %2415 = vmatpush.bf16.msrb.mxu1 %v7692_v36  ;;  %v7340_v35 = vor.u32 %v9775_v27, %v7339_v26  ;;  %v9715_v36 = vld [vmem:[%s15458_s5 + $0x30c] sm:$0xf]  ;;  %v7307_v39 = vld [vmem:[%s15458_s5 + $0x488] sm:$0xf]  ;;  %v7532_v41 = vor.u32 %v9823_v33, %v7531_v32  ;;  %v7219_v32 = vld [vmem:[%s15458_s5 + $0x3d0] sm:$0xf] }
 0x157   :  { %2296 = vmatmul.bf16.vlgmr.msrb.gmra.mxu0 %v11402_v46  ;;  %2324 = vmatmul.bf16.vlgmr.msrb.gmra.mxu2 %v11320_v51  ;;  %v9767_v40 = vld [vmem:[%s15458_s5 + $0x4a4] sm:$0xf0]  ;;  %v9851_v15 = vld [vmem:[%s15458_s5 + $0x74c] sm:$0xf]  ;;  %v9744_v33 = vld [vmem:[%s15458_s5 + $0x3ec] sm:$0xf0] }
 0x158   :  { %2376 = vmatpush.bf16.msra.mxu2 %v6828_v43  ;;  %2400 = vmatpush.bf16.msrb.mxu0 %v7468_v44  ;;  %v6893_v43 = vld [vmem:[%s15458_s5 + $0x168] sm:$0xf0]  ;;  %v7120_v44 = vor.u32 %v9715_v36, %v7117_v37  ;;  %v7499_v45 = vld [vmem:[%s15458_s5 + $0x608] sm:$0xf]  ;;  %v7308_v49 = vor.u32 %v9767_v40, %v7307_v39 }
 0x159   :  { %v9815_v47 = vld [vmem:[%s15458_s5 + $0x624] sm:$0xf0]  ;;  %v6896_v54 = vor.u32 %v9659_v42, %v6893_v43  ;;  %v7661_v16 = vld [vmem:[%s15458_s5 + $0x768] sm:$0xf0] }
 0x15a   :  { %2392 = vmatpush.bf16.msra.mxu3 %v7020_v50  ;;  %2416 = vmatpush.bf16.msrb.mxu1 %v7660_v52  ;;  %v7085_v50 = vld [vmem:[%s15458_s5 + $0x2e8] sm:$0xf0]  ;;  %v7275_v55 = vld [vmem:[%s15458_s5 + $0x448] sm:$0xf] }
 0x15b   :  { %v9867_v52 = vld [vmem:[%s15458_s5 + $0x7cc] sm:$0xf]  ;;  %v9759_v56 = vld [vmem:[%s15458_s5 + $0x464] sm:$0xf0]  ;;  %v7088_v60 = vor.u32 %v9707_v48, %v7085_v50  ;;  %v9736_v48 = vld [vmem:[%s15458_s5 + $0x3ac] sm:$0xf0] }
 0x15c   :  { %2377 = vmatpush.bf16.msra.mxu2 %v6796_v57  ;;  %2401 = vmatpush.bf16.msrb.mxu0 %v7436_v58  ;;  %v7500_v57 = vor.u32 %v9815_v47, %v7499_v45  ;;  %v9651_v58 = vld [vmem:[%s15458_s5 + $0x10c] sm:$0xf]  ;;  %v7728_v61 = vor.u32 %v9867_v52, %v7725_v53  ;;  %v7276_v63 = vor.u32 %v9759_v56, %v7275_v55  ;;  %v7243_v4 = vld [vmem:[%s15458_s5 + $0x408] sm:$0xf]  ;;  %v7187_v47 = vld [vmem:[%s15458_s5 + $0x390] sm:$0xf] }
 0x15d   :  { %v9751_v5 = vld [vmem:[%s15458_s5 + $0x424] sm:$0xf0]  ;;  %v9635_v19 = vld [vmem:[%s15458_s5 + $0x8c] sm:$0xf]  ;;  %v6963_v55 = vld [vmem:[%s15458_s5 + $0x1d0] sm:$0xf] }
 0x15e   :  { %2393 = vmatpush.bf16.msra.mxu3 %v6988_v1  ;;  %2417 = vmatpush.bf16.msrb.mxu1 %v7628_v2  ;;  %v9859_v1 = vld [vmem:[%s15458_s5 + $0x78c] sm:$0xf]  ;;  %v7244_v13 = vor.u32 %v9751_v5, %v7243_v4  ;;  %v9680_v56 = vld [vmem:[%s15458_s5 + $0x1ec] sm:$0xf0] }
 0x15f   :  { %v7693_v2 = vld [vmem:[%s15458_s5 + $0x7a8] sm:$0xf0]  ;;  %v6964_v0 = vor.u32 %v9680_v56, %v6963_v55  ;;  %v6931_v4 = vld [vmem:[%s15458_s5 + $0x190] sm:$0xf] }
 0x160   :  { %2378 = vmatpush.bf16.msra.mxu2 %v6764_v6  ;;  %2402 = vmatpush.bf16.msrb.mxu0 %v7404_v7  ;;  %v9643_v6 = vld [vmem:[%s15458_s5 + $0xcc] sm:$0xf]  ;;  %v7696_v11 = vor.u32 %v9859_v1, %v7693_v2  ;;  %v9672_v5 = vld [vmem:[%s15458_s5 + $0x1ac] sm:$0xf0] }
 0x161   :  { %2366 = vmatmul.bf16.vlgmr.msra.gmra.mxu1 %v11365_v24  ;;  %2394 = vmatmul.bf16.vlgmr.msra.gmra.mxu3 %v11298_v34  ;;  %v6829_v7 = vld [vmem:[%s15458_s5 + $0xe8] sm:$0xf0] }
 0x162   :  { %2442 = vmatpush.bf16.msrb.mxu3 %v7216_v3  ;;  %2418 = vmatpush.bf16.msrb.mxu1 %v7596_v14  ;;  %v6864_v3 = vor.u32 %v9651_v58, %v6861_v59  ;;  %v7021_v14 = vld [vmem:[%s15458_s5 + $0x268] sm:$0xf0] }
 0x163   :  { %v7437_v22 = vld [vmem:[%s15458_s5 + $0x5a8] sm:$0xf0]  ;;  %v7024_v23 = vor.u32 %v9691_v12, %v7021_v14  ;;  %v6932_v12 = vor.u32 %v9672_v5, %v6931_v4  ;;  %v9848_v4 = vld [vmem:[%s15458_s5 + $0x72c] sm:$0xf0] }
 0x164   :  { %2379 = vmatpush.bf16.msra.mxu2 %v6732_v20  ;;  %2403 = vmatpush.bf16.msrb.mxu0 %v7372_v21  ;;  %v6797_v20 = vld [vmem:[%s15458_s5 + $0xa8] sm:$0xf0] }
 0x165   :  { %v9795_v21 = vld [vmem:[%s15458_s5 + $0x58c] sm:$0xf]  ;;  %v6800_v30 = vor.u32 %v9635_v19, %v6797_v20 }
 0x166   :  { %2443 = vmatpush.bf16.msrb.mxu3 %v7184_v17  ;;  %2419 = vmatpush.bf16.msrb.mxu1 %v7564_v28  ;;  %v6832_v17 = vor.u32 %v9643_v6, %v6829_v7  ;;  %v9683_v26 = vld [vmem:[%s15458_s5 + $0x20c] sm:$0xf] }
 0x167   :  { %2352 = vmatmul.bf16.vlgmr.msra.gmra.mxu0 %v11402_v46  ;;  %2380 = vmatmul.bf16.vlgmr.msra.gmra.mxu2 %v11320_v51  ;;  %v6989_v27 = vld [vmem:[%s15458_s5 + $0x228] sm:$0xf0] }
 0x168   :  { %2428 = vmatpush.bf16.msrb.mxu2 %v6960_v25  ;;  %2404 = vmatpush.bf16.msrb.mxu0 %v7340_v35  ;;  %v7664_v25 = vor.u32 %v9851_v15, %v7661_v16  ;;  %v9843_v28 = vld [vmem:[%s15458_s5 + $0x70c] sm:$0xf]  ;;  %v6992_v39 = vor.u32 %v9683_v26, %v6989_v27  ;;  %v6899_v16 = vld [vmem:[%s15458_s5 + $0x150] sm:$0xf] }
 0x169   :  { %v7629_v29 = vld [vmem:[%s15458_s5 + $0x728] sm:$0xf0]  ;;  %v9872_v26 = vld [vmem:[%s15458_s5 + $0x7ec] sm:$0xf0] }
 0x16a   :  { %2444 = vmatpush.bf16.msrb.mxu3 %v7152_v31  ;;  %2420 = vmatpush.bf16.msrb.mxu1 %v7532_v41  ;;  %v7440_v31 = vor.u32 %v9795_v21, %v7437_v22  ;;  %v9627_v35 = vld [vmem:[%s15458_s5 + $0x4c] sm:$0xf]  ;;  %v7632_v40 = vor.u32 %v9843_v28, %v7629_v29  ;;  %v7220_v41 = vor.u32 %v9744_v33, %v7219_v32  ;;  %v7091_v21 = vld [vmem:[%s15458_s5 + $0x2d0] sm:$0xf] }
 0x16b   :  { %v6765_v36 = vld [vmem:[%s15458_s5 + $0x68] sm:$0xf0]  ;;  %v9656_v32 = vld [vmem:[%s15458_s5 + $0x12c] sm:$0xf0] }
 0x16c   :  { %2429 = vmatpush.bf16.msrb.mxu2 %v6928_v38  ;;  %2405 = vmatpush.bf16.msrb.mxu0 %v7308_v49  ;;  %v9787_v37 = vld [vmem:[%s15458_s5 + $0x54c] sm:$0xf] }
 0x16d   :  { %v7405_v38 = vld [vmem:[%s15458_s5 + $0x568] sm:$0xf0] }
 0x16e   :  { %2445 = vmatpush.bf16.msrb.mxu3 %v7120_v44  ;;  %2421 = vmatpush.bf16.msrb.mxu1 %v7500_v57  ;;  %v9835_v42 = vld [vmem:[%s15458_s5 + $0x6cc] sm:$0xf]  ;;  %v6768_v44 = vor.u32 %v9627_v35, %v6765_v36  ;;  %v7408_v45 = vor.u32 %v9787_v37, %v7405_v38  ;;  %v7188_v57 = vor.u32 %v9736_v48, %v7187_v47  ;;  %v7059_v36 = vld [vmem:[%s15458_s5 + $0x290] sm:$0xf] }
 0x16f   :  { %v7597_v43 = vld [vmem:[%s15458_s5 + $0x6e8] sm:$0xf0]  ;;  %v9704_v38 = vld [vmem:[%s15458_s5 + $0x2ac] sm:$0xf0] }
 0x170   :  { %2430 = vmatpush.bf16.msrb.mxu2 %v6896_v54  ;;  %2406 = vmatpush.bf16.msrb.mxu0 %v7276_v63  ;;  %v9619_v49 = vld [vmem:[%s15458_s5 + $0xc] sm:$0xf]  ;;  %v7600_v54 = vor.u32 %v9835_v42, %v7597_v43  ;;  %v9728_v63 = vld [vmem:[%s15458_s5 + $0x36c] sm:$0xf0] }
 0x171   :  { %2422 = vmatmul.bf16.vlgmr.msrb.gmra.mxu1 %v11365_v24  ;;  %v6733_v50 = vld [vmem:[%s15458_s5 + $0x28] sm:$0xf0]  ;;  %v7156_v6 = vor.u32 %v9728_v63, %v7155_v62  ;;  %v7475_v47 = vld [vmem:[%s15458_s5 + $0x5d0] sm:$0xf] }
 0x172   :  { %2446 = vmatpush.bf16.msrb.mxu3 %v7088_v60  ;;  %2470 = vmatpush.bf16.msra.mxu1 %v7728_v61  ;;  %v9779_v52 = vld [vmem:[%s15458_s5 + $0x50c] sm:$0xf]  ;;  %v6736_v60 = vor.u32 %v9619_v49, %v6733_v50  ;;  %v9808_v48 = vld [vmem:[%s15458_s5 + $0x5ec] sm:$0xf0]  ;;  %v7060_v49 = vor.u32 %v9704_v38, %v7059_v36  ;;  %v9724_v36 = vld [vmem:[%s15458_s5 + $0x354] sm:$0xf] }
 0x173   :  { %v7373_v53 = vld [vmem:[%s15458_s5 + $0x528] sm:$0xf0]  ;;  %v7476_v56 = vor.u32 %v9808_v48, %v7475_v47  ;;  %v9800_v62 = vld [vmem:[%s15458_s5 + $0x5ac] sm:$0xf0]  ;;  %v7157_v38 = vld [vmem:[%s15458_s5 + $0x370] sm:$0xf0] }
 0x174   :  { %2431 = vmatpush.bf16.msrb.mxu2 %v6864_v3  ;;  %2407 = vmatpush.bf16.msrb.mxu0 %v7244_v13  ;;  %v9827_v58 = vld [vmem:[%s15458_s5 + $0x68c] sm:$0xf]  ;;  %v7376_v61 = vor.u32 %v9779_v52, %v7373_v53  ;;  %v7027_v53 = vld [vmem:[%s15458_s5 + $0x250] sm:$0xf] }
 0x175   :  { %v7565_v59 = vld [vmem:[%s15458_s5 + $0x6a8] sm:$0xf0]  ;;  %v7539_v47 = vld [vmem:[%s15458_s5 + $0x650] sm:$0xf] }
 0x176   :  { %2447 = vmatpush.bf16.msrb.mxu3 %v7056_v10  ;;  %2471 = vmatpush.bf16.msra.mxu1 %v7696_v11  ;;  %v9771_v1 = vld [vmem:[%s15458_s5 + $0x4cc] sm:$0xf]  ;;  %v7568_v3 = vor.u32 %v9827_v58, %v7565_v59  ;;  %v7123_v10 = vld [vmem:[%s15458_s5 + $0x310] sm:$0xf] }
 0x177   :  { %2408 = vmatmul.bf16.vlgmr.msrb.gmra.mxu0 %v11402_v46  ;;  %v7341_v2 = vld [vmem:[%s15458_s5 + $0x4e8] sm:$0xf0]  ;;  %v9720_v11 = vld [vmem:[%s15458_s5 + $0x32c] sm:$0xf0] }
 0x178   :  { %2432 = vmatpush.bf16.msrb.mxu2 %v6832_v17  ;;  %2456 = vmatpush.bf16.msra.mxu0 %v7472_v18  ;;  %v9819_v7 = vld [vmem:[%s15458_s5 + $0x64c] sm:$0xf]  ;;  %v7344_v9 = vor.u32 %v9771_v1, %v7341_v2  ;;  %v9664_v17 = vld [vmem:[%s15458_s5 + $0x16c] sm:$0xf0]  ;;  %v7124_v18 = vor.u32 %v9720_v11, %v7123_v10 }
 0x179   :  { %v7533_v8 = vld [vmem:[%s15458_s5 + $0x668] sm:$0xf0]  ;;  %v6900_v27 = vor.u32 %v9664_v17, %v6899_v16  ;;  %v9856_v58 = vld [vmem:[%s15458_s5 + $0x76c] sm:$0xf0] }
 0x17a   :  { %2448 = vmatpush.bf16.msrb.mxu3 %v7024_v23  ;;  %2472 = vmatpush.bf16.msra.mxu1 %v7664_v25  ;;  %v9763_v13 = vld [vmem:[%s15458_s5 + $0x48c] sm:$0xf]  ;;  %v7536_v15 = vor.u32 %v9819_v7, %v7533_v8  ;;  %v9712_v23 = vld [vmem:[%s15458_s5 + $0x2ec] sm:$0xf0]  ;;  %v9740_v7 = vld [vmem:[%s15458_s5 + $0x3d4] sm:$0xf] }
 0x17b   :  { %v7309_v14 = vld [vmem:[%s15458_s5 + $0x4a8] sm:$0xf0]  ;;  %v7731_v25 = vld [vmem:[%s15458_s5 + $0x7d0] sm:$0xf]  ;;  %v7092_v33 = vor.u32 %v9712_v23, %v7091_v21  ;;  %v7221_v8 = vld [vmem:[%s15458_s5 + $0x3f0] sm:$0xf0] }
 0x17c   :  { %2433 = vmatpush.bf16.msrb.mxu2 %v6800_v30  ;;  %2457 = vmatpush.bf16.msra.mxu0 %v7440_v31  ;;  %v9811_v19 = vld [vmem:[%s15458_s5 + $0x60c] sm:$0xf]  ;;  %v7312_v22 = vor.u32 %v9763_v13, %v7309_v14  ;;  %v6867_v31 = vld [vmem:[%s15458_s5 + $0x110] sm:$0xf]  ;;  %v7732_v35 = vor.u32 %v9872_v26, %v7731_v25  ;;  %v7189_v21 = vld [vmem:[%s15458_s5 + $0x3b0] sm:$0xf0] }
 0x17d   :  { %v7501_v20 = vld [vmem:[%s15458_s5 + $0x628] sm:$0xf0]  ;;  %v6803_v59 = vld [vmem:[%s15458_s5 + $0x90] sm:$0xf] }
 0x17e   :  { %2449 = vmatpush.bf16.msrb.mxu3 %v6992_v39  ;;  %2473 = vmatpush.bf16.msra.mxu1 %v7632_v40  ;;  %v9755_v28 = vld [vmem:[%s15458_s5 + $0x44c] sm:$0xf]  ;;  %v7504_v30 = vor.u32 %v9811_v19, %v7501_v20  ;;  %v7699_v39 = vld [vmem:[%s15458_s5 + $0x790] sm:$0xf]  ;;  %v9732_v20 = vld [vmem:[%s15458_s5 + $0x394] sm:$0xf] }
 0x17f   :  { %v7277_v29 = vld [vmem:[%s15458_s5 + $0x468] sm:$0xf0]  ;;  %v9864_v40 = vld [vmem:[%s15458_s5 + $0x7ac] sm:$0xf0] }
 0x180   :  { %2434 = vmatpush.bf16.msrb.mxu2 %v6768_v44  ;;  %2458 = vmatpush.bf16.msra.mxu0 %v7408_v45  ;;  %v7280_v37 = vor.u32 %v9755_v28, %v7277_v29  ;;  %v9747_v42 = vld [vmem:[%s15458_s5 + $0x40c] sm:$0xf]  ;;  %v6835_v44 = vld [vmem:[%s15458_s5 + $0xd0] sm:$0xf]  ;;  %v7700_v50 = vor.u32 %v9864_v40, %v7699_v39  ;;  %v6965_v28 = vld [vmem:[%s15458_s5 + $0x1f0] sm:$0xf0] }
 0x181   :  { %2450 = vmatmul.bf16.vlgmr.msrb.gmra.mxu3 %v11298_v34  ;;  %v7245_v43 = vld [vmem:[%s15458_s5 + $0x428] sm:$0xf0]  ;;  %v9648_v45 = vld [vmem:[%s15458_s5 + $0xec] sm:$0xf0] }
 0x182   :  { %2498 = vmatpush.bf16.msra.mxu3 %v7220_v41  ;;  %2474 = vmatpush.bf16.msra.mxu1 %v7600_v54  ;;  %v6868_v41 = vor.u32 %v9656_v32, %v6867_v31  ;;  %v7248_v52 = vor.u32 %v9747_v42, %v7245_v43  ;;  %v9696_v54 = vld [vmem:[%s15458_s5 + $0x26c] sm:$0xf0]  ;;  %v6836_v55 = vor.u32 %v9648_v45, %v6835_v44  ;;  %v6933_v42 = vld [vmem:[%s15458_s5 + $0x1b0] sm:$0xf0] }
 0x183   :  { %v7028_v63 = vor.u32 %v9696_v54, %v7027_v53  ;;  %v9688_v2 = vld [vmem:[%s15458_s5 + $0x22c] sm:$0xf0]  ;;  %v7160_v44 = vor.u32 %v9724_v36, %v7157_v38  ;;  %v7445_v36 = vld [vmem:[%s15458_s5 + $0x5b0] sm:$0xf0] }
 0x184   :  { %2435 = vmatpush.bf16.msrb.mxu2 %v6736_v60  ;;  %2459 = vmatpush.bf16.msra.mxu0 %v7376_v61  ;;  %v9640_v60 = vld [vmem:[%s15458_s5 + $0xac] sm:$0xf0]  ;;  %v9684_v38 = vld [vmem:[%s15458_s5 + $0x214] sm:$0xf] }
 0x185   :  { %v7443_v61 = vld [vmem:[%s15458_s5 + $0x590] sm:$0xf]  ;;  %v6804_v5 = vor.u32 %v9640_v60, %v6803_v59 }
 0x186   :  { %2499 = vmatpush.bf16.msra.mxu3 %v7188_v57  ;;  %2475 = vmatpush.bf16.msra.mxu1 %v7568_v3  ;;  %v7667_v57 = vld [vmem:[%s15458_s5 + $0x750] sm:$0xf] }
 0x187   :  { %2436 = vmatmul.bf16.vlgmr.msrb.gmra.mxu2 %v11320_v51  ;;  %v7668_v1 = vor.u32 %v9856_v58, %v7667_v57  ;;  %v7635_v3 = vld [vmem:[%s15458_s5 + $0x710] sm:$0xf] }
 0x188   :  { %2484 = vmatpush.bf16.msra.mxu2 %v6964_v0  ;;  %2460 = vmatpush.bf16.msra.mxu0 %v7344_v9  ;;  %v6995_v0 = vld [vmem:[%s15458_s5 + $0x210] sm:$0xf]  ;;  %v7636_v14 = vor.u32 %v9848_v4, %v7635_v3 }
 0x189   :  { %v6771_v9 = vld [vmem:[%s15458_s5 + $0x50] sm:$0xf]  ;;  %v6996_v13 = vor.u32 %v9688_v2, %v6995_v0  ;;  %v7733_v2 = vld [vmem:[%s15458_s5 + $0x7f0] sm:$0xf0] }
 0x18a   :  { %2500 = vmatpush.bf16.msra.mxu3 %v7156_v6  ;;  %2476 = vmatpush.bf16.msra.mxu1 %v7536_v15  ;;  %v7444_v6 = vor.u32 %v9800_v62, %v7443_v61  ;;  %v9632_v10 = vld [vmem:[%s15458_s5 + $0x6c] sm:$0xf0]  ;;  %v7224_v15 = vor.u32 %v9740_v7, %v7221_v8  ;;  %v9708_v62 = vld [vmem:[%s15458_s5 + $0x2d4] sm:$0xf] }
 0x18b   :  { %v7411_v11 = vld [vmem:[%s15458_s5 + $0x550] sm:$0xf] }
 0x18c   :  { %2485 = vmatpush.bf16.msra.mxu2 %v6932_v12  ;;  %2461 = vmatpush.bf16.msra.mxu0 %v7312_v22  ;;  %v9792_v12 = vld [vmem:[%s15458_s5 + $0x56c] sm:$0xf0] }
 0x18d   :  { %v7603_v16 = vld [vmem:[%s15458_s5 + $0x6d0] sm:$0xf]  ;;  %v7412_v19 = vor.u32 %v9792_v12, %v7411_v11  ;;  %v7061_v11 = vld [vmem:[%s15458_s5 + $0x2b0] sm:$0xf0] }
 0x18e   :  { %2501 = vmatpush.bf16.msra.mxu3 %v7124_v18  ;;  %2477 = vmatpush.bf16.msra.mxu1 %v7504_v30  ;;  %v9840_v17 = vld [vmem:[%s15458_s5 + $0x6ec] sm:$0xf0]  ;;  %v6772_v18 = vor.u32 %v9632_v10, %v6771_v9  ;;  %v7192_v30 = vor.u32 %v9732_v20, %v7189_v21  ;;  %v9700_v10 = vld [vmem:[%s15458_s5 + $0x294] sm:$0xf] }
 0x18f   :  { %v6739_v22 = vld [vmem:[%s15458_s5 + $0x10] sm:$0xf]  ;;  %v7604_v29 = vor.u32 %v9840_v17, %v7603_v16  ;;  %v9804_v20 = vld [vmem:[%s15458_s5 + $0x5d4] sm:$0xf] }
 0x190   :  { %2486 = vmatpush.bf16.msra.mxu2 %v6900_v27  ;;  %2462 = vmatpush.bf16.msra.mxu0 %v7280_v37  ;;  %v9624_v23 = vld [vmem:[%s15458_s5 + $0x2c] sm:$0xf0]  ;;  %v9676_v27 = vld [vmem:[%s15458_s5 + $0x1d4] sm:$0xf] }
 0x191   :  { %2478 = vmatmul.bf16.vlgmr.msra.gmra.mxu1 %v11365_v24  ;;  %v7379_v25 = vld [vmem:[%s15458_s5 + $0x510] sm:$0xf]  ;;  %v6740_v31 = vor.u32 %v9624_v23, %v6739_v22  ;;  %v6968_v37 = vor.u32 %v9676_v27, %v6965_v28  ;;  %v7477_v21 = vld [vmem:[%s15458_s5 + $0x5f0] sm:$0xf0]  ;;  %v7064_v22 = vor.u32 %v9700_v10, %v7061_v11  ;;  %v7163_v10 = vld [vmem:[%s15458_s5 + $0x358] sm:$0xf] }
 0x192   :  { %2502 = vmatpush.bf16.msra.mxu3 %v7092_v33  ;;  %2526 = vmatpush.bf16.msrb.mxu1 %v7732_v35  ;;  %v9784_v26 = vld [vmem:[%s15458_s5 + $0x52c] sm:$0xf0]  ;;  %v9692_v27 = vld [vmem:[%s15458_s5 + $0x254] sm:$0xf] }
 0x193   :  { %v7380_v32 = vor.u32 %v9784_v26, %v7379_v25  ;;  %v7571_v33 = vld [vmem:[%s15458_s5 + $0x690] sm:$0xf]  ;;  %v7029_v28 = vld [vmem:[%s15458_s5 + $0x270] sm:$0xf0] }
 0x194   :  { %2487 = vmatpush.bf16.msra.mxu2 %v6868_v41  ;;  %2463 = vmatpush.bf16.msra.mxu0 %v7248_v52  ;;  %v9832_v35 = vld [vmem:[%s15458_s5 + $0x6ac] sm:$0xf0]  ;;  %v9668_v41 = vld [vmem:[%s15458_s5 + $0x194] sm:$0xf] }
 0x195   :  { %v7347_v39 = vld [vmem:[%s15458_s5 + $0x4d0] sm:$0xf]  ;;  %v7572_v43 = vor.u32 %v9832_v35, %v7571_v33  ;;  %v7125_v52 = vld [vmem:[%s15458_s5 + $0x330] sm:$0xf0] }
 0x196   :  { %2503 = vmatpush.bf16.msra.mxu3 %v7060_v49  ;;  %2527 = vmatpush.bf16.msrb.mxu1 %v7700_v50  ;;  %v9776_v40 = vld [vmem:[%s15458_s5 + $0x4ec] sm:$0xf0]  ;;  %v9716_v49 = vld [vmem:[%s15458_s5 + $0x314] sm:$0xf]  ;;  %v6936_v50 = vor.u32 %v9668_v41, %v6933_v42 }
 0x197   :  { %2464 = vmatmul.bf16.vlgmr.msra.gmra.mxu0 %v11402_v46  ;;  %v7348_v45 = vor.u32 %v9776_v40, %v7347_v39  ;;  %v9824_v48 = vld [vmem:[%s15458_s5 + $0x66c] sm:$0xf0]  ;;  %v7128_v59 = vor.u32 %v9716_v49, %v7125_v52  ;;  %v6805_v33 = vld [vmem:[%s15458_s5 + $0xb0] sm:$0xf0] }
 0x198   :  { %2488 = vmatpush.bf16.msra.mxu2 %v6836_v55  ;;  %2512 = vmatpush.bf16.msrb.mxu0 %v7476_v56  ;;  %v7315_v53 = vld [vmem:[%s15458_s5 + $0x490] sm:$0xf]  ;;  %v9660_v55 = vld [vmem:[%s15458_s5 + $0x154] sm:$0xf]  ;;  %v7540_v57 = vor.u32 %v9824_v48, %v7539_v47  ;;  %v9745_v47 = vld [vmem:[%s15458_s5 + $0x3f4] sm:$0xf0] }
 0x199   :  { %v9768_v54 = vld [vmem:[%s15458_s5 + $0x4ac] sm:$0xf0]  ;;  %v6901_v56 = vld [vmem:[%s15458_s5 + $0x170] sm:$0xf0] }
 0x19a   :  { %2504 = vmatpush.bf16.msra.mxu3 %v7028_v63  ;;  %2528 = vmatpush.bf16.msrb.mxu1 %v7668_v1  ;;  %v7507_v58 = vld [vmem:[%s15458_s5 + $0x610] sm:$0xf]  ;;  %v7316_v60 = vor.u32 %v9768_v54, %v7315_v53  ;;  %v7093_v63 = vld [vmem:[%s15458_s5 + $0x2f0] sm:$0xf0]  ;;  %v6904_v0 = vor.u32 %v9660_v55, %v6901_v56 }
 0x19b   :  { %v9816_v61 = vld [vmem:[%s15458_s5 + $0x62c] sm:$0xf0]  ;;  %v9868_v1 = vld [vmem:[%s15458_s5 + $0x7d4] sm:$0xf]  ;;  %v7096_v8 = vor.u32 %v9708_v62, %v7093_v63 }
 0x19c   :  { %2489 = vmatpush.bf16.msra.mxu2 %v6804_v5  ;;  %2513 = vmatpush.bf16.msrb.mxu0 %v7444_v6  ;;  %v7283_v3 = vld [vmem:[%s15458_s5 + $0x450] sm:$0xf]  ;;  %v9652_v5 = vld [vmem:[%s15458_s5 + $0x114] sm:$0xf]  ;;  %v7508_v7 = vor.u32 %v9816_v61, %v7507_v58  ;;  %v7736_v9 = vor.u32 %v9868_v1, %v7733_v2  ;;  %v9737_v61 = vld [vmem:[%s15458_s5 + $0x3b4] sm:$0xf0] }
 0x19d   :  { %v9760_v4 = vld [vmem:[%s15458_s5 + $0x46c] sm:$0xf0]  ;;  %v6869_v6 = vld [vmem:[%s15458_s5 + $0x130] sm:$0xf0]  ;;  %v6971_v2 = vld [vmem:[%s15458_s5 + $0x1d8] sm:$0xf] }
 0x19e   :  { %2505 = vmatpush.bf16.msra.mxu3 %v6996_v13  ;;  %2529 = vmatpush.bf16.msrb.mxu1 %v7636_v14  ;;  %v7284_v12 = vor.u32 %v9760_v4, %v7283_v3  ;;  %v6872_v13 = vor.u32 %v9652_v5, %v6869_v6  ;;  %v9860_v14 = vld [vmem:[%s15458_s5 + $0x794] sm:$0xf]  ;;  %v7251_v16 = vld [vmem:[%s15458_s5 + $0x410] sm:$0xf]  ;;  %v9681_v3 = vld [vmem:[%s15458_s5 + $0x1f4] sm:$0xf0] }
 0x19f   :  { %v9752_v17 = vld [vmem:[%s15458_s5 + $0x42c] sm:$0xf0]  ;;  %v9796_v35 = vld [vmem:[%s15458_s5 + $0x594] sm:$0xf]  ;;  %v6972_v11 = vor.u32 %v9681_v3, %v6971_v2  ;;  %v7035_v2 = vld [vmem:[%s15458_s5 + $0x258] sm:$0xf] }
 0x1a0   :  { %2490 = vmatpush.bf16.msra.mxu2 %v6772_v18  ;;  %2514 = vmatpush.bf16.msrb.mxu0 %v7412_v19  ;;  %v9644_v18 = vld [vmem:[%s15458_s5 + $0xd4] sm:$0xf]  ;;  %v7252_v25 = vor.u32 %v9752_v17, %v7251_v16  ;;  %v9673_v16 = vld [vmem:[%s15458_s5 + $0x1b4] sm:$0xf0] }
 0x1a1   :  { %2506 = vmatmul.bf16.vlgmr.msra.gmra.mxu3 %v11298_v34  ;;  %v6837_v19 = vld [vmem:[%s15458_s5 + $0xf0] sm:$0xf0]  ;;  %v9697_v3 = vld [vmem:[%s15458_s5 + $0x274] sm:$0xf0] }
 0x1a2   :  { %2554 = vmatpush.bf16.msrb.mxu3 %v7224_v15  ;;  %2530 = vmatpush.bf16.msrb.mxu1 %v7604_v29  ;;  %v7701_v15 = vld [vmem:[%s15458_s5 + $0x7b0] sm:$0xf0]  ;;  %v6840_v26 = vor.u32 %v9644_v18, %v6837_v19 }
 0x1a3   :  { %v7704_v23 = vor.u32 %v9860_v14, %v7701_v15  ;;  %v9852_v29 = vld [vmem:[%s15458_s5 + $0x754] sm:$0xf]  ;;  %v6939_v15 = vld [vmem:[%s15458_s5 + $0x198] sm:$0xf] }
 0x1a4   :  { %2491 = vmatpush.bf16.msra.mxu2 %v6740_v31  ;;  %2515 = vmatpush.bf16.msrb.mxu0 %v7380_v32  ;;  %v7669_v31 = vld [vmem:[%s15458_s5 + $0x770] sm:$0xf0] }
 0x1a5   :  { %v9636_v32 = vld [vmem:[%s15458_s5 + $0x94] sm:$0xf]  ;;  %v7672_v39 = vor.u32 %v9852_v29, %v7669_v31  ;;  %v9665_v29 = vld [vmem:[%s15458_s5 + $0x174] sm:$0xf0] }
 0x1a6   :  { %2555 = vmatpush.bf16.msrb.mxu3 %v7192_v30  ;;  %2531 = vmatpush.bf16.msrb.mxu1 %v7572_v43  ;;  %v7480_v30 = vor.u32 %v9804_v20, %v7477_v21  ;;  %v6808_v40 = vor.u32 %v9636_v32, %v6805_v33  ;;  %v6997_v41 = vld [vmem:[%s15458_s5 + $0x230] sm:$0xf0] }
 0x1a7   :  { %2492 = vmatmul.bf16.vlgmr.msra.gmra.mxu2 %v11320_v51  ;;  %v9844_v42 = vld [vmem:[%s15458_s5 + $0x714] sm:$0xf]  ;;  %v7000_v53 = vor.u32 %v9684_v38, %v6997_v41 }
 0x1a8   :  { %2540 = vmatpush.bf16.msrb.mxu2 %v6968_v37  ;;  %2516 = vmatpush.bf16.msrb.mxu0 %v7348_v45  ;;  %v7032_v37 = vor.u32 %v9692_v27, %v7029_v28  ;;  %v7637_v43 = vld [vmem:[%s15458_s5 + $0x730] sm:$0xf0]  ;;  %v7227_v45 = vld [vmem:[%s15458_s5 + $0x3d8] sm:$0xf] }
 0x1a9   :  { %v9628_v48 = vld [vmem:[%s15458_s5 + $0x54] sm:$0xf]  ;;  %v7640_v54 = vor.u32 %v9844_v42, %v7637_v43  ;;  %v7228_v55 = vor.u32 %v9745_v47, %v7227_v45  ;;  %v6907_v28 = vld [vmem:[%s15458_s5 + $0x158] sm:$0xf] }
 0x1aa   :  { %2556 = vmatpush.bf16.msrb.mxu3 %v7160_v44  ;;  %2532 = vmatpush.bf16.msrb.mxu1 %v7540_v57  ;;  %v7448_v44 = vor.u32 %v9796_v35, %v7445_v36  ;;  %v6773_v49 = vld [vmem:[%s15458_s5 + $0x70] sm:$0xf0]  ;;  %v7099_v36 = vld [vmem:[%s15458_s5 + $0x2d8] sm:$0xf]  ;;  %v6908_v38 = vor.u32 %v9665_v29, %v6907_v28 }
 0x1ab   :  { %v7413_v52 = vld [vmem:[%s15458_s5 + $0x570] sm:$0xf0]  ;;  %v6776_v58 = vor.u32 %v9628_v48, %v6773_v49  ;;  %v6875_v43 = vld [vmem:[%s15458_s5 + $0x118] sm:$0xf] }
 0x1ac   :  { %2541 = vmatpush.bf16.msrb.mxu2 %v6936_v50  ;;  %2517 = vmatpush.bf16.msrb.mxu0 %v7316_v60  ;;  %v9788_v50 = vld [vmem:[%s15458_s5 + $0x554] sm:$0xf]  ;;  %v7195_v60 = vld [vmem:[%s15458_s5 + $0x398] sm:$0xf] }
 0x1ad   :  { %v9836_v56 = vld [vmem:[%s15458_s5 + $0x6d4] sm:$0xf]  ;;  %v7196_v5 = vor.u32 %v9737_v61, %v7195_v60  ;;  %v7067_v49 = vld [vmem:[%s15458_s5 + $0x298] sm:$0xf] }
 0x1ae   :  { %2557 = vmatpush.bf16.msrb.mxu3 %v7128_v59  ;;  %2533 = vmatpush.bf16.msrb.mxu1 %v7508_v7  ;;  %v7605_v57 = vld [vmem:[%s15458_s5 + $0x6f0] sm:$0xf0]  ;;  %v7416_v59 = vor.u32 %v9788_v50, %v7413_v52  ;;  %v9705_v50 = vld [vmem:[%s15458_s5 + $0x2b4] sm:$0xf0] }
 0x1af   :  { %v9620_v62 = vld [vmem:[%s15458_s5 + $0x14] sm:$0xf]  ;;  %v7608_v4 = vor.u32 %v9836_v56, %v7605_v57  ;;  %v7483_v60 = vld [vmem:[%s15458_s5 + $0x5d8] sm:$0xf] }
 0x1b0   :  { %2542 = vmatpush.bf16.msrb.mxu2 %v6904_v0  ;;  %2518 = vmatpush.bf16.msrb.mxu0 %v7284_v12  ;;  %v6741_v63 = vld [vmem:[%s15458_s5 + $0x30] sm:$0xf0]  ;;  %v9729_v12 = vld [vmem:[%s15458_s5 + $0x374] sm:$0xf0] }
 0x1b1   :  { %2534 = vmatmul.bf16.vlgmr.msrb.gmra.mxu1 %v11365_v24  ;;  %v9780_v0 = vld [vmem:[%s15458_s5 + $0x514] sm:$0xf]  ;;  %v6744_v6 = vor.u32 %v9620_v62, %v6741_v63  ;;  %v7164_v18 = vor.u32 %v9729_v12, %v7163_v10  ;;  %v9809_v61 = vld [vmem:[%s15458_s5 + $0x5f4] sm:$0xf0]  ;;  %v7068_v62 = vor.u32 %v9705_v50, %v7067_v49 }
 0x1b2   :  { %2558 = vmatpush.bf16.msrb.mxu3 %v7096_v8  ;;  %2582 = vmatpush.bf16.msra.mxu1 %v7736_v9  ;;  %v7381_v1 = vld [vmem:[%s15458_s5 + $0x530] sm:$0xf0]  ;;  %v9801_v10 = vld [vmem:[%s15458_s5 + $0x5b4] sm:$0xf0] }
 0x1b3   :  { %v7384_v7 = vor.u32 %v9780_v0, %v7381_v1  ;;  %v9828_v8 = vld [vmem:[%s15458_s5 + $0x694] sm:$0xf]  ;;  %v7003_v12 = vld [vmem:[%s15458_s5 + $0x218] sm:$0xf] }
 0x1b4   :  { %2543 = vmatpush.bf16.msrb.mxu2 %v6872_v13  ;;  %2519 = vmatpush.bf16.msrb.mxu0 %v7252_v25  ;;  %v7573_v9 = vld [vmem:[%s15458_s5 + $0x6b0] sm:$0xf0]  ;;  %v9721_v25 = vld [vmem:[%s15458_s5 + $0x334] sm:$0xf0] }
 0x1b5   :  { %v9772_v13 = vld [vmem:[%s15458_s5 + $0x4d4] sm:$0xf]  ;;  %v7576_v17 = vor.u32 %v9828_v8, %v7573_v9  ;;  %v9641_v8 = vld [vmem:[%s15458_s5 + $0xb4] sm:$0xf0] }
 0x1b6   :  { %2559 = vmatpush.bf16.msrb.mxu3 %v7064_v22  ;;  %2583 = vmatpush.bf16.msra.mxu1 %v7704_v23  ;;  %v7349_v14 = vld [vmem:[%s15458_s5 + $0x4f0] sm:$0xf0]  ;;  %v7131_v22 = vld [vmem:[%s15458_s5 + $0x318] sm:$0xf]  ;;  %v6940_v23 = vor.u32 %v9673_v16, %v6939_v15 }
 0x1b7   :  { %2520 = vmatmul.bf16.vlgmr.msrb.gmra.mxu0 %v11402_v46  ;;  %v7352_v19 = vor.u32 %v9772_v13, %v7349_v14  ;;  %v9820_v20 = vld [vmem:[%s15458_s5 + $0x654] sm:$0xf]  ;;  %v7132_v32 = vor.u32 %v9721_v25, %v7131_v22  ;;  %v7451_v9 = vld [vmem:[%s15458_s5 + $0x598] sm:$0xf] }
 0x1b8   :  { %2544 = vmatpush.bf16.msrb.mxu2 %v6840_v26  ;;  %2568 = vmatpush.bf16.msra.mxu0 %v7480_v30  ;;  %v7541_v21 = vld [vmem:[%s15458_s5 + $0x670] sm:$0xf0]  ;;  %v9689_v16 = vld [vmem:[%s15458_s5 + $0x234] sm:$0xf0] }
 0x1b9   :  { %v9764_v26 = vld [vmem:[%s15458_s5 + $0x494] sm:$0xf]  ;;  %v7544_v30 = vor.u32 %v9820_v20, %v7541_v21  ;;  %v9741_v20 = vld [vmem:[%s15458_s5 + $0x3dc] sm:$0xf]  ;;  %v6779_v22 = vld [vmem:[%s15458_s5 + $0x58] sm:$0xf] }
 0x1ba   :  { %2560 = vmatpush.bf16.msrb.mxu3 %v7032_v37  ;;  %2584 = vmatpush.bf16.msra.mxu1 %v7672_v39  ;;  %v7317_v27 = vld [vmem:[%s15458_s5 + $0x4b0] sm:$0xf0]  ;;  %v9713_v37 = vld [vmem:[%s15458_s5 + $0x2f4] sm:$0xf0]  ;;  %v7229_v21 = vld [vmem:[%s15458_s5 + $0x3f8] sm:$0xf0] }
 0x1bb   :  { %v9812_v31 = vld [vmem:[%s15458_s5 + $0x614] sm:$0xf]  ;;  %v7320_v33 = vor.u32 %v9764_v26, %v7317_v27  ;;  %v7739_v39 = vld [vmem:[%s15458_s5 + $0x7d8] sm:$0xf]  ;;  %v7100_v47 = vor.u32 %v9713_v37, %v7099_v36  ;;  %v7004_v27 = vor.u32 %v9689_v16, %v7003_v12  ;;  %v7232_v29 = vor.u32 %v9741_v20, %v7229_v21  ;;  %v7197_v36 = vld [vmem:[%s15458_s5 + $0x3b8] sm:$0xf0] }
 0x1bc   :  { %2545 = vmatpush.bf16.msrb.mxu2 %v6808_v40  ;;  %2569 = vmatpush.bf16.msra.mxu0 %v7448_v44  ;;  %v7509_v35 = vld [vmem:[%s15458_s5 + $0x630] sm:$0xf0]  ;;  %v9873_v40 = vld [vmem:[%s15458_s5 + $0x7f4] sm:$0xf0]  ;;  %v9869_v20 = vld [vmem:[%s15458_s5 + $0x7dc] sm:$0xf] }
 0x1bd   :  { %v9756_v41 = vld [vmem:[%s15458_s5 + $0x454] sm:$0xf]  ;;  %v9657_v44 = vld [vmem:[%s15458_s5 + $0x134] sm:$0xf0]  ;;  %v7512_v45 = vor.u32 %v9812_v31, %v7509_v35  ;;  %v7740_v48 = vor.u32 %v9873_v40, %v7739_v39  ;;  %v9733_v35 = vld [vmem:[%s15458_s5 + $0x39c] sm:$0xf] }
 0x1be   :  { %2561 = vmatpush.bf16.msrb.mxu3 %v7000_v53  ;;  %2585 = vmatpush.bf16.msra.mxu1 %v7640_v54  ;;  %v7285_v42 = vld [vmem:[%s15458_s5 + $0x470] sm:$0xf0]  ;;  %v6876_v53 = vor.u32 %v9657_v44, %v6875_v43  ;;  %v7707_v54 = vld [vmem:[%s15458_s5 + $0x798] sm:$0xf]  ;;  %v6973_v43 = vld [vmem:[%s15458_s5 + $0x1f8] sm:$0xf0] }
 0x1bf   :  { %v7288_v52 = vor.u32 %v9756_v41, %v7285_v42  ;;  %v9748_v56 = vld [vmem:[%s15458_s5 + $0x414] sm:$0xf]  ;;  %v7419_v25 = vld [vmem:[%s15458_s5 + $0x558] sm:$0xf]  ;;  %v9677_v42 = vld [vmem:[%s15458_s5 + $0x1dc] sm:$0xf] }
 0x1c0   :  { %2546 = vmatpush.bf16.msrb.mxu2 %v6776_v58  ;;  %2570 = vmatpush.bf16.msra.mxu0 %v7416_v59  ;;  %v7253_v57 = vld [vmem:[%s15458_s5 + $0x430] sm:$0xf0]  ;;  %v6843_v58 = vld [vmem:[%s15458_s5 + $0xd8] sm:$0xf]  ;;  %v7741_v21 = vld [vmem:[%s15458_s5 + $0x7f8] sm:$0xf0] }
 0x1c1   :  { %2562 = vmatmul.bf16.vlgmr.msrb.gmra.mxu3 %v11298_v34  ;;  %v9649_v59 = vld [vmem:[%s15458_s5 + $0xf4] sm:$0xf0]  ;;  %v7256_v0 = vor.u32 %v9748_v56, %v7253_v57  ;;  %v6976_v56 = vor.u32 %v9677_v42, %v6973_v43  ;;  %v7165_v57 = vld [vmem:[%s15458_s5 + $0x378] sm:$0xf0] }
 0x1c2   :  { %2610 = vmatpush.bf16.msra.mxu3 %v7228_v55  ;;  %2586 = vmatpush.bf16.msra.mxu1 %v7608_v4  ;;  %v9865_v55 = vld [vmem:[%s15458_s5 + $0x7b4] sm:$0xf0]  ;;  %v6844_v1 = vor.u32 %v9649_v59, %v6843_v58  ;;  %v9645_v43 = vld [vmem:[%s15458_s5 + $0xdc] sm:$0xf] }
 0x1c3   :  { %v7708_v63 = vor.u32 %v9865_v55, %v7707_v54  ;;  %v7675_v4 = vld [vmem:[%s15458_s5 + $0x758] sm:$0xf] }
 0x1c4   :  { %2547 = vmatpush.bf16.msrb.mxu2 %v6744_v6  ;;  %2571 = vmatpush.bf16.msra.mxu0 %v7384_v7  ;;  %v9857_v6 = vld [vmem:[%s15458_s5 + $0x774] sm:$0xf0] }
 0x1c5   :  { %v6811_v7 = vld [vmem:[%s15458_s5 + $0x98] sm:$0xf]  ;;  %v7676_v14 = vor.u32 %v9857_v6, %v7675_v4 }
 0x1c6   :  { %2611 = vmatpush.bf16.msra.mxu3 %v7196_v5  ;;  %2587 = vmatpush.bf16.msra.mxu1 %v7576_v17  ;;  %v7484_v5 = vor.u32 %v9809_v61, %v7483_v60  ;;  %v6812_v15 = vor.u32 %v9641_v8, %v6811_v7  ;;  %v7643_v17 = vld [vmem:[%s15458_s5 + $0x718] sm:$0xf]  ;;  %v9669_v60 = vld [vmem:[%s15458_s5 + $0x19c] sm:$0xf] }
 0x1c7   :  { %2548 = vmatmul.bf16.vlgmr.msrb.gmra.mxu2 %v11320_v51  ;;  %v9793_v26 = vld [vmem:[%s15458_s5 + $0x574] sm:$0xf0]  ;;  %v6941_v61 = vld [vmem:[%s15458_s5 + $0x1b8] sm:$0xf0] }
 0x1c8   :  { %2596 = vmatpush.bf16.msra.mxu2 %v6972_v11  ;;  %2572 = vmatpush.bf16.msra.mxu0 %v7352_v19  ;;  %v7036_v11 = vor.u32 %v9697_v3, %v7035_v2  ;;  %v7452_v19 = vor.u32 %v9801_v10, %v7451_v9  ;;  %v9841_v31 = vld [vmem:[%s15458_s5 + $0x6f4] sm:$0xf0]  ;;  %v9717_v3 = vld [vmem:[%s15458_s5 + $0x31c] sm:$0xf]  ;;  %v6944_v4 = vor.u32 %v9669_v60, %v6941_v61 }
 0x1c9   :  { %v6747_v37 = vld [vmem:[%s15458_s5 + $0x18] sm:$0xf]  ;;  %v9661_v8 = vld [vmem:[%s15458_s5 + $0x15c] sm:$0xf] }
 0x1ca   :  { %2612 = vmatpush.bf16.msra.mxu3 %v7164_v18  ;;  %2588 = vmatpush.bf16.msra.mxu1 %v7544_v30  ;;  %v12203_v13 = vpop.f32.mrf.mxu2  ;;  %v9849_v18 = vld [vmem:[%s15458_s5 + $0x734] sm:$0xf0]  ;;  %v6909_v9 = vld [vmem:[%s15458_s5 + $0x178] sm:$0xf0] }
 0x1cb   :  { %v7644_v28 = vor.u32 %v9849_v18, %v7643_v17  ;;  %v7611_v30 = vld [vmem:[%s15458_s5 + $0x6d8] sm:$0xf]  ;;  %v9709_v17 = vld [vmem:[%s15458_s5 + $0x2dc] sm:$0xf] }
 0x1cc   :  { %2597 = vmatpush.bf16.msra.mxu2 %v6940_v23  ;;  %2573 = vmatpush.bf16.msra.mxu0 %v7320_v33  ;;  %v9633_v23 = vld [vmem:[%s15458_s5 + $0x74] sm:$0xf0]  ;;  %v7420_v33 = vor.u32 %v9793_v26, %v7419_v25  ;;  %v7612_v44 = vor.u32 %v9841_v31, %v7611_v30  ;;  %v7101_v18 = vld [vmem:[%s15458_s5 + $0x2f8] sm:$0xf0] }
 0x1cd   :  { %v9625_v39 = vld [vmem:[%s15458_s5 + $0x34] sm:$0xf0]  ;;  %v9653_v26 = vld [vmem:[%s15458_s5 + $0x11c] sm:$0xf]  ;;  %v7104_v31 = vor.u32 %v9709_v17, %v7101_v18 }
 0x1ce   :  { %2613 = vmatpush.bf16.msra.mxu3 %v7132_v32  ;;  %2589 = vmatpush.bf16.msra.mxu1 %v7512_v45  ;;  %v6780_v32 = vor.u32 %v9633_v23, %v6779_v22  ;;  %v7387_v40 = vld [vmem:[%s15458_s5 + $0x518] sm:$0xf]  ;;  %v7200_v45 = vor.u32 %v9733_v35, %v7197_v36  ;;  %v7069_v35 = vld [vmem:[%s15458_s5 + $0x2b8] sm:$0xf0] }
 0x1cf   :  { %v9785_v41 = vld [vmem:[%s15458_s5 + $0x534] sm:$0xf0]  ;;  %v7677_v61 = vld [vmem:[%s15458_s5 + $0x778] sm:$0xf0] }
 0x1d0   :  { %2598 = vmatpush.bf16.msra.mxu2 %v6908_v38  ;;  %2574 = vmatpush.bf16.msra.mxu0 %v7288_v52  ;;  %v12248_v38 = vpop.f32.mrf.mxu3  ;;  %v7388_v49 = vor.u32 %v9785_v41, %v7387_v40  ;;  %v7579_v50 = vld [vmem:[%s15458_s5 + $0x698] sm:$0xf]  ;;  %v7709_v40 = vld [vmem:[%s15458_s5 + $0x7b8] sm:$0xf0] }
 0x1d1   :  { %2590 = vmatmul.bf16.vlgmr.msra.gmra.mxu1 %v11365_v24  ;;  %v9833_v52 = vld [vmem:[%s15458_s5 + $0x6b4] sm:$0xf0]  ;;  %v9629_v17 = vld [vmem:[%s15458_s5 + $0x5c] sm:$0xf] }
 0x1d2   :  { %2614 = vmatpush.bf16.msra.mxu3 %v7100_v47  ;;  %2638 = vmatpush.bf16.msrb.mxu1 %v7740_v48  ;;  %v12265_v47 = vpop.f32.mrf.mxu1  ;;  %v6748_v48 = vor.u32 %v9625_v39, %v6747_v37  ;;  %v12276_v54 = vpop.f32.mrf.mxu2  ;;  %v7355_v58 = vld [vmem:[%s15458_s5 + $0x4d8] sm:$0xf]  ;;  %v9861_v39 = vld [vmem:[%s15458_s5 + $0x79c] sm:$0xf] }
 0x1d3   :  { %v9777_v59 = vld [vmem:[%s15458_s5 + $0x4f4] sm:$0xf0]  ;;  %v6781_v18 = vld [vmem:[%s15458_s5 + $0x78] sm:$0xf0] }
 0x1d4   :  { %2599 = vmatpush.bf16.msra.mxu2 %v6876_v53  ;;  %2575 = vmatpush.bf16.msra.mxu0 %v7256_v0  ;;  %v9725_v53 = vld [vmem:[%s15458_s5 + $0x35c] sm:$0xf]  ;;  %v12278_v55 = vpop.f32.mrf.mxu0  ;;  %v7356_v0 = vor.u32 %v9777_v59, %v7355_v58  ;;  %v9825_v2 = vld [vmem:[%s15458_s5 + $0x674] sm:$0xf0] }
 0x1d5   :  { %v7323_v6 = vld [vmem:[%s15458_s5 + $0x498] sm:$0xf]  ;;  %v7037_v58 = vld [vmem:[%s15458_s5 + $0x278] sm:$0xf0] }
 0x1d6   :  { %2615 = vmatpush.bf16.msra.mxu3 %v7068_v62  ;;  %2639 = vmatpush.bf16.msrb.mxu1 %v7708_v63  ;;  %v7580_v62 = vor.u32 %v9833_v52, %v7579_v50  ;;  %v7168_v63 = vor.u32 %v9725_v53, %v7165_v57  ;;  %v9769_v7 = vld [vmem:[%s15458_s5 + $0x4b4] sm:$0xf0]  ;;  %v7712_v50 = vor.u32 %v9861_v39, %v7709_v40  ;;  %v9693_v57 = vld [vmem:[%s15458_s5 + $0x25c] sm:$0xf] }
 0x1d7   :  { %2576 = vmatmul.bf16.vlgmr.msra.gmra.mxu0 %v11402_v46  ;;  %v7515_v12 = vld [vmem:[%s15458_s5 + $0x618] sm:$0xf]  ;;  %v9853_v59 = vld [vmem:[%s15458_s5 + $0x75c] sm:$0xf] }
 0x1d8   :  { %2600 = vmatpush.bf16.msra.mxu2 %v6844_v1  ;;  %2624 = vmatpush.bf16.msrb.mxu0 %v7484_v5  ;;  %v7547_v1 = vld [vmem:[%s15458_s5 + $0x658] sm:$0xf]  ;;  %v7133_v5 = vld [vmem:[%s15458_s5 + $0x338] sm:$0xf0]  ;;  %v12320_v10 = vpop.f32.mrf.mxu3 }
 0x1d9   :  { %v9817_v16 = vld [vmem:[%s15458_s5 + $0x634] sm:$0xf0]  ;;  %v9781_v39 = vld [vmem:[%s15458_s5 + $0x51c] sm:$0xf] }
 0x1da   :  { %2616 = vmatpush.bf16.msra.mxu3 %v7036_v11  ;;  %2640 = vmatpush.bf16.msrb.mxu1 %v7676_v14  ;;  %v7548_v11 = vor.u32 %v9825_v2, %v7547_v1  ;;  %v7136_v14 = vor.u32 %v9717_v3, %v7133_v5  ;;  %v7291_v22 = vld [vmem:[%s15458_s5 + $0x458] sm:$0xf]  ;;  %v12344_v23 = vpop.f32.mrf.mxu1  ;;  %v7516_v30 = vor.u32 %v9817_v16, %v7515_v12  ;;  %v7453_v1 = vld [vmem:[%s15458_s5 + $0x5b8] sm:$0xf0]  ;;  %v9982_v16 = vld [vmem:[%s15460_s7 + $0x360] sm:$0xf0] }
 0x1db   :  { %v9761_v25 = vld [vmem:[%s15458_s5 + $0x474] sm:$0xf0]  ;;  %v7040_v3 = vor.u32 %v9693_v57, %v7037_v58  ;;  %v7645_v12 = vld [vmem:[%s15458_s5 + $0x738] sm:$0xf0] }
 0x1dc   :  { %2601 = vmatpush.bf16.msra.mxu2 %v6812_v15  ;;  %2625 = vmatpush.bf16.msrb.mxu0 %v7452_v19  ;;  %v7324_v15 = vor.u32 %v9769_v7, %v7323_v6  ;;  %v6912_v19 = vor.u32 %v9661_v8, %v6909_v9  ;;  %v7292_v36 = vor.u32 %v9761_v25, %v7291_v22  ;;  %v7259_v41 = vld [vmem:[%s15458_s5 + $0x418] sm:$0xf]  ;;  %v7005_v9 = vld [vmem:[%s15458_s5 + $0x238] sm:$0xf0] }
 0x1dd   :  { %v9753_v42 = vld [vmem:[%s15458_s5 + $0x434] sm:$0xf0]  ;;  %v7680_v7 = vor.u32 %v9853_v59, %v7677_v61  ;;  %v7389_v40 = vld [vmem:[%s15458_s5 + $0x538] sm:$0xf0] }
 0x1de   :  { %2617 = vmatpush.bf16.msra.mxu3 %v7004_v27  ;;  %2641 = vmatpush.bf16.msrb.mxu1 %v7644_v28  ;;  %v6877_v27 = vld [vmem:[%s15458_s5 + $0x138] sm:$0xf0]  ;;  %v12355_v28 = vpop.f32.mrf.mxu2  ;;  %v7260_v53 = vor.u32 %v9753_v42, %v7259_v41  ;;  %v12482_v41 = vld [vmem:[%s15461_s6] sm:$0xff]  ;;  %v7943_v42 = vld [vmem:[%s15460_s7 + $0x188] sm:$0xf] }
 0x1df   :  { %v6880_v37 = vor.u32 %v9653_v26, %v6877_v27  ;;  %v9837_v26 = vld [vmem:[%s15458_s5 + $0x6dc] sm:$0xf]  ;;  %v8111_v58 = vld [vmem:[%s15460_s7 + $0x2d8] sm:$0xf] }
 0x1e0   :  { %2602 = vmatpush.bf16.msra.mxu2 %v6780_v32  ;;  %2626 = vmatpush.bf16.msrb.mxu0 %v7420_v33  ;;  %v7744_v32 = vor.u32 %v9869_v20, %v7741_v21  ;;  %v9701_v33 = vld [vmem:[%s15458_s5 + $0x29c] sm:$0xf]  ;;  %v12389_v52 = vpop.f32.mrf.mxu3 }
 0x1e1   :  { %2618 = vmatmul.bf16.vlgmr.msra.gmra.mxu3 %v11298_v34  ;;  %v7421_v20 = vld [vmem:[%s15458_s5 + $0x578] sm:$0xf0] }
 0x1e2   :  { %2666 = vmatpush.bf16.msrb.mxu3 %v7232_v29  ;;  %2642 = vmatpush.bf16.msrb.mxu1 %v7612_v44  ;;  %v12357_v29 = vpop.f32.mrf.mxu0  ;;  %v6845_v44 = vld [vmem:[%s15458_s5 + $0xf8] sm:$0xf0]  ;;  %v12416_v2 = vpop.f32.mrf.mxu1 }
 0x1e3   :  { %v7613_v27 = vld [vmem:[%s15458_s5 + $0x6f8] sm:$0xf0] }
 0x1e4   :  { %2603 = vmatpush.bf16.msra.mxu2 %v6748_v48  ;;  %2627 = vmatpush.bf16.msrb.mxu0 %v7388_v49  ;;  %v7485_v48 = vld [vmem:[%s15458_s5 + $0x5f8] sm:$0xf0]  ;;  %v7072_v49 = vor.u32 %v9701_v33, %v7069_v35  ;;  %v9975_v33 = vld [vmem:[%s15460_s7 + $0x328] sm:$0xf0] }
 0x1e5   :  { %v9621_v35 = vld [vmem:[%s15458_s5 + $0x1c] sm:$0xf] }
 0x1e6   :  { %2667 = vmatpush.bf16.msrb.mxu3 %v7200_v45  ;;  %2643 = vmatpush.bf16.msrb.mxu1 %v7580_v62  ;;  %v9805_v45 = vld [vmem:[%s15458_s5 + $0x5dc] sm:$0xf]  ;;  %v12421_v5 = vpop.f32.mrf.mxu2 }
 0x1e7   :  { %2604 = vmatmul.bf16.vlgmr.msra.gmra.mxu2 %v11320_v51  ;;  %v7488_v60 = vor.u32 %v9805_v45, %v7485_v48  ;;  %v9637_v62 = vld [vmem:[%s15458_s5 + $0x9c] sm:$0xf]  ;;  %v7616_v45 = vor.u32 %v9837_v26, %v7613_v27 }
 0x1e8   :  { %2652 = vmatpush.bf16.msrb.mxu2 %v6976_v56  ;;  %2628 = vmatpush.bf16.msrb.mxu0 %v7356_v0  ;;  %v6848_v56 = vor.u32 %v9645_v43, %v6845_v44  ;;  %v9797_v0 = vld [vmem:[%s15458_s5 + $0x59c] sm:$0xf]  ;;  %v9926_v43 = vld [vmem:[%s15460_s7 + $0x1a0] sm:$0xf0]  ;;  %v965_v44 = vperm.slane %v12482_v41, 1 }
 0x1e9   :  { %v7581_v57 = vld [vmem:[%s15458_s5 + $0x6b8] sm:$0xf0]  ;;  %v7944_v61 = vor.u32 %v9926_v43, %v7943_v42  ;;  %v10094_v43 = vld [vmem:[%s15460_s7 + $0x6e0] sm:$0xf0] }
 0x1ea   :  { %2668 = vmatpush.bf16.msrb.mxu3 %v7168_v63  ;;  %2644 = vmatpush.bf16.msrb.mxu1 %v7548_v11  ;;  %v6813_v63 = vld [vmem:[%s15458_s5 + $0xb8] sm:$0xf0]  ;;  %v12423_v6 = vpop.f32.mrf.mxu0 }
 0x1eb   :  { %v6816_v8 = vor.u32 %v9637_v62, %v6813_v63  ;;  %v9845_v11 = vld [vmem:[%s15458_s5 + $0x71c] sm:$0xf]  ;;  %v9968_v62 = vld [vmem:[%s15460_s7 + $0x2f0] sm:$0xf0] }
 0x1ec   :  { %2653 = vmatpush.bf16.msrb.mxu2 %v6944_v4  ;;  %2629 = vmatpush.bf16.msrb.mxu0 %v7324_v15  ;;  %v9685_v4 = vld [vmem:[%s15458_s5 + $0x21c] sm:$0xf]  ;;  %v8167_v15 = vld [vmem:[%s15460_s7 + $0x348] sm:$0xf]  ;;  %v7648_v22 = vor.u32 %v9845_v11, %v7645_v12  ;;  %v8083_v12 = vld [vmem:[%s15460_s7 + $0x2a0] sm:$0xf] }
 0x1ed   :  { %v7008_v21 = vor.u32 %v9685_v4, %v7005_v9  ;;  %v8168_v25 = vor.u32 %v9982_v16, %v8167_v15  ;;  %v9773_v63 = vld [vmem:[%s15458_s5 + $0x4dc] sm:$0xf] }
 0x1ee   :  { %2669 = vmatpush.bf16.msrb.mxu3 %v7136_v14  ;;  %2645 = vmatpush.bf16.msrb.mxu1 %v7516_v30  ;;  %v7456_v14 = vor.u32 %v9797_v0, %v7453_v1  ;;  %v6784_v30 = vor.u32 %v9629_v17, %v6781_v18  ;;  %v12502_v59 = vpop.f32.mrf.mxu2  ;;  %v7357_v0 = vld [vmem:[%s15458_s5 + $0x4f8] sm:$0xf0]  ;;  %v7915_v1 = vld [vmem:[%s15460_s7 + $0x150] sm:$0xf] }
 0x1ef   :  { %v9821_v9 = vld [vmem:[%s15458_s5 + $0x65c] sm:$0xf] }
 0x1f0   :  { %2654 = vmatpush.bf16.msrb.mxu2 %v6912_v19  ;;  %2630 = vmatpush.bf16.msrb.mxu0 %v7292_v36  ;;  %v9789_v19 = vld [vmem:[%s15458_s5 + $0x55c] sm:$0xf]  ;;  %v12468_v36 = vpop.f32.mrf.mxu3 }
 0x1f1   :  { %2646 = vmatmul.bf16.vlgmr.msrb.gmra.mxu1 %v11365_v24  ;;  %v7549_v11 = vld [vmem:[%s15458_s5 + $0x678] sm:$0xf0] }
 0x1f2   :  { %2670 = vmatpush.bf16.msrb.mxu3 %v7104_v31  ;;  %2694 = vmatpush.bf16.msra.mxu1 %v7744_v32  ;;  %v7424_v31 = vor.u32 %v9789_v19, %v7421_v20  ;;  %v8139_v32 = vld [vmem:[%s15460_s7 + $0x310] sm:$0xf]  ;;  %v9961_v16 = vld [vmem:[%s15460_s7 + $0x2b8] sm:$0xf0]  ;;  %v7887_v19 = vld [vmem:[%s15460_s7 + $0x118] sm:$0xf]  ;;  %v2328_v20 = vadd.f32 %v12421_v5, %v965_v44 }
 0x1f3   :  { %v8140_v48 = vor.u32 %v9975_v33, %v8139_v32  ;;  %v9765_v17 = vld [vmem:[%s15458_s5 + $0x49c] sm:$0xf]  ;;  %v8084_v26 = vor.u32 %v9961_v16, %v8083_v12  ;;  %v8055_v5 = vld [vmem:[%s15460_s7 + $0x268] sm:$0xf]  ;;  %v7999_v16 = vld [vmem:[%s15460_s7 + $0x1f8] sm:$0xf] }
 0x1f4   :  { %2655 = vmatpush.bf16.msrb.mxu2 %v6880_v37  ;;  %2631 = vmatpush.bf16.msrb.mxu0 %v7260_v53  ;;  %v6749_v37 = vld [vmem:[%s15458_s5 + $0x38] sm:$0xf0]  ;;  %v7392_v53 = vor.u32 %v9781_v39, %v7389_v40  ;;  %v7859_v39 = vld [vmem:[%s15460_s7 + $0xe0] sm:$0xf] }
 0x1f5   :  { %v7325_v18 = vld [vmem:[%s15458_s5 + $0x4b8] sm:$0xf0] }
 0x1f6   :  { %2671 = vmatpush.bf16.msrb.mxu3 %v7072_v49  ;;  %2695 = vmatpush.bf16.msra.mxu1 %v7712_v50  ;;  %v12491_v49 = vpop.f32.mrf.mxu1  ;;  %v6752_v50 = vor.u32 %v9621_v35, %v6749_v37  ;;  %v7328_v27 = vor.u32 %v9765_v17, %v7325_v18  ;;  %v9757_v35 = vld [vmem:[%s15458_s5 + $0x45c] sm:$0xf]  ;;  %v7803_v17 = vld [vmem:[%s15460_s7 + $0x70] sm:$0xf]  ;;  %v9891_v18 = vld [vmem:[%s15460_s7 + $0x88] sm:$0xf0] }
 0x1f7   :  { %2632 = vmatmul.bf16.vlgmr.msrb.gmra.mxu0 %v11402_v46  ;;  %v7293_v37 = vld [vmem:[%s15458_s5 + $0x478] sm:$0xf0] }
 0x1f8   :  { %2656 = vmatpush.bf16.msrb.mxu2 %v6848_v56  ;;  %2680 = vmatpush.bf16.msra.mxu0 %v7488_v60  ;;  %v9829_v56 = vld [vmem:[%s15458_s5 + $0x69c] sm:$0xf]  ;;  %v12504_v60 = vpop.f32.mrf.mxu0 }
 0x1f9   :  { %v7584_v4 = vor.u32 %v9829_v56, %v7581_v57  ;;  %v7296_v56 = vor.u32 %v9757_v35, %v7293_v37  ;;  %v8027_v57 = vld [vmem:[%s15460_s7 + $0x230] sm:$0xf]  ;;  %v7804_v35 = vor.u32 %v9891_v18, %v7803_v17 }
 0x1fa   :  { %2672 = vmatpush.bf16.msrb.mxu3 %v7040_v3  ;;  %2696 = vmatpush.bf16.msra.mxu1 %v7680_v7  ;;  %v964_v3 = vperm.slane %v12482_v41, 0  ;;  %v8112_v7 = vor.u32 %v9968_v62, %v8111_v58  ;;  %v9749_v62 = vld [vmem:[%s15458_s5 + $0x41c] sm:$0xf] }
 0x1fc   :  { %2657 = vmatpush.bf16.msrb.mxu2 %v6816_v8  ;;  %2681 = vmatpush.bf16.msra.mxu0 %v7456_v14  ;;  %v7360_v8 = vor.u32 %v9773_v63, %v7357_v0  ;;  %v2326_v14 = vadd.f32 %v12355_v28, %v965_v44  ;;  %v9912_v28 = vld [vmem:[%s15460_s7 + $0x130] sm:$0xf0]  ;;  %v2272_v40 = vadd.f32 %v12276_v54, %v964_v3  ;;  %v7261_v63 = vld [vmem:[%s15458_s5 + $0x438] sm:$0xf0] }
 0x1fd   :  { %v7888_v33 = vor.u32 %v9912_v28, %v7887_v19  ;;  %v7264_v12 = vor.u32 %v9749_v62, %v7261_v63  ;;  %v8363_v19 = vld [vmem:[%s15460_s7 + $0x4d0] sm:$0xf]  ;;  %v10031_v28 = vld [vmem:[%s15460_s7 + $0x4e8] sm:$0xf0]  ;;  %v7747_v62 = vld [vmem:[%s15460_s7] sm:$0xf] }
 0x1fe   :  { %2673 = vmatpush.bf16.msrb.mxu3 %v7008_v21  ;;  %2697 = vmatpush.bf16.msra.mxu1 %v7648_v22  ;;  %v12549_v21 = vpop.f32.mrf.mxu3  ;;  %v7552_v22 = vor.u32 %v9821_v9, %v7549_v11  ;;  %v2340_v32 = vadd.f32 %v12389_v52, %v2326_v14  ;;  %v12576_v42 = vpop.f32.mrf.mxu1  ;;  %v8615_v52 = vld [vmem:[%s15460_s7 + $0x6c8] sm:$0xf]  ;;  %v8364_v37 = vor.u32 %v10031_v28, %v8363_v19  ;;  %v9877_v63 = vld [vmem:[%s15460_s7 + $0x18] sm:$0xf0] }
 0x1ff   :  { %v8616_v0 = vor.u32 %v10094_v43, %v8615_v52  ;;  %v10024_v52 = vld [vmem:[%s15460_s7 + $0x4b0] sm:$0xf0]  ;;  %v8531_v43 = vld [vmem:[%s15460_s7 + $0x620] sm:$0xf]  ;;  %v7748_v17 = vor.u32 %v9877_v63, %v7747_v62  ;;  %v8279_v28 = vld [vmem:[%s15460_s7 + $0x428] sm:$0xf] }
 0x200   :  { %2658 = vmatpush.bf16.msrb.mxu2 %v6784_v30  ;;  %2682 = vmatpush.bf16.msra.mxu0 %v7424_v31  ;;  %v7517_v30 = vld [vmem:[%s15458_s5 + $0x638] sm:$0xf0]  ;;  %v2270_v31 = vadd.f32 %v12203_v13, %v964_v3  ;;  %v2354_v44 = vadd.f32 %v12423_v6, %v2340_v32  ;;  %v12591_v54 = vpop.f32.mrf.mxu0  ;;  %v9947_v6 = vld [vmem:[%s15460_s7 + $0x248] sm:$0xf0]  ;;  %v10038_v3 = vld [vmem:[%s15460_s7 + $0x520] sm:$0xf0] }
 0x201   :  { %2674 = vmatmul.bf16.vlgmr.msrb.gmra.mxu3 %v11298_v34  ;;  %v9919_v34 = vld [vmem:[%s15460_s7 + $0x168] sm:$0xf0]  ;;  %v9905_v13 = vld [vmem:[%s15460_s7 + $0xf8] sm:$0xf0]  ;;  %v8028_v11 = vor.u32 %v9947_v6, %v8027_v57 }
 0x202   :  { %5594 = vmatpush.bf16.msra.mxu3 %v8168_v25  ;;  %2698 = vmatpush.bf16.msra.mxu1 %v7616_v45  ;;  %v7916_v15 = vor.u32 %v9919_v34, %v7915_v1  ;;  %v9813_v25 = vld [vmem:[%s15458_s5 + $0x61c] sm:$0xf]  ;;  %v2342_v45 = vadd.f32 %v12468_v36, %v2328_v20  ;;  %v2284_v36 = vadd.f32 %v12248_v38, %v2270_v31  ;;  %v7831_v1 = vld [vmem:[%s15460_s7 + $0xa8] sm:$0xf]  ;;  %v9898_v38 = vld [vmem:[%s15460_s7 + $0xc0] sm:$0xf0] }
 0x203   :  { %v2286_v34 = vadd.f32 %v12320_v10, %v2272_v40  ;;  %v8587_v10 = vld [vmem:[%s15460_s7 + $0x690] sm:$0xf]  ;;  %v7832_v14 = vor.u32 %v9898_v38, %v7831_v1  ;;  %v9933_v31 = vld [vmem:[%s15460_s7 + $0x1d8] sm:$0xf0]  ;;  %v9884_v40 = vld [vmem:[%s15460_s7 + $0x50] sm:$0xf0] }
 0x204   :  { %2659 = vmatpush.bf16.msrb.mxu2 %v6752_v50  ;;  %2683 = vmatpush.bf16.msra.mxu0 %v7392_v53  ;;  %v7520_v50 = vor.u32 %v9813_v25, %v7517_v30  ;;  %v2356_v58 = vadd.f32 %v12504_v60, %v2342_v45  ;;  %v8391_v60 = vld [vmem:[%s15460_s7 + $0x508] sm:$0xf]  ;;  %v10080_v25 = vld [vmem:[%s15460_s7 + $0x670] sm:$0xf0]  ;;  %v967_v30 = vperm.slane %v12482_v41, 3 }
 0x205   :  { %v2300_v9 = vadd.f32 %v12357_v29, %v2286_v34  ;;  %v9940_v29 = vld [vmem:[%s15460_s7 + $0x210] sm:$0xf0]  ;;  %v9063_v45 = vld [vmem:[%s15460_s7 + $0xa48] sm:$0xf]  ;;  %v8307_v34 = vld [vmem:[%s15460_s7 + $0x460] sm:$0xf] }
 0x206   :  { %5595 = vmatpush.bf16.msra.mxu3 %v8140_v48  ;;  %2699 = vmatpush.bf16.msra.mxu1 %v7584_v4  ;;  %v12589_v48 = vpop.f32.mrf.mxu2  ;;  %v2298_v4 = vadd.f32 %v12278_v55, %v2284_v36  ;;  %v12632_v55 = vadd.f32 %v12491_v49, %v2356_v58  ;;  %v10017_v38 = vld [vmem:[%s15460_s7 + $0x478] sm:$0xf0] }
 0x207   :  { %2660 = vmatmul.bf16.vlgmr.msrb.gmra.mxu2 %v11320_v51  ;;  %v9954_v51 = vld [vmem:[%s15460_s7 + $0x280] sm:$0xf0] }
 0x208   :  { %5580 = vmatpush.bf16.msra.mxu2 %v7944_v61  ;;  %2684 = vmatpush.bf16.msra.mxu0 %v7360_v8  ;;  %v8056_v53 = vor.u32 %v9954_v51, %v8055_v5  ;;  %v7860_v61 = vor.u32 %v9905_v13, %v7859_v39  ;;  %v10087_v8 = vld [vmem:[%s15460_s7 + $0x6a8] sm:$0xf0]  ;;  %v8000_v5 = vor.u32 %v9940_v29, %v7999_v16  ;;  %v7971_v51 = vld [vmem:[%s15460_s7 + $0x1c0] sm:$0xf]  ;;  %v7775_v39 = vld [vmem:[%s15460_s7 + $0x38] sm:$0xf] }
 0x209   :  { %v8588_v49 = vor.u32 %v10087_v8, %v8587_v10  ;;  %v12675_v32 = vadd.f32 %v12265_v47, %v2298_v4  ;;  %v8335_v47 = vld [vmem:[%s15460_s7 + $0x498] sm:$0xf]  ;;  %v7972_v57 = vor.u32 %v9933_v31, %v7971_v51  ;;  %v7776_v58 = vor.u32 %v9884_v40, %v7775_v39  ;;  %v10150_v8 = vld [vmem:[%s15460_s7 + $0x8a0] sm:$0xf0]  ;;  %v10059_v51 = vld [vmem:[%s15460_s7 + $0x5c8] sm:$0xf0] }
 0x20a   :  { %5596 = vmatpush.bf16.msra.mxu3 %v8112_v7  ;;  %2700 = vmatpush.bf16.msra.mxu1 %v7552_v22  ;;  %v12622_v7 = vadd.f32 %v12416_v2, %v2354_v44  ;;  %v12634_v2 = vpop.f32.mrf.mxu3  ;;  %v10073_v44 = vld [vmem:[%s15460_s7 + $0x638] sm:$0xf0] }
 0x20b   :  { %v8532_v1 = vor.u32 %v10073_v44, %v8531_v43  ;;  %v10003_v43 = vld [vmem:[%s15460_s7 + $0x408] sm:$0xf0] }
 0x20c   :  { %5581 = vmatpush.bf16.msra.mxu2 %v7916_v15  ;;  %2685 = vmatpush.bf16.msra.mxu0 %v7328_v27  ;;  %v8392_v15 = vor.u32 %v10038_v3, %v8391_v60  ;;  %v2709_v20 = vmul.f32 0.01, %v12622_v7  ;;  %v12665_v27 = vpop.f32.mrf.mxu1  ;;  %v8839_v60 = vld [vmem:[%s15460_s7 + $0x888] sm:$0xf] }
 0x20e   :  { %5597 = vmatpush.bf16.msra.mxu3 %v8084_v26  ;;  %2701 = vmatpush.bf16.msra.mxu1 %v7520_v50  ;;  %v2437_v22 = vpop.f32.mrf.mxu2  ;;  %v12663_v26 = vadd.f32 %v12344_v23, %v2300_v9  ;;  %v2717_v23 = vmul.f32 0.01, %v12632_v55  ;;  %v10206_v50 = vld [vmem:[%s15460_s7 + $0xa60] sm:$0xf0]  ;;  %v2725_v4 = vmax.f32 %v12622_v7, %v2709_v20  ;;  %v8503_v9 = vld [vmem:[%s15460_s7 + $0x5e8] sm:$0xf] }
 0x20f   :  { %v9064_v3 = vor.u32 %v10206_v50, %v9063_v45  ;;  %v10199_v7 = vld [vmem:[%s15460_s7 + $0xa28] sm:$0xf0]  ;;  %v10010_v20 = vld [vmem:[%s15460_s7 + $0x440] sm:$0xf0]  ;;  %v8447_v45 = vld [vmem:[%s15460_s7 + $0x578] sm:$0xf] }
 0x210   :  { %5582 = vmatpush.bf16.msra.mxu2 %v7888_v33  ;;  %2686 = vmatpush.bf16.msra.mxu0 %v7296_v56  ;;  %v12678_v33 = vpop.f32.mrf.mxu0  ;;  %v966_v56 = vperm.slane %v12482_v41, 2  ;;  %v2733_v6 = vmax.f32 %v12632_v55, %v2717_v23  ;;  %v8280_v40 = vor.u32 %v10010_v20, %v8279_v28  ;;  %v10052_v50 = vld [vmem:[%s15460_s7 + $0x590] sm:$0xf0] }
 0x211   :  { %2702 = vmatmul.bf16.vlgmr.msra.gmra.mxu1 %v11365_v24  ;;  %v8559_v24 = vld [vmem:[%s15460_s7 + $0x658] sm:$0xf] }
 0x212   :  { %5598 = vmatpush.bf16.msra.mxu3 %v8056_v53  ;;  %5622 = vmatpush.bf16.msrb.mxu1 %v8616_v0  ;;  %v8560_v13 = vor.u32 %v10080_v25, %v8559_v24  ;;  %v2716_v53 = vmul.f32 0.01, %v12663_v26  ;;  %v2451_v36 = vpop.f32.mrf.mxu3  ;;  %v2438_v0 = vadd.f32 %v2437_v22, %v967_v30  ;;  %v2384_v10 = vadd.f32 %v12589_v48, %v966_v56  ;;  %v9035_v48 = vld [vmem:[%s15460_s7 + $0xa10] sm:$0xf] }
 0x213   :  { %v2382_v55 = vadd.f32 %v12502_v59, %v966_v56  ;;  %v8840_v59 = vor.u32 %v10150_v8, %v8839_v60  ;;  %v8811_v22 = vld [vmem:[%s15460_s7 + $0x850] sm:$0xf]  ;;  %v9036_v31 = vor.u32 %v10199_v7, %v9035_v48  ;;  %v10129_v60 = vld [vmem:[%s15460_s7 + $0x7f8] sm:$0xf0] }
 0x214   :  { %5583 = vmatpush.bf16.msra.mxu2 %v7860_v61  ;;  %2687 = vmatpush.bf16.msra.mxu0 %v7264_v12  ;;  %v8336_v61 = vor.u32 %v10024_v52, %v8335_v47  ;;  %v2732_v12 = vmax.f32 %v12663_v26, %v2716_v53  ;;  %v2452_v18 = vadd.f32 %v2451_v36, %v2438_v0  ;;  %v10143_v26 = vld [vmem:[%s15460_s7 + $0x868] sm:$0xf0]  ;;  %v8251_v52 = vld [vmem:[%s15460_s7 + $0x3f0] sm:$0xf]  ;;  %v10185_v36 = vld [vmem:[%s15460_s7 + $0x9b8] sm:$0xf0] }
 0x215   :  { %v2398_v25 = vadd.f32 %v12634_v2, %v2384_v10  ;;  %v9007_v2 = vld [vmem:[%s15460_s7 + $0x9d8] sm:$0xf]  ;;  %v8252_v62 = vor.u32 %v10003_v43, %v8251_v52  ;;  %v8448_v0 = vor.u32 %v10052_v50, %v8447_v45  ;;  %v10108_v45 = vld [vmem:[%s15460_s7 + $0x750] sm:$0xf0] }
 0x216   :  { %5599 = vmatpush.bf16.msra.mxu3 %v8028_v11  ;;  %5623 = vmatpush.bf16.msrb.mxu1 %v8588_v49  ;;  %v10066_v11 = vld [vmem:[%s15460_s7 + $0x600] sm:$0xf0]  ;;  %v2439_v16 = vpop.f32.mrf.mxu2  ;;  %v8308_v49 = vor.u32 %v10017_v38, %v8307_v34  ;;  %v9996_v34 = vld [vmem:[%s15460_s7 + $0x3d0] sm:$0xf0] }
 0x217   :  { %2688 = vmatmul.bf16.vlgmr.msra.gmra.mxu0 %v11402_v46  ;;  %v2708_v46 = vmul.f32 0.01, %v12675_v32  ;;  %v8504_v19 = vor.u32 %v10066_v11, %v8503_v9  ;;  %v2412_v39 = vadd.f32 %v12678_v33, %v2398_v25  ;;  %v8783_v33 = vld [vmem:[%s15460_s7 + $0x818] sm:$0xf] }
 0x218   :  { %5584 = vmatpush.bf16.msra.mxu2 %v7832_v14  ;;  %5608 = vmatpush.bf16.msrb.mxu0 %v8392_v15  ;;  %v2479_v14 = vpop.f32.mrf.mxu1  ;;  %v12745_v15 = vpack.c.bf16 %v2733_v6, %v2725_v4  ;;  %v2465_v29 = vpop.f32.mrf.mxu0  ;;  %v8979_v6 = vld [vmem:[%s15460_s7 + $0x9a0] sm:$0xf]  ;;  %v10045_v4 = vld [vmem:[%s15460_s7 + $0x558] sm:$0xf0] }
 0x219   :  { %v2724_v24 = vmax.f32 %v12675_v32, %v2708_v46  ;;  %v2440_v32 = vadd.f32 %v2439_v16, %v967_v30  ;;  %v2466_v23 = vadd.f32 %v2465_v29, %v2452_v18  ;;  %v8812_v30 = vor.u32 %v10143_v26, %v8811_v22  ;;  %v10122_v18 = vld [vmem:[%s15460_s7 + $0x7c0] sm:$0xf0]  ;;  %v8923_v22 = vld [vmem:[%s15460_s7 + $0x930] sm:$0xf] }
 0x21a   :  { %5600 = vmatpush.bf16.msra.mxu3 %v8000_v5  ;;  %5624 = vmatpush.bf16.msrb.mxu1 %v8560_v13  ;;  %v8475_v5 = vld [vmem:[%s15460_s7 + $0x5b0] sm:$0xf]  ;;  %v2396_v13 = vadd.f32 %v12549_v21, %v2382_v55  ;;  %v2453_v44 = vpop.f32.mrf.mxu3  ;;  %v10136_v21 = vld [vmem:[%s15460_s7 + $0x830] sm:$0xf0]  ;;  %v8980_v10 = vor.u32 %v10185_v36, %v8979_v6  ;;  %v10178_v55 = vld [vmem:[%s15460_s7 + $0x980] sm:$0xf0] }
 0x21b   :  { %v8476_v47 = vor.u32 %v10059_v51, %v8475_v5  ;;  %v2454_v46 = vadd.f32 %v2453_v44, %v2440_v32  ;;  %v8784_v63 = vor.u32 %v10136_v21, %v8783_v33  ;;  %v10262_v32 = vld [vmem:[%s15460_s7 + $0xc20] sm:$0xf0]  ;;  %v9259_v33 = vld [vmem:[%s15460_s7 + $0xbd0] sm:$0xf]  ;;  %v10255_v44 = vld [vmem:[%s15460_s7 + $0xbe8] sm:$0xf0] }
 0x21c   :  { %5585 = vmatpush.bf16.msra.mxu2 %v7804_v35  ;;  %5609 = vmatpush.bf16.msrb.mxu0 %v8364_v37  ;;  %v10192_v35 = vld [vmem:[%s15460_s7 + $0x9f0] sm:$0xf0]  ;;  %v12776_v37 = vpack.c.bf16 %v2732_v12, %v2724_v24  ;;  %v2410_v56 = vadd.f32 %v12591_v54, %v2396_v13  ;;  %v8951_v12 = vld [vmem:[%s15460_s7 + $0x968] sm:$0xf]  ;;  %v10171_v24 = vld [vmem:[%s15460_s7 + $0x948] sm:$0xf0] }
 0x21d   :  { %v9008_v53 = vor.u32 %v10192_v35, %v9007_v2  ;;  %v10115_v2 = vld [vmem:[%s15460_s7 + $0x788] sm:$0xf0]  ;;  %v8924_v35 = vor.u32 %v10171_v24, %v8923_v22  ;;  %v8895_v13 = vld [vmem:[%s15460_s7 + $0x8f8] sm:$0xf]  ;;  %v8169_v36 = vld [vmem:[%s15460_s7 + $0x364] sm:$0xf0] }
 0x21e   :  { %5601 = vmatpush.bf16.msra.mxu3 %v7972_v57  ;;  %5625 = vmatpush.bf16.msrb.mxu1 %v8532_v1  ;;  %v2480_v57 = vadd.f32 %v2479_v14, %v2466_v23  ;;  %v8223_v1 = vld [vmem:[%s15460_s7 + $0x3b8] sm:$0xf]  ;;  %v2424_v8 = vadd.f32 %v12576_v42, %v2410_v56  ;;  %v8195_v42 = vld [vmem:[%s15460_s7 + $0x380] sm:$0xf]  ;;  %v8699_v23 = vld [vmem:[%s15460_s7 + $0x770] sm:$0xf] }
 0x21f   :  { %v8224_v48 = vor.u32 %v9996_v34, %v8223_v1  ;;  %v8700_v43 = vor.u32 %v10115_v2, %v8699_v23  ;;  %v8671_v21 = vld [vmem:[%s15460_s7 + $0x738] sm:$0xf]  ;;  %v968_v56 = vperm.slane %v12482_v41, 4  ;;  %v9979_v6 = vld [vmem:[%s15460_s7 + $0x34c] sm:$0xf] }
 0x220   :  { %5586 = vmatpush.bf16.msra.mxu2 %v7776_v58  ;;  %5610 = vmatpush.bf16.msrb.mxu0 %v8336_v61  ;;  %v12807_v58 = vadd.f32 %v12665_v27, %v2412_v39  ;;  %v2467_v61 = vpop.f32.mrf.mxu0  ;;  %v8755_v27 = vld [vmem:[%s15460_s7 + $0x7e0] sm:$0xf]  ;;  %v2481_v38 = vpop.f32.mrf.mxu1  ;;  %v2711_v9 = vmul.f32 0.01, %v2480_v57 }
 0x221   :  { %5602 = vmatmul.bf16.vlgmr.msra.gmra.mxu3 %v12745_v15  ;;  %v2468_v54 = vadd.f32 %v2467_v61, %v2454_v46  ;;  %v8756_v16 = vor.u32 %v10129_v60, %v8755_v27  ;;  %v10157_v46 = vld [vmem:[%s15460_s7 + $0x8d8] sm:$0xf0]  ;;  %v9231_v61 = vld [vmem:[%s15460_s7 + $0xb98] sm:$0xf]  ;;  %v7945_v60 = vld [vmem:[%s15460_s7 + $0x1a4] sm:$0xf0] }
 0x222   :  { %5650 = vmatpush.bf16.msrb.mxu3 %v9064_v3  ;;  %5626 = vmatpush.bf16.msrb.mxu1 %v8504_v19  ;;  %v8419_v3 = vld [vmem:[%s15460_s7 + $0x540] sm:$0xf]  ;;  %v2718_v14 = vmul.f32 0.01, %v12807_v58  ;;  %v2710_v19 = vmul.f32 0.01, %v2424_v8  ;;  %v2727_v28 = vmax.f32 %v2480_v57, %v2711_v9 }
 0x223   :  { %v2482_v11 = vadd.f32 %v2481_v38, %v2468_v54  ;;  %v8420_v29 = vor.u32 %v10045_v4, %v8419_v3  ;;  %v8867_v57 = vld [vmem:[%s15460_s7 + $0x8c0] sm:$0xf]  ;;  %v9923_v38 = vld [vmem:[%s15460_s7 + $0x18c] sm:$0xf]  ;;  %v8172_v3 = vor.u32 %v9979_v6, %v8169_v36  ;;  %v9972_v4 = vld [vmem:[%s15460_s7 + $0x314] sm:$0xf] }
 0x224   :  { %5587 = vmatpush.bf16.msra.mxu2 %v7748_v17  ;;  %5611 = vmatpush.bf16.msrb.mxu0 %v8308_v49  ;;  %v9989_v17 = vld [vmem:[%s15460_s7 + $0x398] sm:$0xf0]  ;;  %v8727_v49 = vld [vmem:[%s15460_s7 + $0x7a8] sm:$0xf]  ;;  %v2734_v26 = vmax.f32 %v12807_v58, %v2718_v14  ;;  %v8672_v58 = vor.u32 %v10108_v45, %v8671_v21  ;;  %v2507_v54 = vpop.f32.mrf.mxu3  ;;  %v8868_v1 = vor.u32 %v10157_v46, %v8867_v57  ;;  %v8085_v23 = vld [vmem:[%s15460_s7 + $0x2bc] sm:$0xf0] }
 0x225   :  { %v2719_v7 = vmul.f32 0.01, %v2482_v11  ;;  %v8196_v25 = vor.u32 %v9989_v17, %v8195_v42  ;;  %v8728_v51 = vor.u32 %v10122_v18, %v8727_v49  ;;  %v7917_v42 = vld [vmem:[%s15460_s7 + $0x16c] sm:$0xf0]  ;;  %v9965_v49 = vld [vmem:[%s15460_s7 + $0x2dc] sm:$0xf] }
 0x226   :  { %5651 = vmatpush.bf16.msrb.mxu3 %v9036_v31  ;;  %5627 = vmatpush.bf16.msrb.mxu1 %v8476_v47  ;;  %v9287_v31 = vld [vmem:[%s15460_s7 + $0xc08] sm:$0xf]  ;;  %v8113_v18 = vld [vmem:[%s15460_s7 + $0x2f4] sm:$0xf0]  ;;  %v10220_v6 = vld [vmem:[%s15460_s7 + $0xad0] sm:$0xf0] }
 0x227   :  { %5588 = vmatmul.bf16.vlgmr.msra.gmra.mxu2 %v12776_v37  ;;  %v2735_v20 = vmax.f32 %v2482_v11, %v2719_v7  ;;  %v9288_v39 = vor.u32 %v10262_v32, %v9287_v31  ;;  %v9203_v11 = vld [vmem:[%s15460_s7 + $0xb60] sm:$0xf]  ;;  %v9958_v32 = vld [vmem:[%s15460_s7 + $0x2a4] sm:$0xf]  ;;  %v9119_v46 = vld [vmem:[%s15460_s7 + $0xab8] sm:$0xf] }
 0x228   :  { %5636 = vmatpush.bf16.msrb.mxu2 %v8840_v59  ;;  %5612 = vmatpush.bf16.msrb.mxu0 %v8280_v40  ;;  %v8952_v59 = vor.u32 %v10178_v55, %v8951_v12  ;;  %v2726_v40 = vmax.f32 %v2424_v8, %v2710_v19  ;;  %v10241_v12 = vld [vmem:[%s15460_s7 + $0xb78] sm:$0xf0]  ;;  %v8088_v21 = vor.u32 %v9958_v32, %v8085_v23  ;;  %v969_v32 = vperm.slane %v12482_v41, 5  ;;  %v7749_v41 = vld [vmem:[%s15460_s7 + $0x1c] sm:$0xf0] }
 0x229   :  { %v12854_v5 = vpack.c.bf16 %v2735_v20, %v2727_v28  ;;  %v9204_v7 = vor.u32 %v10241_v12, %v9203_v11  ;;  %v9175_v28 = vld [vmem:[%s15460_s7 + $0xb28] sm:$0xf]  ;;  %v10234_v20 = vld [vmem:[%s15460_s7 + $0xb40] sm:$0xf0]  ;;  %v9937_v12 = vld [vmem:[%s15460_s7 + $0x1fc] sm:$0xf] }
 0x22a   :  { %5652 = vmatpush.bf16.msrb.mxu3 %v9008_v53  ;;  %5628 = vmatpush.bf16.msrb.mxu1 %v8448_v0  ;;  %v2493_v47 = vpop.f32.mrf.mxu2  ;;  %v12875_v52 = vpack.c.bf16 %v2734_v26, %v2726_v40  ;;  %v9260_v53 = vor.u32 %v10255_v44, %v9259_v33  ;;  %v10101_v0 = vld [vmem:[%s15460_s7 + $0x718] sm:$0xf0]  ;;  %v9176_v24 = vor.u32 %v10234_v20, %v9175_v28  ;;  %v7889_v26 = vld [vmem:[%s15460_s7 + $0x134] sm:$0xf0]  ;;  %v10227_v40 = vld [vmem:[%s15460_s7 + $0xb08] sm:$0xf0] }
 0x22b   :  { %v2494_v27 = vadd.f32 %v2493_v47, %v968_v56  ;;  %v9902_v33 = vld [vmem:[%s15460_s7 + $0xe4] sm:$0xf]  ;;  %v7861_v44 = vld [vmem:[%s15460_s7 + $0xfc] sm:$0xf0]  ;;  %v9881_v28 = vld [vmem:[%s15460_s7 + $0x3c] sm:$0xf] }
 0x22c   :  { %5637 = vmatpush.bf16.msrb.mxu2 %v8812_v30  ;;  %5613 = vmatpush.bf16.msrb.mxu0 %v8252_v62  ;;  %v10164_v30 = vld [vmem:[%s15460_s7 + $0x910] sm:$0xf0]  ;;  %v2509_v31 = vpop.f32.mrf.mxu3  ;;  %v7864_v36 = vor.u32 %v9902_v33, %v7861_v44  ;;  %v7777_v20 = vld [vmem:[%s15460_s7 + $0x54] sm:$0xf0]  ;;  %v10147_v33 = vld [vmem:[%s15460_s7 + $0x88c] sm:$0xf] }
 0x22d   :  { %v8896_v50 = vor.u32 %v10164_v30, %v8895_v13  ;;  %v10248_v62 = vld [vmem:[%s15460_s7 + $0xbb0] sm:$0xf0]  ;;  %v7780_v23 = vor.u32 %v9881_v28, %v7777_v20  ;;  %v8841_v44 = vld [vmem:[%s15460_s7 + $0x8a4] sm:$0xf0]  ;;  %v8757_v28 = vld [vmem:[%s15460_s7 + $0x7fc] sm:$0xf0] }
 0x22e   :  { %5653 = vmatpush.bf16.msrb.mxu3 %v8980_v10  ;;  %5629 = vmatpush.bf16.msrb.mxu1 %v8420_v29  ;;  %v9232_v34 = vor.u32 %v10248_v62, %v9231_v61  ;;  %v8141_v10 = vld [vmem:[%s15460_s7 + $0x32c] sm:$0xf0]  ;;  %v2535_v8 = vpop.f32.mrf.mxu1  ;;  %v9916_v29 = vld [vmem:[%s15460_s7 + $0x154] sm:$0xf]  ;;  %v9895_v62 = vld [vmem:[%s15460_s7 + $0xac] sm:$0xf] }
 0x22f   :  { %v8144_v17 = vor.u32 %v9972_v4, %v8141_v10  ;;  %v7920_v22 = vor.u32 %v9916_v29, %v7917_v42  ;;  %v9888_v4 = vld [vmem:[%s15460_s7 + $0x74] sm:$0xf]  ;;  %v7805_v10 = vld [vmem:[%s15460_s7 + $0x8c] sm:$0xf0]  ;;  %v8393_v29 = vld [vmem:[%s15460_s7 + $0x524] sm:$0xf0] }
 0x230   :  { %5638 = vmatpush.bf16.msrb.mxu2 %v8784_v63  ;;  %5614 = vmatpush.bf16.msrb.mxu0 %v8224_v48  ;;  %v8643_v63 = vld [vmem:[%s15460_s7 + $0x700] sm:$0xf]  ;;  %v7948_v48 = vor.u32 %v9923_v38, %v7945_v60  ;;  %v10213_v60 = vld [vmem:[%s15460_s7 + $0xa98] sm:$0xf0] }
 0x231   :  { %5630 = vmatmul.bf16.vlgmr.msrb.gmra.mxu1 %v12854_v5  ;;  %v8644_v9 = vor.u32 %v10101_v0, %v8643_v63  ;;  %v9944_v0 = vld [vmem:[%s15460_s7 + $0x234] sm:$0xf]  ;;  %v9091_v38 = vld [vmem:[%s15460_s7 + $0xa80] sm:$0xf] }
 0x232   :  { %5654 = vmatpush.bf16.msrb.mxu3 %v8952_v59  ;;  %v2495_v55 = vpop.f32.mrf.mxu2 }
 0x233   :  { %v2496_v59 = vadd.f32 %v2495_v55, %v968_v56  ;;  %v9511_v55 = vld [vmem:[%s15460_s7 + $0xdc8] sm:$0xf] }
 0x234   :  { %5639 = vmatpush.bf16.msrb.mxu2 %v8756_v16  ;;  %5615 = vmatpush.bf16.msrb.mxu0 %v8196_v25  ;;  %v2521_v14 = vpop.f32.mrf.mxu0  ;;  %v2508_v16 = vadd.f32 %v2507_v54, %v2494_v27  ;;  %v9909_v25 = vld [vmem:[%s15460_s7 + $0x11c] sm:$0xf]  ;;  %v7833_v54 = vld [vmem:[%s15460_s7 + $0xc4] sm:$0xf0] }
 0x235   :  { %v7892_v30 = vor.u32 %v9909_v25, %v7889_v26  ;;  %v8365_v25 = vld [vmem:[%s15460_s7 + $0x4ec] sm:$0xf0]  ;;  %v9930_v26 = vld [vmem:[%s15460_s7 + $0x1c4] sm:$0xf] }
 0x236   :  { %5655 = vmatpush.bf16.msrb.mxu3 %v8924_v35  ;;  %v2522_v19 = vadd.f32 %v2521_v14, %v2508_v16  ;;  %v2510_v35 = vadd.f32 %v2509_v31, %v2496_v59  ;;  %v2537_v45 = vpop.f32.mrf.mxu1  ;;  %v10318_v14 = vld [vmem:[%s15460_s7 + $0xde0] sm:$0xf0]  ;;  %v10035_v16 = vld [vmem:[%s15460_s7 + $0x50c] sm:$0xf] }
 0x237   :  { %5616 = vmatmul.bf16.vlgmr.msrb.gmra.mxu0 %v12875_v52  ;;  %v8396_v42 = vor.u32 %v10035_v16, %v8393_v29  ;;  %v10311_v59 = vld [vmem:[%s15460_s7 + $0xda8] sm:$0xf0]  ;;  %v10000_v29 = vld [vmem:[%s15460_s7 + $0x3f4] sm:$0xf] }
 0x238   :  { %5640 = vmatpush.bf16.msrb.mxu2 %v8728_v51  ;;  %5664 = vmatpush.bf16.msra.mxu0 %v9288_v39  ;;  %v8116_v51 = vor.u32 %v9965_v49, %v8113_v18  ;;  %v2536_v2 = vadd.f32 %v2535_v8, %v2522_v19  ;;  %v9147_v39 = vld [vmem:[%s15460_s7 + $0xaf0] sm:$0xf]  ;;  %v9092_v8 = vor.u32 %v10213_v60, %v9091_v38  ;;  %v10028_v19 = vld [vmem:[%s15460_s7 + $0x4d4] sm:$0xf]  ;;  %v10290_v38 = vld [vmem:[%s15460_s7 + $0xd00] sm:$0xf0] }
 0x239   :  { %v9148_v47 = vor.u32 %v10227_v40, %v9147_v39  ;;  %v7808_v49 = vor.u32 %v9888_v4, %v7805_v10  ;;  %v9483_v18 = vld [vmem:[%s15460_s7 + $0xd90] sm:$0xf]  ;;  %v8368_v31 = vor.u32 %v10028_v19, %v8365_v25  ;;  %v10021_v39 = vld [vmem:[%s15460_s7 + $0x49c] sm:$0xf]  ;;  %v9874_v40 = vld [vmem:[%s15460_s7 + $0x4] sm:$0xf] }
 0x23a   :  { %5656 = vmatpush.bf16.msrb.mxu3 %v8896_v50  ;;  %v9951_v50 = vld [vmem:[%s15460_s7 + $0x26c] sm:$0xf]  ;;  %v2712_v56 = vmul.f32 0.01, %v2536_v2  ;;  %v10133_v10 = vld [vmem:[%s15460_s7 + $0x81c] sm:$0xf] }
 0x23b   :  { %v10007_v60 = vld [vmem:[%s15460_s7 + $0x42c] sm:$0xf]  ;;  %v10126_v19 = vld [vmem:[%s15460_s7 + $0x7e4] sm:$0xf] }
 0x23c   :  { %5641 = vmatpush.bf16.msrb.mxu2 %v8700_v43  ;;  %5665 = vmatpush.bf16.msra.mxu0 %v9260_v53  ;;  %v2523_v13 = vpop.f32.mrf.mxu0  ;;  %v8057_v53 = vld [vmem:[%s15460_s7 + $0x284] sm:$0xf0]  ;;  %v10283_v16 = vld [vmem:[%s15460_s7 + $0xcc8] sm:$0xf0] }
 0x23d   :  { %v2524_v43 = vadd.f32 %v2523_v13, %v2510_v35  ;;  %v8060_v63 = vor.u32 %v9951_v50, %v8057_v53  ;;  %v10304_v35 = vld [vmem:[%s15460_s7 + $0xd70] sm:$0xf0]  ;;  %v7752_v50 = vor.u32 %v9874_v40, %v7749_v41  ;;  %v9427_v53 = vld [vmem:[%s15460_s7 + $0xd20] sm:$0xf]  ;;  %v8225_v40 = vld [vmem:[%s15460_s7 + $0x3d4] sm:$0xf0] }
 0x23e   :  { %5657 = vmatpush.bf16.msrb.mxu3 %v8868_v1  ;;  %v8029_v1 = vld [vmem:[%s15460_s7 + $0x24c] sm:$0xf0] }
 0x23f   :  { %v2538_v57 = vadd.f32 %v2537_v45, %v2524_v43  ;;  %v8032_v11 = vor.u32 %v9944_v0, %v8029_v1 }
 0x240   :  { %5642 = vmatpush.bf16.msrb.mxu2 %v8672_v58  ;;  %5666 = vmatpush.bf16.msra.mxu0 %v9232_v34  ;;  %v9120_v58 = vor.u32 %v10220_v6, %v9119_v46  ;;  %v2728_v34 = vmax.f32 %v2536_v2, %v2712_v56  ;;  %v9455_v2 = vld [vmem:[%s15460_s7 + $0xd58] sm:$0xf]  ;;  %v10297_v56 = vld [vmem:[%s15460_s7 + $0xd38] sm:$0xf0]  ;;  %v8844_v6 = vor.u32 %v10147_v33, %v8841_v44  ;;  %v9315_v33 = vld [vmem:[%s15460_s7 + $0xc40] sm:$0xf] }
 0x241   :  { %v2720_v61 = vmul.f32 0.01, %v2538_v57  ;;  %v10269_v44 = vld [vmem:[%s15460_s7 + $0xc58] sm:$0xf0] }
 0x242   :  { %5706 = vmatpush.bf16.msra.mxu3 %v8172_v3  ;;  %v7836_v3 = vor.u32 %v9895_v62, %v7833_v54  ;;  %v8309_v62 = vld [vmem:[%s15460_s7 + $0x47c] sm:$0xf0] }
 0x243   :  { %v2736_v27 = vmax.f32 %v2538_v57, %v2720_v61  ;;  %v10014_v57 = vld [vmem:[%s15460_s7 + $0x464] sm:$0xf]  ;;  %v9428_v61 = vor.u32 %v10297_v56, %v9427_v53  ;;  %v9316_v53 = vor.u32 %v10269_v44, %v9315_v33  ;;  %v8197_v56 = vld [vmem:[%s15460_s7 + $0x39c] sm:$0xf0]  ;;  %v10168_v44 = vld [vmem:[%s15460_s7 + $0x934] sm:$0xf] }
 0x244   :  { %5643 = vmatpush.bf16.msrb.mxu2 %v8644_v9  ;;  %5667 = vmatpush.bf16.msra.mxu0 %v9204_v7  ;;  %v9512_v7 = vor.u32 %v10318_v14, %v9511_v55  ;;  %v2563_v43 = vpop.f32.mrf.mxu3  ;;  %v8312_v0 = vor.u32 %v10014_v57, %v8309_v62  ;;  %v9037_v62 = vld [vmem:[%s15460_s7 + $0xa2c] sm:$0xf0] }
 0x245   :  { %v13011_v9 = vpack.c.bf16 %v2736_v27, %v2728_v34  ;;  %v9399_v27 = vld [vmem:[%s15460_s7 + $0xce8] sm:$0xf] }
 0x246   :  { %5707 = vmatpush.bf16.msra.mxu3 %v8144_v17  ;;  %5678 = vmatpush.bf16.msra.mxu1 %v9512_v7  ;;  %v9371_v7 = vld [vmem:[%s15460_s7 + $0xcb0] sm:$0xf] }
 0x247   :  { %5644 = vmatmul.bf16.vlgmr.msrb.gmra.mxu2 %v13011_v9 }
 0x248   :  { %5692 = vmatpush.bf16.msra.mxu2 %v7948_v48  ;;  %5668 = vmatpush.bf16.msra.mxu0 %v9176_v24  ;;  %v8001_v48 = vld [vmem:[%s15460_s7 + $0x214] sm:$0xf0]  ;;  %v9484_v24 = vor.u32 %v10311_v59, %v9483_v18  ;;  %v8253_v18 = vld [vmem:[%s15460_s7 + $0x40c] sm:$0xf0] }
 0x249   :  { %v8256_v20 = vor.u32 %v10000_v29, %v8253_v18  ;;  %v10098_v29 = vld [vmem:[%s15460_s7 + $0x704] sm:$0xf]  ;;  %v7951_v18 = vld [vmem:[%s15460_s7 + $0x190] sm:$0xf] }
 0x24a   :  { %5708 = vmatpush.bf16.msra.mxu3 %v8116_v51  ;;  %v2549_v17 = vpop.f32.mrf.mxu2  ;;  %v7973_v51 = vld [vmem:[%s15460_s7 + $0x1dc] sm:$0xf0]  ;;  %5679 = vmatpush.bf16.msra.mxu1 %v9484_v24  ;;  %v10119_v24 = vld [vmem:[%s15460_s7 + $0x7ac] sm:$0xf] }
 0x24b   :  { %v7976_v13 = vor.u32 %v9930_v26, %v7973_v51  ;;  %v2550_v45 = vadd.f32 %v2549_v17, %v969_v32  ;;  %v9343_v26 = vld [vmem:[%s15460_s7 + $0xc78] sm:$0xf]  ;;  %v10276_v51 = vld [vmem:[%s15460_s7 + $0xc90] sm:$0xf0] }
 0x24c   :  { %5693 = vmatpush.bf16.msra.mxu2 %v7920_v22  ;;  %5669 = vmatpush.bf16.msra.mxu0 %v9148_v47  ;;  %v8004_v22 = vor.u32 %v9937_v12, %v8001_v48  ;;  %v8337_v47 = vld [vmem:[%s15460_s7 + $0x4b4] sm:$0xf0]  ;;  %v8281_v12 = vld [vmem:[%s15460_s7 + $0x444] sm:$0xf0]  ;;  %v2565_v14 = vpop.f32.mrf.mxu3 }
 0x24d   :  { %v2564_v1 = vadd.f32 %v2563_v43, %v2550_v45  ;;  %v8284_v55 = vor.u32 %v10007_v60, %v8281_v12  ;;  %v10105_v60 = vld [vmem:[%s15460_s7 + $0x73c] sm:$0xf]  ;;  %v13214_v12 = vld [vmem:[%s15461_s6] sm:$0xff] }
 0x24e   :  { %5709 = vmatpush.bf16.msra.mxu3 %v8088_v21  ;;  %v8340_v21 = vor.u32 %v10021_v39, %v8337_v47  ;;  %v2591_v46 = vpop.f32.mrf.mxu1  ;;  %v9344_v39 = vor.u32 %v10276_v51, %v9343_v26  ;;  %v9065_v47 = vld [vmem:[%s15460_s7 + $0xa64] sm:$0xf0] }
 0x250   :  { %5694 = vmatpush.bf16.msra.mxu2 %v7892_v30  ;;  %5670 = vmatpush.bf16.msra.mxu0 %v9120_v58  ;;  %v9456_v30 = vor.u32 %v10304_v35, %v9455_v2  ;;  %v8813_v58 = vld [vmem:[%s15460_s7 + $0x86c] sm:$0xf0]  ;;  %v8760_v2 = vor.u32 %v10126_v19, %v8757_v28  ;;  %v8729_v35 = vld [vmem:[%s15460_s7 + $0x7c4] sm:$0xf0] }
 0x251   :  { %v8732_v43 = vor.u32 %v10119_v24, %v8729_v35  ;;  %v10070_v24 = vld [vmem:[%s15460_s7 + $0x624] sm:$0xf]  ;;  %v9920_v35 = vld [vmem:[%s15460_s7 + $0x170] sm:$0xf0] }
 0x252   :  { %5710 = vmatpush.bf16.msra.mxu3 %v8060_v63  ;;  %5680 = vmatpush.bf16.msra.mxu1 %v9456_v30  ;;  %v2551_v54 = vpop.f32.mrf.mxu2  ;;  %v10203_v30 = vld [vmem:[%s15460_s7 + $0xa4c] sm:$0xf] }
 0x253   :  { %v9068_v57 = vor.u32 %v10203_v30, %v9065_v47  ;;  %v10063_v30 = vld [vmem:[%s15460_s7 + $0x5ec] sm:$0xf]  ;;  %v8505_v47 = vld [vmem:[%s15460_s7 + $0x604] sm:$0xf0] }
 0x254   :  { %5695 = vmatpush.bf16.msra.mxu2 %v7864_v36  ;;  %5671 = vmatpush.bf16.msra.mxu0 %v9092_v8  ;;  %v10140_v36 = vld [vmem:[%s15460_s7 + $0x854] sm:$0xf]  ;;  %v2577_v63 = vpop.f32.mrf.mxu0  ;;  %v8785_v8 = vld [vmem:[%s15460_s7 + $0x834] sm:$0xf0] }
 0x255   :  { %v8816_v34 = vor.u32 %v10140_v36, %v8813_v58  ;;  %v2578_v4 = vadd.f32 %v2577_v63, %v2564_v1  ;;  %v8788_v48 = vor.u32 %v10133_v10, %v8785_v8  ;;  %v10196_v36 = vld [vmem:[%s15460_s7 + $0xa14] sm:$0xf]  ;;  %v8617_v63 = vld [vmem:[%s15460_s7 + $0x6e4] sm:$0xf0]  ;;  %v10189_v10 = vld [vmem:[%s15460_s7 + $0x9dc] sm:$0xf] }
 0x256   :  { %5711 = vmatpush.bf16.msra.mxu3 %v8032_v11  ;;  %5681 = vmatpush.bf16.msra.mxu1 %v9428_v61  ;;  %v9400_v11 = vor.u32 %v10290_v38, %v9399_v27  ;;  %v2593_v25 = vpop.f32.mrf.mxu1  ;;  %v9040_v38 = vor.u32 %v10196_v36, %v9037_v62  ;;  %v9009_v8 = vld [vmem:[%s15460_s7 + $0x9f4] sm:$0xf0] }
 0x258   :  { %5696 = vmatpush.bf16.msra.mxu2 %v7836_v3  ;;  %5720 = vmatpush.bf16.msrb.mxu0 %v8396_v42  ;;  %v2552_v3 = vadd.f32 %v2551_v54, %v969_v32  ;;  %v2592_v42 = vadd.f32 %v2591_v46, %v2578_v4  ;;  %v10112_v46 = vld [vmem:[%s15460_s7 + $0x774] sm:$0xf]  ;;  %v10091_v54 = vld [vmem:[%s15460_s7 + $0x6cc] sm:$0xf]  ;;  %v8589_v4 = vld [vmem:[%s15460_s7 + $0x6ac] sm:$0xf0] }
 0x25a   :  { %5712 = vmatpush.bf16.msra.mxu3 %v8004_v22  ;;  %5682 = vmatpush.bf16.msra.mxu1 %v9400_v11  ;;  %v2566_v17 = vadd.f32 %v2565_v14, %v2552_v3  ;;  %v2713_v32 = vmul.f32 0.01, %v2592_v42  ;;  %v8673_v3 = vld [vmem:[%s15460_s7 + $0x754] sm:$0xf0] }
 0x25b   :  { %v8676_v14 = vor.u32 %v10105_v60, %v8673_v3 }
 0x25c   :  { %5697 = vmatpush.bf16.msra.mxu2 %v7808_v49  ;;  %5721 = vmatpush.bf16.msrb.mxu0 %v8368_v31  ;;  %v9372_v49 = vor.u32 %v10283_v16, %v9371_v7  ;;  %v2579_v59 = vpop.f32.mrf.mxu0  ;;  %v9993_v31 = vld [vmem:[%s15460_s7 + $0x3bc] sm:$0xf]  ;;  %v2729_v45 = vmax.f32 %v2592_v42, %v2713_v32  ;;  %v8561_v7 = vld [vmem:[%s15460_s7 + $0x674] sm:$0xf0]  ;;  %v9012_v16 = vor.u32 %v10189_v10, %v9009_v8  ;;  %v8645_v42 = vld [vmem:[%s15460_s7 + $0x71c] sm:$0xf0] }
 0x25d   :  { %v2580_v22 = vadd.f32 %v2579_v59, %v2566_v17  ;;  %v8228_v41 = vor.u32 %v9993_v31, %v8225_v40  ;;  %v10182_v17 = vld [vmem:[%s15460_s7 + $0x9a4] sm:$0xf]  ;;  %v9927_v59 = vld [vmem:[%s15460_s7 + $0x1a8] sm:$0xf0]  ;;  %v8449_v10 = vld [vmem:[%s15460_s7 + $0x594] sm:$0xf0] }
 0x25e   :  { %5713 = vmatpush.bf16.msra.mxu3 %v7976_v13  ;;  %5683 = vmatpush.bf16.msra.mxu1 %v9372_v49  ;;  %v8981_v49 = vld [vmem:[%s15460_s7 + $0x9bc] sm:$0xf0]  ;;  %v7952_v51 = vor.u32 %v9927_v59, %v7951_v18  ;;  %v10175_v31 = vld [vmem:[%s15460_s7 + $0x96c] sm:$0xf]  ;;  %v9289_v18 = vld [vmem:[%s15460_s7 + $0xc24] sm:$0xf0] }
 0x25f   :  { %v8984_v26 = vor.u32 %v10182_v17, %v8981_v49  ;;  %v10259_v17 = vld [vmem:[%s15460_s7 + $0xc0c] sm:$0xf]  ;;  %v8175_v59 = vld [vmem:[%s15460_s7 + $0x350] sm:$0xf] }
 0x260   :  { %5698 = vmatpush.bf16.msra.mxu2 %v7780_v23  ;;  %5722 = vmatpush.bf16.msrb.mxu0 %v8340_v21  ;;  %v2594_v23 = vadd.f32 %v2593_v25, %v2580_v22  ;;  %v9986_v21 = vld [vmem:[%s15460_s7 + $0x384] sm:$0xf]  ;;  %v8648_v22 = vor.u32 %v10098_v29, %v8645_v42  ;;  %v8533_v25 = vld [vmem:[%s15460_s7 + $0x63c] sm:$0xf0]  ;;  %v9899_v42 = vld [vmem:[%s15460_s7 + $0xc8] sm:$0xf0] }
 0x261   :  { %v8200_v58 = vor.u32 %v9986_v21, %v8197_v56  ;;  %v9913_v56 = vld [vmem:[%s15460_s7 + $0x138] sm:$0xf0] }
 0x262   :  { %v2721_v13 = vmul.f32 0.01, %v2594_v23  ;;  %5684 = vmatpush.bf16.msra.mxu1 %v9344_v39  ;;  %v8536_v39 = vor.u32 %v10070_v24, %v8533_v25 }
 0x264   :  { %5699 = vmatpush.bf16.msra.mxu2 %v7752_v50  ;;  %5723 = vmatpush.bf16.msrb.mxu0 %v8312_v0  ;;  %v2737_v50 = vmax.f32 %v2594_v23, %v2721_v13  ;;  %v8620_v0 = vor.u32 %v10091_v54, %v8617_v63  ;;  %v2619_v28 = vpop.f32.mrf.mxu3  ;;  %v8953_v23 = vld [vmem:[%s15460_s7 + $0x984] sm:$0xf0]  ;;  %v10161_v54 = vld [vmem:[%s15460_s7 + $0x8fc] sm:$0xf] }
 0x266   :  { %v13181_v61 = vpack.c.bf16 %v2737_v50, %v2729_v45  ;;  %5685 = vmatpush.bf16.msra.mxu1 %v9316_v53  ;;  %v8925_v50 = vld [vmem:[%s15460_s7 + $0x94c] sm:$0xf0]  ;;  %v7895_v53 = vld [vmem:[%s15460_s7 + $0x120] sm:$0xf] }
 0x267   :  { %5700 = vmatmul.bf16.vlgmr.msra.gmra.mxu2 %v12776_v37  ;;  %v7896_v62 = vor.u32 %v9913_v56, %v7895_v53  ;;  %v9969_v53 = vld [vmem:[%s15460_s7 + $0x2f8] sm:$0xf0] }
 0x268   :  { %5748 = vmatpush.bf16.msrb.mxu2 %v8844_v6  ;;  %5724 = vmatpush.bf16.msrb.mxu0 %v8284_v55  ;;  %v8701_v6 = vld [vmem:[%s15460_s7 + $0x78c] sm:$0xf0]  ;;  %v970_v55 = vperm.slane %v13214_v12, 6  ;;  %v10245_v56 = vld [vmem:[%s15460_s7 + $0xb9c] sm:$0xf] }
 0x269   :  { %5658 = vmatmul.bf16.vlgmr.msrb.gmra.mxu3 %v13181_v61  ;;  %v8704_v1 = vor.u32 %v10112_v46, %v8701_v6  ;;  %v10056_v46 = vld [vmem:[%s15460_s7 + $0x5b4] sm:$0xf]  ;;  %v8477_v6 = vld [vmem:[%s15460_s7 + $0x5cc] sm:$0xf0] }
 0x26a   :  { %v2605_v27 = vpop.f32.mrf.mxu2  ;;  %5762 = vmatpush.bf16.msrb.mxu3 %v9068_v57  ;;  %5734 = vmatpush.bf16.msrb.mxu1 %v8620_v0  ;;  %v8508_v57 = vor.u32 %v10063_v30, %v8505_v47  ;;  %v9261_v30 = vld [vmem:[%s15460_s7 + $0xbec] sm:$0xf0] }
 0x26c   :  { %5749 = vmatpush.bf16.msrb.mxu2 %v8816_v34  ;;  %5725 = vmatpush.bf16.msrb.mxu0 %v8256_v20  ;;  %v10084_v34 = vld [vmem:[%s15460_s7 + $0x694] sm:$0xf]  ;;  %v2606_v20 = vadd.f32 %v2605_v27, %v970_v55  ;;  %v2621_v36 = vpop.f32.mrf.mxu3  ;;  %v9906_v27 = vld [vmem:[%s15460_s7 + $0x100] sm:$0xf0] }
 0x26d   :  { %v8592_v11 = vor.u32 %v10084_v34, %v8589_v4  ;;  %v7867_v34 = vld [vmem:[%s15460_s7 + $0xe8] sm:$0xf]  ;;  %v10049_v4 = vld [vmem:[%s15460_s7 + $0x57c] sm:$0xf] }
 0x26e   :  { %5763 = vmatpush.bf16.msrb.mxu3 %v9040_v38  ;;  %v2647_v32 = vpop.f32.mrf.mxu1  ;;  %v2620_v13 = vadd.f32 %v2619_v28, %v2606_v20  ;;  %v8480_v38 = vor.u32 %v10056_v46, %v8477_v6  ;;  %v8452_v49 = vor.u32 %v10049_v4, %v8449_v10  ;;  %v10042_v20 = vld [vmem:[%s15460_s7 + $0x544] sm:$0xf]  ;;  %v971_v46 = vperm.slane %v13214_v12, 7 }
 0x26f   :  { %5735 = vmatpush.bf16.msrb.mxu1 %v8592_v11  ;;  %v9962_v12 = vld [vmem:[%s15460_s7 + $0x2c0] sm:$0xf0] }
 0x270   :  { %5750 = vmatpush.bf16.msrb.mxu2 %v8788_v48  ;;  %5726 = vmatpush.bf16.msrb.mxu0 %v8228_v41  ;;  %v10077_v48 = vld [vmem:[%s15460_s7 + $0x65c] sm:$0xf] }
 0x271   :  { %v8564_v19 = vor.u32 %v10077_v48, %v8561_v7  ;;  %v8869_v48 = vld [vmem:[%s15460_s7 + $0x8dc] sm:$0xf0]  ;;  %v7839_v7 = vld [vmem:[%s15460_s7 + $0xb0] sm:$0xf] }
 0x272   :  { %5764 = vmatpush.bf16.msrb.mxu3 %v9012_v16  ;;  %v2607_v40 = vpop.f32.mrf.mxu2  ;;  %v7840_v25 = vor.u32 %v9899_v42, %v7839_v7  ;;  %v8819_v42 = vld [vmem:[%s15460_s7 + $0x858] sm:$0xf] }
 0x273   :  { %5736 = vmatpush.bf16.msrb.mxu1 %v8564_v19  ;;  %v2608_v21 = vadd.f32 %v2607_v40, %v970_v55  ;;  %v7868_v55 = vor.u32 %v9906_v27, %v7867_v34  ;;  %v9983_v19 = vld [vmem:[%s15460_s7 + $0x368] sm:$0xf0]  ;;  %v10238_v27 = vld [vmem:[%s15460_s7 + $0xb64] sm:$0xf] }
 0x274   :  { %5751 = vmatpush.bf16.msrb.mxu2 %v8760_v2  ;;  %5727 = vmatpush.bf16.msrb.mxu0 %v8200_v58  ;;  %v7923_v2 = vld [vmem:[%s15460_s7 + $0x158] sm:$0xf]  ;;  %v2633_v41 = vpop.f32.mrf.mxu0  ;;  %v8928_v58 = vor.u32 %v10168_v44, %v8925_v50  ;;  %v7783_v44 = vld [vmem:[%s15460_s7 + $0x40] sm:$0xf] }
 0x275   :  { %v7924_v33 = vor.u32 %v9920_v35, %v7923_v2  ;;  %v2634_v45 = vadd.f32 %v2633_v41, %v2620_v13  ;;  %v2622_v0 = vadd.f32 %v2621_v36, %v2608_v21  ;;  %v9292_v2 = vor.u32 %v10259_v17, %v9289_v18  ;;  %v8147_v35 = vld [vmem:[%s15460_s7 + $0x318] sm:$0xf]  ;;  %v10252_v13 = vld [vmem:[%s15460_s7 + $0xbd4] sm:$0xf]  ;;  %v9885_v21 = vld [vmem:[%s15460_s7 + $0x58] sm:$0xf0] }
 0x276   :  { %5765 = vmatpush.bf16.msrb.mxu3 %v8984_v26  ;;  %v2649_v8 = vpop.f32.mrf.mxu1  ;;  %v8119_v50 = vld [vmem:[%s15460_s7 + $0x2e0] sm:$0xf]  ;;  %v7784_v6 = vor.u32 %v9885_v21, %v7783_v44  ;;  %v10144_v17 = vld [vmem:[%s15460_s7 + $0x870] sm:$0xf0]  ;;  %v8763_v44 = vld [vmem:[%s15460_s7 + $0x7e8] sm:$0xf] }
 0x277   :  { %5737 = vmatpush.bf16.msrb.mxu1 %v8536_v39  ;;  %v2648_v63 = vadd.f32 %v2647_v32, %v2634_v45  ;;  %v7811_v32 = vld [vmem:[%s15460_s7 + $0x78] sm:$0xf]  ;;  %v9976_v39 = vld [vmem:[%s15460_s7 + $0x330] sm:$0xf0]  ;;  %v9264_v45 = vor.u32 %v10252_v13, %v9261_v30  ;;  %v8120_v36 = vor.u32 %v9969_v53, %v8119_v50  ;;  %v10217_v13 = vld [vmem:[%s15460_s7 + $0xabc] sm:$0xf] }
 0x278   :  { %5752 = vmatpush.bf16.msrb.mxu2 %v8732_v43  ;;  %v8956_v43 = vor.u32 %v10175_v31, %v8953_v23  ;;  %v8176_v31 = vor.u32 %v9983_v19, %v8175_v59  ;;  %v9892_v23 = vld [vmem:[%s15460_s7 + $0x90] sm:$0xf0]  ;;  %v8007_v30 = vld [vmem:[%s15460_s7 + $0x200] sm:$0xf]  ;;  %v10130_v21 = vld [vmem:[%s15460_s7 + $0x800] sm:$0xf0] }
 0x279   :  { %5714 = vmatmul.bf16.vlgmr.msra.gmra.mxu3 %v12745_v15  ;;  %v2714_v16 = vmul.f32 0.01, %v2648_v63  ;;  %v7812_v47 = vor.u32 %v9892_v23, %v7811_v32  ;;  %v10224_v59 = vld [vmem:[%s15460_s7 + $0xaf4] sm:$0xf] }
 0x27a   :  { %5766 = vmatpush.bf16.msrb.mxu3 %v8956_v43 }
 0x27b   :  { %5738 = vmatpush.bf16.msrb.mxu1 %v8508_v57  ;;  %v2730_v26 = vmax.f32 %v2648_v63, %v2714_v16  ;;  %v9233_v57 = vld [vmem:[%s15460_s7 + $0xbb4] sm:$0xf0] }
 0x27c   :  { %5753 = vmatpush.bf16.msrb.mxu2 %v8704_v1  ;;  %v8897_v1 = vld [vmem:[%s15460_s7 + $0x914] sm:$0xf0]  ;;  %v2635_v60 = vpop.f32.mrf.mxu0  ;;  %v9236_v63 = vor.u32 %v10245_v56, %v9233_v57  ;;  %v10210_v56 = vld [vmem:[%s15460_s7 + $0xa84] sm:$0xf]  ;;  %v9093_v57 = vld [vmem:[%s15460_s7 + $0xa9c] sm:$0xf0] }
 0x27d   :  { %v2636_v3 = vadd.f32 %v2635_v60, %v2622_v0  ;;  %v8900_v11 = vor.u32 %v10161_v54, %v8897_v1  ;;  %v8091_v54 = vld [vmem:[%s15460_s7 + $0x2a8] sm:$0xf]  ;;  %v8847_v0 = vld [vmem:[%s15460_s7 + $0x890] sm:$0xf]  ;;  %v10151_v1 = vld [vmem:[%s15460_s7 + $0x8a8] sm:$0xf0] }
 0x27e   :  { %5767 = vmatpush.bf16.msrb.mxu3 %v8928_v58  ;;  %v7755_v58 = vld [vmem:[%s15460_s7 + $0x8] sm:$0xf]  ;;  %v8092_v4 = vor.u32 %v9962_v12, %v8091_v54  ;;  %v8848_v10 = vor.u32 %v10151_v1, %v8847_v0  ;;  %v9934_v54 = vld [vmem:[%s15460_s7 + $0x1e0] sm:$0xf0]  ;;  %v10123_v12 = vld [vmem:[%s15460_s7 + $0x7c8] sm:$0xf0] }
 0x27f   :  { %v2650_v29 = vadd.f32 %v2649_v8, %v2636_v3  ;;  %5739 = vmatpush.bf16.msrb.mxu1 %v8480_v38  ;;  %v9205_v38 = vld [vmem:[%s15460_s7 + $0xb7c] sm:$0xf0]  ;;  %v10315_v0 = vld [vmem:[%s15460_s7 + $0xdcc] sm:$0xf] }
 0x280   :  { %5754 = vmatpush.bf16.msrb.mxu2 %v8676_v14  ;;  %v10154_v14 = vld [vmem:[%s15460_s7 + $0x8c4] sm:$0xf] }
 0x281   :  { %v2722_v28 = vmul.f32 0.01, %v2650_v29  ;;  %v8872_v24 = vor.u32 %v10154_v14, %v8869_v48  ;;  %v8063_v14 = vld [vmem:[%s15460_s7 + $0x270] sm:$0xf]  ;;  %v9955_v48 = vld [vmem:[%s15460_s7 + $0x288] sm:$0xf0] }
 0x282   :  { %5768 = vmatpush.bf16.msrb.mxu3 %v8900_v11  ;;  %v9208_v11 = vor.u32 %v10238_v27, %v9205_v38  ;;  %v8064_v18 = vor.u32 %v9955_v48, %v8063_v14  ;;  %v10039_v27 = vld [vmem:[%s15460_s7 + $0x528] sm:$0xf0]  ;;  %v9096_v38 = vor.u32 %v10210_v56, %v9093_v57  ;;  %v8707_v48 = vld [vmem:[%s15460_s7 + $0x778] sm:$0xf]  ;;  %v9429_v56 = vld [vmem:[%s15460_s7 + $0xd3c] sm:$0xf0] }
 0x283   :  { %5740 = vmatpush.bf16.msrb.mxu1 %v8452_v49  ;;  %v8987_v57 = vld [vmem:[%s15460_s7 + $0x9a8] sm:$0xf] }
 0x284   :  { %5755 = vmatpush.bf16.msrb.mxu2 %v8648_v22  ;;  %v8421_v22 = vld [vmem:[%s15460_s7 + $0x55c] sm:$0xf0]  ;;  %v2675_v34 = vpop.f32.mrf.mxu3 }
 0x285   :  { %v8424_v40 = vor.u32 %v10042_v20, %v8421_v22  ;;  %v8820_v22 = vor.u32 %v10144_v17, %v8819_v42  ;;  %v10308_v17 = vld [vmem:[%s15460_s7 + $0xd94] sm:$0xf] }
 0x286   :  { %5769 = vmatpush.bf16.msrb.mxu3 %v8872_v24  ;;  %v9149_v24 = vld [vmem:[%s15460_s7 + $0xb0c] sm:$0xf0] }
 0x287   :  { %5756 = vmatmul.bf16.vlgmr.msrb.gmra.mxu2 %v13011_v9  ;;  %5741 = vmatpush.bf16.msrb.mxu1 %v8424_v40  ;;  %v9152_v23 = vor.u32 %v10224_v59, %v9149_v24  ;;  %v9485_v59 = vld [vmem:[%s15460_s7 + $0xdac] sm:$0xf0]  ;;  %v8679_v24 = vld [vmem:[%s15460_s7 + $0x740] sm:$0xf] }
 0x288   :  { %5804 = vmatpush.bf16.msra.mxu2 %v7952_v51  ;;  %v2738_v51 = vmax.f32 %v2650_v29, %v2722_v28  ;;  %v9177_v29 = vld [vmem:[%s15460_s7 + $0xb44] sm:$0xf0] }
 0x289   :  { %5770 = vmatmul.bf16.vlgmr.msrb.gmra.mxu3 %v13181_v61 }
 0x28a   :  { %v13345_v41 = vpack.c.bf16 %v2738_v51, %v2730_v26  ;;  %v2661_v43 = vpop.f32.mrf.mxu2  ;;  %5818 = vmatpush.bf16.msra.mxu3 %v8176_v31  ;;  %v9948_v26 = vld [vmem:[%s15460_s7 + $0x250] sm:$0xf0]  ;;  %v8791_v51 = vld [vmem:[%s15460_s7 + $0x820] sm:$0xf]  ;;  %v10137_v31 = vld [vmem:[%s15460_s7 + $0x838] sm:$0xf0] }
 0x28b   :  { %v2662_v60 = vadd.f32 %v2661_v43, %v971_v46  ;;  %v8792_v40 = vor.u32 %v10137_v31, %v8791_v51  ;;  %v10301_v31 = vld [vmem:[%s15460_s7 + $0xd5c] sm:$0xf] }
 0x28c   :  { %5805 = vmatpush.bf16.msra.mxu2 %v7924_v33  ;;  %5672 = vmatmul.bf16.vlgmr.msra.gmra.mxu0 %v13345_v41  ;;  %v8148_v33 = vor.u32 %v9976_v39, %v8147_v35  ;;  %v2677_v32 = vpop.f32.mrf.mxu3 }
 0x28d   :  { %5776 = vmatpush.bf16.msra.mxu0 %v9292_v2  ;;  %v2676_v49 = vadd.f32 %v2675_v34, %v2662_v60  ;;  %v8399_v34 = vld [vmem:[%s15460_s7 + $0x510] sm:$0xf] }
 0x28e   :  { %5819 = vmatpush.bf16.msra.mxu3 %v8148_v33  ;;  %v2703_v8 = vpop.f32.mrf.mxu1  ;;  %v9121_v33 = vld [vmem:[%s15460_s7 + $0xad4] sm:$0xf0]  ;;  %v8400_v14 = vor.u32 %v10039_v27, %v8399_v34  ;;  %v8959_v34 = vld [vmem:[%s15460_s7 + $0x970] sm:$0xf]  ;;  %v10179_v27 = vld [vmem:[%s15460_s7 + $0x988] sm:$0xf0] }
 0x290   :  { %5806 = vmatpush.bf16.msra.mxu2 %v7896_v62  ;;  %v9878_v62 = vld [vmem:[%s15460_s7 + $0x20] sm:$0xf0] }
 0x291   :  { %5777 = vmatpush.bf16.msra.mxu0 %v9264_v45  ;;  %v7756_v3 = vor.u32 %v9878_v62, %v7755_v58  ;;  %v8764_v58 = vor.u32 %v10130_v21, %v8763_v44  ;;  %v7979_v62 = vld [vmem:[%s15460_s7 + $0x1c8] sm:$0xf] }
 0x292   :  { %5820 = vmatpush.bf16.msra.mxu3 %v8120_v36  ;;  %v2663_v7 = vpop.f32.mrf.mxu2  ;;  %v9124_v36 = vor.u32 %v10217_v13, %v9121_v33  ;;  %v7980_v60 = vor.u32 %v9934_v54, %v7979_v62  ;;  %v8651_v13 = vld [vmem:[%s15460_s7 + $0x708] sm:$0xf] }
 0x293   :  { %v2664_v19 = vadd.f32 %v2663_v7, %v971_v46  ;;  %v10116_v7 = vld [vmem:[%s15460_s7 + $0x790] sm:$0xf0]  ;;  %v8315_v33 = vld [vmem:[%s15460_s7 + $0x468] sm:$0xf] }
 0x294   :  { %5807 = vmatpush.bf16.msra.mxu2 %v7868_v55  ;;  %v10231_v55 = vld [vmem:[%s15460_s7 + $0xb2c] sm:$0xf]  ;;  %v2689_v16 = vpop.f32.mrf.mxu0 }
 0x295   :  { %5778 = vmatpush.bf16.msra.mxu0 %v9236_v63  ;;  %v2690_v28 = vadd.f32 %v2689_v16, %v2676_v49  ;;  %v9180_v20 = vor.u32 %v10231_v55, %v9177_v29  ;;  %v2678_v39 = vadd.f32 %v2677_v32, %v2664_v19  ;;  %v8735_v63 = vld [vmem:[%s15460_s7 + $0x7b0] sm:$0xf]  ;;  %v8371_v49 = vld [vmem:[%s15460_s7 + $0x4d8] sm:$0xf]  ;;  %v8343_v32 = vld [vmem:[%s15460_s7 + $0x4a0] sm:$0xf] }
 0x296   :  { %5821 = vmatpush.bf16.msra.mxu3 %v8092_v4  ;;  %v2705_v50 = vpop.f32.mrf.mxu1  ;;  %v9071_v4 = vld [vmem:[%s15460_s7 + $0xa50] sm:$0xf]  ;;  %v8736_v55 = vor.u32 %v10123_v12, %v8735_v63  ;;  %v9043_v19 = vld [vmem:[%s15460_s7 + $0xa18] sm:$0xf]  ;;  %v10287_v63 = vld [vmem:[%s15460_s7 + $0xcec] sm:$0xf] }
 0x297   :  { %v2704_v35 = vadd.f32 %v2703_v8, %v2690_v28  ;;  %v10200_v28 = vld [vmem:[%s15460_s7 + $0xa30] sm:$0xf0]  ;;  %v8287_v12 = vld [vmem:[%s15460_s7 + $0x430] sm:$0xf] }
 0x298   :  { %5808 = vmatpush.bf16.msra.mxu2 %v7840_v25  ;;  %v8035_v25 = vld [vmem:[%s15460_s7 + $0x238] sm:$0xf]  ;;  %v9044_v51 = vor.u32 %v10200_v28, %v9043_v19  ;;  %v10273_v19 = vld [vmem:[%s15460_s7 + $0xc7c] sm:$0xf]  ;;  %v8231_v28 = vld [vmem:[%s15460_s7 + $0x3c0] sm:$0xf] }
 0x299   :  { %5779 = vmatpush.bf16.msra.mxu0 %v9208_v11  ;;  %v8036_v2 = vor.u32 %v9948_v26, %v8035_v25  ;;  %v2715_v46 = vmul.f32 0.01, %v2704_v35  ;;  %v10109_v25 = vld [vmem:[%s15460_s7 + $0x758] sm:$0xf0]  ;;  %v9488_v26 = vor.u32 %v10308_v17, %v9485_v59  ;;  %v7897_v17 = vld [vmem:[%s15460_s7 + $0x13c] sm:$0xf0] }
 0x29a   :  { %5822 = vmatpush.bf16.msra.mxu3 %v8064_v18  ;;  %v10032_v18 = vld [vmem:[%s15460_s7 + $0x4f0] sm:$0xf0] }
 0x29b   :  { %v2731_v8 = vmax.f32 %v2704_v35, %v2715_v46  ;;  %v9015_v35 = vld [vmem:[%s15460_s7 + $0x9e0] sm:$0xf]  ;;  %v10186_v46 = vld [vmem:[%s15460_s7 + $0x9c0] sm:$0xf0] }
 0x29c   :  { %5809 = vmatpush.bf16.msra.mxu2 %v7812_v47  ;;  %5728 = vmatmul.bf16.vlgmr.msrb.gmra.mxu0 %v12875_v52  ;;  %v9941_v47 = vld [vmem:[%s15460_s7 + $0x218] sm:$0xf0]  ;;  %v2691_v43 = vpop.f32.mrf.mxu0  ;;  %v8988_v54 = vor.u32 %v10186_v46, %v8987_v57  ;;  %v9980_v57 = vld [vmem:[%s15460_s7 + $0x354] sm:$0xf]  ;;  %v8177_v46 = vld [vmem:[%s15460_s7 + $0x36c] sm:$0xf0] }
 0x29d   :  { %5780 = vmatpush.bf16.msra.mxu0 %v9180_v20  ;;  %v2692_v45 = vadd.f32 %v2691_v43, %v2678_v39  ;;  %v8008_v53 = vor.u32 %v9941_v47, %v8007_v30  ;;  %v8708_v20 = vor.u32 %v10116_v7, %v8707_v48  ;;  %v10193_v39 = vld [vmem:[%s15460_s7 + $0x9f8] sm:$0xf0]  ;;  %v10102_v47 = vld [vmem:[%s15460_s7 + $0x720] sm:$0xf0]  ;;  %v9373_v48 = vld [vmem:[%s15460_s7 + $0xccc] sm:$0xf0] }
 0x29e   :  { %5823 = vmatpush.bf16.msra.mxu3 %v8036_v2  ;;  %v9457_v2 = vld [vmem:[%s15460_s7 + $0xd74] sm:$0xf0]  ;;  %v10294_v43 = vld [vmem:[%s15460_s7 + $0xd24] sm:$0xf]  ;;  %v9016_v21 = vor.u32 %v10193_v39, %v9015_v35 }
 0x29f   :  { %v9460_v44 = vor.u32 %v10301_v31, %v9457_v2  ;;  %v9432_v62 = vor.u32 %v10294_v43, %v9429_v56  ;;  %v8931_v7 = vld [vmem:[%s15460_s7 + $0x938] sm:$0xf]  ;;  %v7869_v31 = vld [vmem:[%s15460_s7 + $0x104] sm:$0xf0]  ;;  %v9317_v2 = vld [vmem:[%s15460_s7 + $0xc5c] sm:$0xf0] }
 0x2a0   :  { %5810 = vmatpush.bf16.msra.mxu2 %v7784_v6  ;;  %v2706_v6 = vadd.f32 %v2705_v50, %v2692_v45  ;;  %v10018_v45 = vld [vmem:[%s15460_s7 + $0x480] sm:$0xf0]  ;;  %v9924_v50 = vld [vmem:[%s15460_s7 + $0x194] sm:$0xf]  ;;  %v10263_v56 = vld [vmem:[%s15460_s7 + $0xc28] sm:$0xf0] }
 0x2a1   :  { %5781 = vmatpush.bf16.msra.mxu0 %v9152_v23  ;;  %v10025_v23 = vld [vmem:[%s15460_s7 + $0x4b8] sm:$0xf0]  ;;  %v10158_v43 = vld [vmem:[%s15460_s7 + $0x8e0] sm:$0xf0] }
 0x2a2   :  { %v2723_v1 = vmul.f32 0.01, %v2706_v6  ;;  %5824 = vmatpush.bf16.msra.mxu3 %v8008_v53  ;;  %v8344_v30 = vor.u32 %v10025_v23, %v8343_v32  ;;  %v7953_v53 = vld [vmem:[%s15460_s7 + $0x1ac] sm:$0xf0]  ;;  %v10266_v23 = vld [vmem:[%s15460_s7 + $0xc44] sm:$0xf] }
 0x2a4   :  { %5811 = vmatpush.bf16.msra.mxu2 %v7756_v3  ;;  %v9513_v3 = vld [vmem:[%s15460_s7 + $0xde4] sm:$0xf0]  ;;  %v2739_v11 = vmax.f32 %v2706_v6, %v2723_v1  ;;  %v8652_v6 = vor.u32 %v10102_v47, %v8651_v13  ;;  %v9990_v13 = vld [vmem:[%s15460_s7 + $0x3a0] sm:$0xf0] }
 0x2a5   :  { %5782 = vmatpush.bf16.msra.mxu0 %v9124_v36  ;;  %v9516_v29 = vor.u32 %v10315_v0, %v9513_v3  ;;  %v8316_v36 = vor.u32 %v10018_v45, %v8315_v33  ;;  %v10011_v0 = vld [vmem:[%s15460_s7 + $0x448] sm:$0xf0]  ;;  %v9401_v1 = vld [vmem:[%s15460_s7 + $0xd04] sm:$0xf0]  ;;  %v9896_v33 = vld [vmem:[%s15460_s7 + $0xb4] sm:$0xf] }
 0x2a6   :  { %v13496_v16 = vpack.c.bf16 %v2739_v11, %v2731_v8  ;;  %5825 = vmatpush.bf16.msra.mxu3 %v7980_v60  ;;  %v7925_v60 = vld [vmem:[%s15460_s7 + $0x174] sm:$0xf0]  ;;  %v8288_v3 = vor.u32 %v10011_v0, %v8287_v12  ;;  %v10280_v8 = vld [vmem:[%s15460_s7 + $0xcb4] sm:$0xf]  ;;  %v10095_v45 = vld [vmem:[%s15460_s7 + $0x6e8] sm:$0xf0]  ;;  %v8180_v0 = vor.u32 %v9980_v57, %v8177_v46 }
 0x2a7   :  { %5812 = vmatmul.bf16.vlgmr.msra.gmra.mxu2 %v12776_v37  ;;  %v8259_v11 = vld [vmem:[%s15460_s7 + $0x3f8] sm:$0xf] }
 0x2a8   :  { %5860 = vmatpush.bf16.msrb.mxu2 %v8848_v10  ;;  %v10207_v10 = vld [vmem:[%s15460_s7 + $0xa68] sm:$0xf0]  ;;  %5686 = vmatmul.bf16.vlgmr.msra.gmra.mxu1 %v13496_v16 }
 0x2a9   :  { %v9072_v42 = vor.u32 %v10207_v10, %v9071_v4  ;;  %5783 = vmatpush.bf16.msra.mxu0 %v9096_v38  ;;  %5790 = vmatpush.bf16.msra.mxu1 %v9516_v29  ;;  %v9917_v38 = vld [vmem:[%s15460_s7 + $0x15c] sm:$0xf]  ;;  %v9404_v4 = vor.u32 %v10287_v63, %v9401_v1  ;;  %v8960_v10 = vor.u32 %v10179_v27, %v8959_v34  ;;  %v10172_v29 = vld [vmem:[%s15460_s7 + $0x950] sm:$0xf0]  ;;  %v7813_v63 = vld [vmem:[%s15460_s7 + $0x94] sm:$0xf0] }
 0x2aa   :  { %5826 = vmatmul.bf16.vlgmr.msra.gmra.mxu3 %v12745_v15  ;;  %v8932_v59 = vor.u32 %v10172_v29, %v8931_v7  ;;  %v8595_v1 = vld [vmem:[%s15460_s7 + $0x698] sm:$0xf]  ;;  %v10088_v34 = vld [vmem:[%s15460_s7 + $0x6b0] sm:$0xf0]  ;;  %v10081_v7 = vld [vmem:[%s15460_s7 + $0x678] sm:$0xf0] }
 0x2ab   :  { %5874 = vmatpush.bf16.msrb.mxu3 %v9072_v42  ;;  %v9910_v42 = vld [vmem:[%s15460_s7 + $0x124] sm:$0xf]  ;;  %v9267_v27 = vld [vmem:[%s15460_s7 + $0xbd8] sm:$0xf]  ;;  %v9239_v29 = vld [vmem:[%s15460_s7 + $0xba0] sm:$0xf] }
 0x2ac   :  { %5861 = vmatpush.bf16.msrb.mxu2 %v8820_v22  ;;  %v8372_v22 = vor.u32 %v10032_v18, %v8371_v49  ;;  %5784 = vmatmul.bf16.vlgmr.msra.gmra.mxu0 %v13345_v41  ;;  %v9376_v18 = vor.u32 %v10280_v8, %v9373_v48  ;;  %v9882_v8 = vld [vmem:[%s15460_s7 + $0x44] sm:$0xf]  ;;  %v8567_v48 = vld [vmem:[%s15460_s7 + $0x660] sm:$0xf] }
 0x2ad   :  { %5832 = vmatpush.bf16.msrb.mxu0 %v8400_v14  ;;  %5791 = vmatpush.bf16.msra.mxu1 %v9488_v26  ;;  %v7928_v14 = vor.u32 %v9917_v38, %v7925_v60  ;;  %v10165_v26 = vld [vmem:[%s15460_s7 + $0x918] sm:$0xf0]  ;;  %v10256_v38 = vld [vmem:[%s15460_s7 + $0xbf0] sm:$0xf0] }
 0x2ae   :  { %v9973_v60 = vld [vmem:[%s15460_s7 + $0x31c] sm:$0xf] }
 0x2af   :  { %5875 = vmatpush.bf16.msrb.mxu3 %v9044_v51  ;;  %v9903_v51 = vld [vmem:[%s15460_s7 + $0xec] sm:$0xf] }
 0x2b0   :  { %5862 = vmatpush.bf16.msrb.mxu2 %v8792_v40  ;;  %v8680_v40 = vor.u32 %v10109_v25, %v8679_v24  ;;  %v9345_v24 = vld [vmem:[%s15460_s7 + $0xc94] sm:$0xf0]  ;;  %v8903_v25 = vld [vmem:[%s15460_s7 + $0x900] sm:$0xf]  ;;  %v7872_v47 = vor.u32 %v9903_v51, %v7869_v31  ;;  %v10242_v51 = vld [vmem:[%s15460_s7 + $0xb80] sm:$0xf0] }
 0x2b1   :  { %5833 = vmatpush.bf16.msrb.mxu0 %v8372_v22  ;;  %5792 = vmatpush.bf16.msra.mxu1 %v9460_v44  ;;  %v7900_v22 = vor.u32 %v9910_v42, %v7897_v17  ;;  %v9348_v35 = vor.u32 %v10273_v19, %v9345_v24  ;;  %v8904_v39 = vor.u32 %v10165_v26, %v8903_v25  ;;  %v7841_v44 = vld [vmem:[%s15460_s7 + $0xcc] sm:$0xf0]  ;;  %v10249_v42 = vld [vmem:[%s15460_s7 + $0xbb8] sm:$0xf0]  ;;  %v9966_v17 = vld [vmem:[%s15460_s7 + $0x2e4] sm:$0xf] }
 0x2b2   :  { %v9875_v19 = vld [vmem:[%s15460_s7 + $0xc] sm:$0xf]  ;;  %v8539_v24 = vld [vmem:[%s15460_s7 + $0x628] sm:$0xf]  ;;  %v10074_v25 = vld [vmem:[%s15460_s7 + $0x640] sm:$0xf0] }
 0x2b3   :  { %5876 = vmatpush.bf16.msrb.mxu3 %v9016_v21  ;;  %v8623_v21 = vld [vmem:[%s15460_s7 + $0x6d0] sm:$0xf]  ;;  %v9211_v26 = vld [vmem:[%s15460_s7 + $0xb68] sm:$0xf]  ;;  %v9959_v31 = vld [vmem:[%s15460_s7 + $0x2ac] sm:$0xf] }
 0x2b4   :  { %5863 = vmatpush.bf16.msrb.mxu2 %v8764_v58  ;;  %v7956_v58 = vor.u32 %v9924_v50, %v7953_v53  ;;  %v9295_v50 = vld [vmem:[%s15460_s7 + $0xc10] sm:$0xf] }
 0x2b5   :  { %5834 = vmatpush.bf16.msrb.mxu0 %v8344_v30  ;;  %5793 = vmatpush.bf16.msra.mxu1 %v9432_v62  ;;  %v8875_v30 = vld [vmem:[%s15460_s7 + $0x8c8] sm:$0xf]  ;;  %v8624_v62 = vor.u32 %v10095_v45, %v8623_v21  ;;  %v9296_v12 = vor.u32 %v10263_v56, %v9295_v50  ;;  %v9952_v21 = vld [vmem:[%s15460_s7 + $0x274] sm:$0xf]  ;;  %v8065_v45 = vld [vmem:[%s15460_s7 + $0x28c] sm:$0xf0] }
 0x2b6   :  { %v10141_v50 = vld [vmem:[%s15460_s7 + $0x85c] sm:$0xf]  ;;  %v8068_v46 = vor.u32 %v9952_v21, %v8065_v45  ;;  %v10312_v21 = vld [vmem:[%s15460_s7 + $0xdb0] sm:$0xf0] }
 0x2b7   :  { %5877 = vmatpush.bf16.msrb.mxu3 %v8988_v54  ;;  %v9889_v54 = vld [vmem:[%s15460_s7 + $0x7c] sm:$0xf] }
 0x2b8   :  { %5864 = vmatpush.bf16.msrb.mxu2 %v8736_v55  ;;  %v10004_v55 = vld [vmem:[%s15460_s7 + $0x410] sm:$0xf0]  ;;  %5742 = vmatmul.bf16.vlgmr.msrb.gmra.mxu1 %v12854_v5  ;;  %v10029_v45 = vld [vmem:[%s15460_s7 + $0x4dc] sm:$0xf] }
 0x2b9   :  { %5835 = vmatpush.bf16.msrb.mxu0 %v8316_v36  ;;  %v8260_v49 = vor.u32 %v10004_v55, %v8259_v11  ;;  %5794 = vmatpush.bf16.msra.mxu1 %v9404_v4  ;;  %v8876_v36 = vor.u32 %v10158_v43, %v8875_v30  ;;  %v7816_v4 = vor.u32 %v9889_v54, %v7813_v63  ;;  %v7785_v11 = vld [vmem:[%s15460_s7 + $0x5c] sm:$0xf0]  ;;  %v8511_v30 = vld [vmem:[%s15460_s7 + $0x5f0] sm:$0xf]  ;;  %v10228_v54 = vld [vmem:[%s15460_s7 + $0xb10] sm:$0xf0] }
 0x2ba   :  { %v9268_v55 = vor.u32 %v10256_v38, %v9267_v27  ;;  %v9183_v43 = vld [vmem:[%s15460_s7 + $0xb30] sm:$0xf]  ;;  %v9945_v63 = vld [vmem:[%s15460_s7 + $0x23c] sm:$0xf] }
 0x2bb   :  { %5878 = vmatpush.bf16.msrb.mxu3 %v8960_v10  ;;  %v8596_v10 = vor.u32 %v10088_v34, %v8595_v1  ;;  %v8793_v1 = vld [vmem:[%s15460_s7 + $0x83c] sm:$0xf0] }
 0x2bc   :  { %5865 = vmatpush.bf16.msrb.mxu2 %v8708_v20  ;;  %v9997_v20 = vld [vmem:[%s15460_s7 + $0x3d8] sm:$0xf0] }
 0x2bd   :  { %5836 = vmatpush.bf16.msrb.mxu0 %v8288_v3  ;;  %v8232_v32 = vor.u32 %v9997_v20, %v8231_v28  ;;  %5795 = vmatpush.bf16.msra.mxu1 %v9376_v18  ;;  %v8149_v3 = vld [vmem:[%s15460_s7 + $0x334] sm:$0xf0]  ;;  %v7788_v18 = vor.u32 %v9882_v8, %v7785_v11  ;;  %v7757_v28 = vld [vmem:[%s15460_s7 + $0x24] sm:$0xf0]  ;;  %v9240_v20 = vor.u32 %v10249_v42, %v9239_v29  ;;  %v10221_v8 = vld [vmem:[%s15460_s7 + $0xad8] sm:$0xf0] }
 0x2be   :  { %v9938_v11 = vld [vmem:[%s15460_s7 + $0x204] sm:$0xf]  ;;  %v8427_v29 = vld [vmem:[%s15460_s7 + $0x548] sm:$0xf] }
 0x2bf   :  { %5879 = vmatpush.bf16.msrb.mxu3 %v8932_v59  ;;  %v8568_v59 = vor.u32 %v10081_v7, %v8567_v48  ;;  %v8765_v48 = vld [vmem:[%s15460_s7 + $0x804] sm:$0xf0]  ;;  %v10046_v42 = vld [vmem:[%s15460_s7 + $0x560] sm:$0xf0] }
 0x2c0   :  { %5866 = vmatpush.bf16.msrb.mxu2 %v8680_v40  ;;  %v8203_v40 = vld [vmem:[%s15460_s7 + $0x388] sm:$0xf] }
 0x2c1   :  { %5837 = vmatpush.bf16.msrb.mxu0 %v8260_v49  ;;  %v8204_v53 = vor.u32 %v9990_v13, %v8203_v40  ;;  %5796 = vmatpush.bf16.msra.mxu1 %v9348_v35  ;;  %v8121_v49 = vld [vmem:[%s15460_s7 + $0x2fc] sm:$0xf0]  ;;  %v7760_v35 = vor.u32 %v9875_v19, %v7757_v28  ;;  %v9212_v40 = vor.u32 %v10242_v51, %v9211_v26  ;;  %v9931_v19 = vld [vmem:[%s15460_s7 + $0x1cc] sm:$0xf]  ;;  %v10036_v51 = vld [vmem:[%s15460_s7 + $0x514] sm:$0xf] }
 0x2c2   :  { %v10319_v26 = vld [vmem:[%s15460_s7 + $0xde8] sm:$0xf0] }
 0x2c3   :  { %5880 = vmatpush.bf16.msrb.mxu3 %v8904_v39  ;;  %v8540_v39 = vor.u32 %v10074_v25, %v8539_v24  ;;  %v8737_v24 = vld [vmem:[%s15460_s7 + $0x7cc] sm:$0xf0] }
 0x2c4   :  { %5867 = vmatpush.bf16.msrb.mxu2 %v8652_v6  ;;  %v9320_v6 = vor.u32 %v10266_v23, %v9317_v2  ;;  %v10148_v23 = vld [vmem:[%s15460_s7 + $0x894] sm:$0xf]  ;;  %v8849_v2 = vld [vmem:[%s15460_s7 + $0x8ac] sm:$0xf0] }
 0x2c5   :  { %5838 = vmatpush.bf16.msrb.mxu0 %v8232_v32  ;;  %v8093_v32 = vld [vmem:[%s15460_s7 + $0x2c4] sm:$0xf0]  ;;  %v9519_v25 = vld [vmem:[%s15460_s7 + $0xdd0] sm:$0xf] }
 0x2c6   :  { %5797 = vmatpush.bf16.msra.mxu1 %v9320_v6  ;;  %v8096_v13 = vor.u32 %v9959_v31, %v8093_v32  ;;  %v8483_v6 = vld [vmem:[%s15460_s7 + $0x5b8] sm:$0xf]  ;;  %v8428_v31 = vor.u32 %v10046_v42, %v8427_v29  ;;  %v8401_v32 = vld [vmem:[%s15460_s7 + $0x52c] sm:$0xf0]  ;;  %v9928_v42 = vld [vmem:[%s15460_s7 + $0x1b0] sm:$0xf0] }
 0x2c7   :  { %5868 = vmatmul.bf16.vlgmr.msrb.gmra.mxu2 %v13011_v9  ;;  %5881 = vmatpush.bf16.msrb.mxu3 %v8876_v36  ;;  %v10060_v36 = vld [vmem:[%s15460_s7 + $0x5d0] sm:$0xf0]  ;;  %v7959_v29 = vld [vmem:[%s15460_s7 + $0x198] sm:$0xf] }
 0x2c8   :  { %5916 = vmatpush.bf16.msra.mxu2 %v7956_v58  ;;  %v7844_v58 = vor.u32 %v9896_v33, %v7841_v44  ;;  %v8852_v33 = vor.u32 %v10148_v23, %v8849_v2  ;;  %v10235_v44 = vld [vmem:[%s15460_s7 + $0xb48] sm:$0xf0]  ;;  %v8484_v34 = vor.u32 %v10060_v36, %v8483_v6  ;;  %v10204_v23 = vld [vmem:[%s15460_s7 + $0xa54] sm:$0xf]  ;;  %v9073_v2 = vld [vmem:[%s15460_s7 + $0xa6c] sm:$0xf0] }
 0x2c9   :  { %5839 = vmatpush.bf16.msrb.mxu0 %v8204_v53  ;;  %5798 = vmatmul.bf16.vlgmr.msra.gmra.mxu1 %v13496_v16  ;;  %v8821_v53 = vld [vmem:[%s15460_s7 + $0x874] sm:$0xf0]  ;;  %v9184_v57 = vor.u32 %v10235_v44, %v9183_v43  ;;  %v8404_v43 = vor.u32 %v10036_v51, %v8401_v32  ;;  %v10106_v6 = vld [vmem:[%s15460_s7 + $0x744] sm:$0xf]  ;;  %v8681_v36 = vld [vmem:[%s15460_s7 + $0x75c] sm:$0xf0] }
 0x2ca   :  { %5846 = vmatpush.bf16.msrb.mxu1 %v8624_v62  ;;  %5882 = vmatmul.bf16.vlgmr.msrb.gmra.mxu3 %v13181_v61  ;;  %v8824_v62 = vor.u32 %v10141_v50, %v8821_v53  ;;  %v9491_v44 = vld [vmem:[%s15460_s7 + $0xd98] sm:$0xf]  ;;  %v10197_v53 = vld [vmem:[%s15460_s7 + $0xa1c] sm:$0xf]  ;;  %v7931_v51 = vld [vmem:[%s15460_s7 + $0x160] sm:$0xf] }
 0x2cb   :  { %5930 = vmatpush.bf16.msra.mxu3 %v8180_v0  ;;  %v10134_v0 = vld [vmem:[%s15460_s7 + $0x824] sm:$0xf]  ;;  %v8373_v50 = vld [vmem:[%s15460_s7 + $0x4f4] sm:$0xf0] }
 0x2cc   :  { %5917 = vmatpush.bf16.msra.mxu2 %v7928_v14  ;;  %v8152_v14 = vor.u32 %v9973_v60, %v8149_v3  ;;  %5840 = vmatmul.bf16.vlgmr.msrb.gmra.mxu0 %v12875_v52  ;;  %v8455_v60 = vld [vmem:[%s15460_s7 + $0x580] sm:$0xf]  ;;  %v10053_v3 = vld [vmem:[%s15460_s7 + $0x598] sm:$0xf0] }
 0x2cd   :  { %5888 = vmatpush.bf16.msra.mxu0 %v9296_v12  ;;  %v8037_v12 = vld [vmem:[%s15460_s7 + $0x254] sm:$0xf0]  ;;  %v8456_v7 = vor.u32 %v10053_v3, %v8455_v60  ;;  %v10099_v60 = vld [vmem:[%s15460_s7 + $0x70c] sm:$0xf]  ;;  %v8653_v3 = vld [vmem:[%s15460_s7 + $0x724] sm:$0xf0] }
 0x2ce   :  { %5847 = vmatpush.bf16.msrb.mxu1 %v8596_v10  ;;  %v8040_v38 = vor.u32 %v9945_v63, %v8037_v12  ;;  %v8796_v10 = vor.u32 %v10134_v0, %v8793_v1  ;;  %v10305_v63 = vld [vmem:[%s15460_s7 + $0xd78] sm:$0xf0]  ;;  %v10022_v12 = vld [vmem:[%s15460_s7 + $0x4a4] sm:$0xf]  ;;  %v8345_v0 = vld [vmem:[%s15460_s7 + $0x4bc] sm:$0xf0] }
 0x2cf   :  { %5931 = vmatpush.bf16.msra.mxu3 %v8152_v14  ;;  %v10127_v14 = vld [vmem:[%s15460_s7 + $0x7ec] sm:$0xf]  ;;  %v10190_v1 = vld [vmem:[%s15460_s7 + $0x9e4] sm:$0xf] }
 0x2d0   :  { %5918 = vmatpush.bf16.msra.mxu2 %v7900_v22  ;;  %v8124_v22 = vor.u32 %v9966_v17, %v8121_v49  ;;  %v8768_v28 = vor.u32 %v10127_v14, %v8765_v48  ;;  %v8317_v14 = vld [vmem:[%s15460_s7 + $0x484] sm:$0xf0]  ;;  %v10183_v48 = vld [vmem:[%s15460_s7 + $0x9ac] sm:$0xf] }
 0x2d1   :  { %5889 = vmatpush.bf16.msra.mxu0 %v9268_v55  ;;  %v8009_v55 = vld [vmem:[%s15460_s7 + $0x21c] sm:$0xf0] }
 0x2d2   :  { %5848 = vmatpush.bf16.msrb.mxu1 %v8568_v59  ;;  %v8012_v49 = vor.u32 %v9938_v11, %v8009_v55  ;;  %v10214_v59 = vld [vmem:[%s15460_s7 + $0xaa0] sm:$0xf0]  ;;  %v10015_v55 = vld [vmem:[%s15460_s7 + $0x46c] sm:$0xf] }
 0x2d3   :  { %5932 = vmatpush.bf16.msra.mxu3 %v8124_v22  ;;  %v10120_v22 = vld [vmem:[%s15460_s7 + $0x7b4] sm:$0xf]  ;;  %v10298_v11 = vld [vmem:[%s15460_s7 + $0xd40] sm:$0xf0] }
 0x2d4   :  { %5919 = vmatpush.bf16.msra.mxu2 %v7872_v47  ;;  %v10067_v47 = vld [vmem:[%s15460_s7 + $0x608] sm:$0xf0] }
 0x2d5   :  { %5890 = vmatpush.bf16.msra.mxu0 %v9240_v20  ;;  %v8512_v56 = vor.u32 %v10067_v47, %v8511_v30  ;;  %v7981_v20 = vld [vmem:[%s15460_s7 + $0x1e4] sm:$0xf0]  ;;  %v10113_v30 = vld [vmem:[%s15460_s7 + $0x77c] sm:$0xf]  ;;  %v8709_v47 = vld [vmem:[%s15460_s7 + $0x794] sm:$0xf0] }
 0x2d6   :  { %5849 = vmatpush.bf16.msrb.mxu1 %v8540_v39  ;;  %v7984_v39 = vor.u32 %v9931_v19, %v7981_v20  ;;  %v9407_v19 = vld [vmem:[%s15460_s7 + $0xcf0] sm:$0xf]  ;;  %v10008_v20 = vld [vmem:[%s15460_s7 + $0x434] sm:$0xf] }
 0x2d7   :  { %5933 = vmatpush.bf16.msra.mxu3 %v8096_v13  ;;  %v9520_v13 = vor.u32 %v10319_v26, %v9519_v25  ;;  %v10176_v25 = vld [vmem:[%s15460_s7 + $0x974] sm:$0xf]  ;;  %v8961_v26 = vld [vmem:[%s15460_s7 + $0x98c] sm:$0xf0] }
 0x2d8   :  { %5920 = vmatpush.bf16.msra.mxu2 %v7844_v58  ;;  %v9155_v58 = vld [vmem:[%s15460_s7 + $0xaf8] sm:$0xf] }
 0x2d9   :  { %5891 = vmatpush.bf16.msra.mxu0 %v9212_v40  ;;  %v9156_v27 = vor.u32 %v10228_v54, %v9155_v58  ;;  %v8740_v40 = vor.u32 %v10120_v22, %v8737_v24  ;;  %v8376_v58 = vor.u32 %v10029_v45, %v8373_v50  ;;  %v9463_v54 = vld [vmem:[%s15460_s7 + $0xd60] sm:$0xf]  ;;  %v7960_v22 = vor.u32 %v9928_v42, %v7959_v29  ;;  %v8289_v24 = vld [vmem:[%s15460_s7 + $0x44c] sm:$0xf0]  ;;  %v8183_v29 = vld [vmem:[%s15460_s7 + $0x358] sm:$0xf] }
 0x2da   :  { %5850 = vmatpush.bf16.msrb.mxu1 %v8512_v56  ;;  %v9045_v56 = vld [vmem:[%s15460_s7 + $0xa34] sm:$0xf0]  ;;  %v9984_v42 = vld [vmem:[%s15460_s7 + $0x370] sm:$0xf0] }
 0x2db   :  { %5934 = vmatpush.bf16.msra.mxu3 %v8068_v46  ;;  %v9492_v46 = vor.u32 %v10312_v21, %v9491_v44  ;;  %v9914_v44 = vld [vmem:[%s15460_s7 + $0x140] sm:$0xf0] }
 0x2dc   :  { %5921 = vmatpush.bf16.msra.mxu2 %v7816_v4  ;;  %v9127_v4 = vld [vmem:[%s15460_s7 + $0xac0] sm:$0xf] }
 0x2dd   :  { %5892 = vmatpush.bf16.msra.mxu0 %v9184_v57  ;;  %v9128_v17 = vor.u32 %v10221_v8, %v9127_v4  ;;  %v8712_v57 = vor.u32 %v10113_v30, %v8709_v47  ;;  %v8348_v4 = vor.u32 %v10022_v12, %v8345_v0  ;;  %v9435_v8 = vld [vmem:[%s15460_s7 + $0xd28] sm:$0xf]  ;;  %v8261_v30 = vld [vmem:[%s15460_s7 + $0x414] sm:$0xf0]  ;;  %v10169_v47 = vld [vmem:[%s15460_s7 + $0x93c] sm:$0xf] }
 0x2de   :  { %5851 = vmatpush.bf16.msrb.mxu1 %v8484_v34  ;;  %v9017_v34 = vld [vmem:[%s15460_s7 + $0x9fc] sm:$0xf0]  ;;  %v9323_v12 = vld [vmem:[%s15460_s7 + $0xc48] sm:$0xf]  ;;  %v10270_v0 = vld [vmem:[%s15460_s7 + $0xc60] sm:$0xf0] }
 0x2df   :  { %5935 = vmatpush.bf16.msra.mxu3 %v8040_v38  ;;  %v9464_v38 = vor.u32 %v10305_v63, %v9463_v54  ;;  %v9907_v54 = vld [vmem:[%s15460_s7 + $0x108] sm:$0xf0] }
 0x2e0   :  { %5922 = vmatpush.bf16.msra.mxu2 %v7788_v18  ;;  %v9099_v18 = vld [vmem:[%s15460_s7 + $0xa88] sm:$0xf] }
 0x2e1   :  { %5893 = vmatpush.bf16.msra.mxu0 %v9156_v27  ;;  %v8684_v27 = vor.u32 %v10106_v6, %v8681_v36  ;;  %v8233_v6 = vld [vmem:[%s15460_s7 + $0x3dc] sm:$0xf0]  ;;  %v10162_v36 = vld [vmem:[%s15460_s7 + $0x904] sm:$0xf] }
 0x2e2   :  { %5852 = vmatpush.bf16.msrb.mxu1 %v8456_v7  ;;  %v8989_v7 = vld [vmem:[%s15460_s7 + $0x9c4] sm:$0xf0] }
 0x2e3   :  { %5936 = vmatpush.bf16.msra.mxu3 %v8012_v49  ;;  %v9436_v49 = vor.u32 %v10298_v11, %v9435_v8  ;;  %v9900_v8 = vld [vmem:[%s15460_s7 + $0xd0] sm:$0xf0] }
 0x2e4   :  { %5923 = vmatpush.bf16.msra.mxu2 %v7760_v35  ;;  %v9100_v35 = vor.u32 %v10214_v59, %v9099_v18  ;;  %v8320_v18 = vor.u32 %v10015_v55, %v8317_v14  ;;  %v8992_v59 = vor.u32 %v10183_v48, %v8989_v7  ;;  %v10092_v11 = vld [vmem:[%s15460_s7 + $0x6d4] sm:$0xf]  ;;  %v8625_v55 = vld [vmem:[%s15460_s7 + $0x6ec] sm:$0xf0]  ;;  %v9324_v48 = vor.u32 %v10270_v0, %v9323_v12  ;;  %v9213_v12 = vld [vmem:[%s15460_s7 + $0xb84] sm:$0xf0] }
 0x2e5   :  { %5894 = vmatpush.bf16.msra.mxu0 %v9128_v17  ;;  %v8656_v17 = vor.u32 %v10099_v60, %v8653_v3  ;;  %v10155_v60 = vld [vmem:[%s15460_s7 + $0x8cc] sm:$0xf]  ;;  %v10260_v14 = vld [vmem:[%s15460_s7 + $0xc14] sm:$0xf]  ;;  %v9297_v7 = vld [vmem:[%s15460_s7 + $0xc2c] sm:$0xf0] }
 0x2e6   :  { %5853 = vmatpush.bf16.msrb.mxu1 %v8428_v31  ;;  %v9921_v31 = vld [vmem:[%s15460_s7 + $0x178] sm:$0xf0]  ;;  %v8099_v0 = vld [vmem:[%s15460_s7 + $0x2b0] sm:$0xf] }
 0x2e7   :  { %5924 = vmatmul.bf16.vlgmr.msra.gmra.mxu2 %v12776_v37  ;;  %5937 = vmatpush.bf16.msra.mxu3 %v7984_v39  ;;  %v10284_v39 = vld [vmem:[%s15460_s7 + $0xcd0] sm:$0xf0] }
 0x2e8   :  { %5972 = vmatpush.bf16.msrb.mxu2 %v8852_v33  ;;  %v9076_v33 = vor.u32 %v10204_v23, %v9073_v2  ;;  %v8292_v23 = vor.u32 %v10008_v20, %v8289_v24  ;;  %v8964_v2 = vor.u32 %v10176_v25, %v8961_v26  ;;  %v9300_v20 = vor.u32 %v10260_v14, %v9297_v7  ;;  %v10085_v24 = vld [vmem:[%s15460_s7 + $0x69c] sm:$0xf]  ;;  %v8597_v25 = vld [vmem:[%s15460_s7 + $0x6b4] sm:$0xf0]  ;;  %v9185_v7 = vld [vmem:[%s15460_s7 + $0xb4c] sm:$0xf0] }
 0x2e9   :  { %5895 = vmatpush.bf16.msra.mxu0 %v9100_v35  ;;  %5854 = vmatmul.bf16.vlgmr.msrb.gmra.mxu1 %v12854_v5  ;;  %v9379_v35 = vld [vmem:[%s15460_s7 + $0xcb8] sm:$0xf]  ;;  %v10253_v26 = vld [vmem:[%s15460_s7 + $0xbdc] sm:$0xf] }
 0x2ea   :  { %5902 = vmatpush.bf16.msra.mxu1 %v9520_v13  ;;  %5938 = vmatmul.bf16.vlgmr.msra.gmra.mxu3 %v12745_v15  ;;  %v7932_v13 = vor.u32 %v9921_v31, %v7931_v51  ;;  %v9380_v21 = vor.u32 %v10284_v39, %v9379_v35  ;;  %v9269_v51 = vld [vmem:[%s15460_s7 + $0xbf4] sm:$0xf0]  ;;  %v8155_v31 = vld [vmem:[%s15460_s7 + $0x320] sm:$0xf]  ;;  %v8600_v35 = vor.u32 %v10085_v24, %v8597_v25  ;;  %v7791_v39 = vld [vmem:[%s15460_s7 + $0x48] sm:$0xf] }
 0x2eb   :  { %5986 = vmatpush.bf16.msrb.mxu3 %v9076_v33  ;;  %v7903_v33 = vld [vmem:[%s15460_s7 + $0x128] sm:$0xf]  ;;  %v8485_v24 = vld [vmem:[%s15460_s7 + $0x5d4] sm:$0xf0]  ;;  %v10225_v25 = vld [vmem:[%s15460_s7 + $0xafc] sm:$0xf] }
 0x2ec   :  { %5973 = vmatpush.bf16.msrb.mxu2 %v8824_v62  ;;  %v9048_v62 = vor.u32 %v10197_v53, %v9045_v56  ;;  %5896 = vmatmul.bf16.vlgmr.msra.gmra.mxu0 %v13345_v41  ;;  %v9351_v53 = vld [vmem:[%s15460_s7 + $0xc80] sm:$0xf]  ;;  %v10277_v56 = vld [vmem:[%s15460_s7 + $0xc98] sm:$0xf0] }
 0x2ed   :  { %5944 = vmatpush.bf16.msrb.mxu0 %v8404_v43  ;;  %v8933_v43 = vld [vmem:[%s15460_s7 + $0x954] sm:$0xf0]  ;;  %v9352_v63 = vor.u32 %v10277_v56, %v9351_v53 }
 0x2ee   :  { %5903 = vmatpush.bf16.msra.mxu1 %v9492_v46  ;;  %v8936_v50 = vor.u32 %v10169_v47, %v8933_v43  ;;  %v7904_v46 = vor.u32 %v9914_v44, %v7903_v33  ;;  %v10078_v47 = vld [vmem:[%s15460_s7 + $0x664] sm:$0xf]  ;;  %v8569_v43 = vld [vmem:[%s15460_s7 + $0x67c] sm:$0xf0]  ;;  %v14122_v44 = vpop.f32.mrf.mxu3 }
 0x2ef   :  { %5987 = vmatpush.bf16.msrb.mxu3 %v9048_v62  ;;  %v7875_v62 = vld [vmem:[%s15460_s7 + $0xf0] sm:$0xf]  ;;  %v10246_v33 = vld [vmem:[%s15460_s7 + $0xba4] sm:$0xf]  ;;  %v8572_v56 = vor.u32 %v10078_v47, %v8569_v43 }
 0x2f0   :  { %5974 = vmatpush.bf16.msrb.mxu2 %v8796_v10  ;;  %v9020_v10 = vor.u32 %v10190_v1, %v9017_v34  ;;  %v7876_v3 = vor.u32 %v9907_v54, %v7875_v62  ;;  %v8541_v62 = vld [vmem:[%s15460_s7 + $0x644] sm:$0xf0]  ;;  %v10239_v54 = vld [vmem:[%s15460_s7 + $0xb6c] sm:$0xf]  ;;  %v10050_v43 = vld [vmem:[%s15460_s7 + $0x584] sm:$0xf] }
 0x2f1   :  { %5945 = vmatpush.bf16.msrb.mxu0 %v8376_v58  ;;  %v8905_v58 = vld [vmem:[%s15460_s7 + $0x91c] sm:$0xf0] }
 0x2f2   :  { %5904 = vmatpush.bf16.msra.mxu1 %v9464_v38  ;;  %v8908_v34 = vor.u32 %v10162_v36, %v8905_v58  ;;  %v8205_v38 = vld [vmem:[%s15460_s7 + $0x3a4] sm:$0xf0]  ;;  %v10071_v58 = vld [vmem:[%s15460_s7 + $0x62c] sm:$0xf] }
 0x2f3   :  { %5988 = vmatpush.bf16.msrb.mxu3 %v9020_v10  ;;  %v7847_v10 = vld [vmem:[%s15460_s7 + $0xb8] sm:$0xf] }
 0x2f4   :  { %5975 = vmatpush.bf16.msrb.mxu2 %v8768_v28  ;;  %v10291_v28 = vld [vmem:[%s15460_s7 + $0xd08] sm:$0xf0] }
 0x2f5   :  { %5946 = vmatpush.bf16.msrb.mxu0 %v8348_v4  ;;  %v9408_v32 = vor.u32 %v10291_v28, %v9407_v19  ;;  %v8877_v4 = vld [vmem:[%s15460_s7 + $0x8e4] sm:$0xf0]  ;;  %v7819_v19 = vld [vmem:[%s15460_s7 + $0x80] sm:$0xf]  ;;  %v9893_v28 = vld [vmem:[%s15460_s7 + $0x98] sm:$0xf0] }
 0x2f6   :  { %5905 = vmatpush.bf16.msra.mxu1 %v9436_v49  ;;  %v8880_v49 = vor.u32 %v10155_v60, %v8877_v4  ;;  %v9216_v4 = vor.u32 %v10239_v54, %v9213_v12  ;;  %v8429_v54 = vld [vmem:[%s15460_s7 + $0x564] sm:$0xf0] }
 0x2f7   :  { %5989 = vmatpush.bf16.msrb.mxu3 %v8992_v59  ;;  %v8628_v59 = vor.u32 %v10092_v11, %v8625_v55  ;;  %v8513_v11 = vld [vmem:[%s15460_s7 + $0x60c] sm:$0xf0]  ;;  %v10232_v55 = vld [vmem:[%s15460_s7 + $0xb34] sm:$0xf] }
 0x2f8   :  { %5976 = vmatpush.bf16.msrb.mxu2 %v8740_v40  ;;  %v10001_v40 = vld [vmem:[%s15460_s7 + $0x3fc] sm:$0xf] }
 0x2f9   :  { %5947 = vmatpush.bf16.msrb.mxu0 %v8320_v18  ;;  %v8264_v45 = vor.u32 %v10001_v40, %v8261_v30  ;;  %v7848_v18 = vor.u32 %v9900_v8, %v7847_v10  ;;  %v9886_v40 = vld [vmem:[%s15460_s7 + $0x60] sm:$0xf0]  ;;  %v10064_v8 = vld [vmem:[%s15460_s7 + $0x5f4] sm:$0xf] }
 0x2fa   :  { %5906 = vmatpush.bf16.msra.mxu1 %v9408_v32  ;;  %v9977_v32 = vld [vmem:[%s15460_s7 + $0x338] sm:$0xf0]  ;;  %v7792_v53 = vor.u32 %v9886_v40, %v7791_v39 }
 0x2fb   :  { %5990 = vmatpush.bf16.msrb.mxu3 %v8964_v2  ;;  %v7820_v2 = vor.u32 %v9893_v28, %v7819_v19  ;;  %v8156_v30 = vor.u32 %v9977_v32, %v8155_v31  ;;  %v8516_v19 = vor.u32 %v10064_v8, %v8513_v11  ;;  %v9188_v28 = vor.u32 %v10232_v55, %v9185_v7  ;;  %v8043_v31 = vld [vmem:[%s15460_s7 + $0x240] sm:$0xf]  ;;  %v9949_v32 = vld [vmem:[%s15460_s7 + $0x258] sm:$0xf0]  ;;  %v10124_v8 = vld [vmem:[%s15460_s7 + $0x7d0] sm:$0xf0] }
 0x2fc   :  { %5977 = vmatpush.bf16.msrb.mxu2 %v8712_v57  ;;  %v9994_v57 = vld [vmem:[%s15460_s7 + $0x3c4] sm:$0xf]  ;;  %v8044_v47 = vor.u32 %v9949_v32, %v8043_v31  ;;  %v10316_v11 = vld [vmem:[%s15460_s7 + $0xdd4] sm:$0xf]  ;;  %v8407_v55 = vld [vmem:[%s15460_s7 + $0x518] sm:$0xf] }
 0x2fd   :  { %5948 = vmatpush.bf16.msrb.mxu0 %v8292_v23  ;;  %v8236_v1 = vor.u32 %v9994_v57, %v8233_v6  ;;  %v14105_v23 = vpop.f32.mrf.mxu2  ;;  %v7763_v57 = vld [vmem:[%s15460_s7 + $0x10] sm:$0xf]  ;;  %v8379_v32 = vld [vmem:[%s15460_s7 + $0x4e0] sm:$0xf] }
 0x2fe   :  { %5907 = vmatpush.bf16.msra.mxu1 %v9380_v21  ;;  %v9241_v21 = vld [vmem:[%s15460_s7 + $0xbbc] sm:$0xf0] }
 0x2ff   :  { %5991 = vmatpush.bf16.msrb.mxu3 %v8936_v50  ;;  %v9970_v50 = vld [vmem:[%s15460_s7 + $0x300] sm:$0xf0]  ;;  %v9244_v6 = vor.u32 %v10246_v33, %v9241_v21  ;;  %v8457_v33 = vld [vmem:[%s15460_s7 + $0x59c] sm:$0xf0] }
 0x300   :  { %5978 = vmatpush.bf16.msrb.mxu2 %v8684_v27  ;;  %v9987_v27 = vld [vmem:[%s15460_s7 + $0x38c] sm:$0xf]  ;;  %v10218_v21 = vld [vmem:[%s15460_s7 + $0xac4] sm:$0xf] }
 0x301   :  { %5949 = vmatpush.bf16.msrb.mxu0 %v8264_v45  ;;  %v8127_v45 = vld [vmem:[%s15460_s7 + $0x2e8] sm:$0xf] }
 0x302   :  { %5908 = vmatpush.bf16.msra.mxu1 %v9352_v63  ;;  %v8128_v36 = vor.u32 %v9970_v50, %v8127_v45  ;;  %v14151_v63 = vpop.f32.mrf.mxu0 }
 0x303   :  { %5992 = vmatpush.bf16.msrb.mxu3 %v8908_v34  ;;  %v8855_v34 = vld [vmem:[%s15460_s7 + $0x898] sm:$0xf] }
 0x304   :  { %5979 = vmatpush.bf16.msrb.mxu2 %v8656_v17  ;;  %v8208_v17 = vor.u32 %v9987_v27, %v8205_v38  ;;  %v10152_v27 = vld [vmem:[%s15460_s7 + $0x8b0] sm:$0xf0]  ;;  %v14171_v38 = vld [vmem:[%s15462_s8] sm:$0x7f] }
 0x305   :  { %5950 = vmatpush.bf16.msrb.mxu0 %v8236_v1  ;;  %v9963_v1 = vld [vmem:[%s15460_s7 + $0x2c8] sm:$0xf0]  ;;  %v14182_v14 = vpop.f32.mrf.mxu2 }
 0x306   :  { %5909 = vmatpush.bf16.msra.mxu1 %v9324_v48  ;;  %v8100_v10 = vor.u32 %v9963_v1, %v8099_v0  ;;  %v8856_v48 = vor.u32 %v10152_v27, %v8855_v34  ;;  %v10211_v1 = vld [vmem:[%s15460_s7 + $0xa8c] sm:$0xf]  ;;  %v9101_v34 = vld [vmem:[%s15460_s7 + $0xaa4] sm:$0xf0]  ;;  %v7987_v27 = vld [vmem:[%s15460_s7 + $0x1d0] sm:$0xf] }
 0x307   :  { %5980 = vmatmul.bf16.vlgmr.msrb.gmra.mxu2 %v13011_v9  ;;  %5993 = vmatpush.bf16.msrb.mxu3 %v8880_v49  ;;  %v10145_v49 = vld [vmem:[%s15460_s7 + $0x878] sm:$0xf0] }
 0x308   :  { %6028 = vmatpush.bf16.msra.mxu2 %v7960_v22  ;;  %v8184_v22 = vor.u32 %v9984_v42, %v8183_v29  ;;  %v8071_v29 = vld [vmem:[%s15460_s7 + $0x278] sm:$0xf]  ;;  %v9956_v42 = vld [vmem:[%s15460_s7 + $0x290] sm:$0xf0] }
 0x309   :  { %5951 = vmatpush.bf16.msrb.mxu0 %v8208_v17  ;;  %5910 = vmatmul.bf16.vlgmr.msra.gmra.mxu1 %v13496_v16  ;;  %v8827_v17 = vld [vmem:[%s15460_s7 + $0x860] sm:$0xf] }
 0x30a   :  { %5958 = vmatpush.bf16.msrb.mxu1 %v8628_v59  ;;  %5994 = vmatmul.bf16.vlgmr.msrb.gmra.mxu3 %v13181_v61  ;;  %v14200_v59 = vpop.f32.mrf.mxu3  ;;  %v14227_v39 = vpop.f32.mrf.mxu0 }
 0x30b   :  { %6042 = vmatpush.bf16.msra.mxu3 %v8184_v22  ;;  %v10057_v22 = vld [vmem:[%s15460_s7 + $0x5bc] sm:$0xf] }
 0x30c   :  { %6029 = vmatpush.bf16.msra.mxu2 %v7932_v13  ;;  %v9272_v13 = vor.u32 %v10253_v26, %v9269_v51  ;;  %5952 = vmatmul.bf16.vlgmr.msrb.gmra.mxu0 %v12875_v52  ;;  %v8828_v26 = vor.u32 %v10145_v49, %v8827_v17  ;;  %v9157_v51 = vld [vmem:[%s15460_s7 + $0xb14] sm:$0xf0]  ;;  %v8488_v40 = vor.u32 %v10057_v22, %v8485_v24  ;;  %v10208_v49 = vld [vmem:[%s15460_s7 + $0xa70] sm:$0xf0]  ;;  %v8715_v24 = vld [vmem:[%s15460_s7 + $0x780] sm:$0xf] }
 0x30d   :  { %6000 = vmatpush.bf16.msra.mxu0 %v9300_v20  ;;  %v8072_v20 = vor.u32 %v9956_v42, %v8071_v29  ;;  %v5645_v50 = vpop.f32.mrf.mxu2  ;;  %v10040_v42 = vld [vmem:[%s15460_s7 + $0x530] sm:$0xf0]  ;;  %v9079_v17 = vld [vmem:[%s15460_s7 + $0xa58] sm:$0xf] }
 0x30e   :  { %5959 = vmatpush.bf16.msrb.mxu1 %v8600_v35  ;;  %v10138_v35 = vld [vmem:[%s15460_s7 + $0x840] sm:$0xf0]  ;;  %v9080_v31 = vor.u32 %v10208_v49, %v9079_v17  ;;  %v7961_v17 = vld [vmem:[%s15460_s7 + $0x1b4] sm:$0xf0] }
 0x30f   :  { %6043 = vmatpush.bf16.msra.mxu3 %v8156_v30  ;;  %v9160_v30 = vor.u32 %v10225_v25, %v9157_v51  ;;  %v10117_v25 = vld [vmem:[%s15460_s7 + $0x798] sm:$0xf0]  ;;  %v8408_v51 = vor.u32 %v10040_v42, %v8407_v55 }
 0x310   :  { %6030 = vmatpush.bf16.msra.mxu2 %v7904_v46  ;;  %v9879_v46 = vld [vmem:[%s15460_s7 + $0x28] sm:$0xf0]  ;;  %v9925_v42 = vld [vmem:[%s15460_s7 + $0x19c] sm:$0xf] }
 0x311   :  { %6001 = vmatpush.bf16.msra.mxu0 %v9272_v13  ;;  %v7764_v60 = vor.u32 %v9879_v46, %v7763_v57  ;;  %v5631_v13 = vpop.f32.mrf.mxu1  ;;  %v8015_v57 = vld [vmem:[%s15460_s7 + $0x208] sm:$0xf]  ;;  %v9942_v46 = vld [vmem:[%s15460_s7 + $0x220] sm:$0xf0] }
 0x312   :  { %5960 = vmatpush.bf16.msrb.mxu1 %v8572_v56  ;;  %v9129_v56 = vld [vmem:[%s15460_s7 + $0xadc] sm:$0xf0]  ;;  %v8016_v0 = vor.u32 %v9942_v46, %v8015_v57  ;;  %v5673_v7 = vpop.f32.mrf.mxu0 }
 0x313   :  { %6044 = vmatpush.bf16.msra.mxu3 %v8128_v36  ;;  %v14256_v36 = vpop.f32.mrf.mxu3  ;;  %v9132_v12 = vor.u32 %v10218_v21, %v9129_v56  ;;  %v8716_v21 = vor.u32 %v10117_v25, %v8715_v24  ;;  %v10110_v56 = vld [vmem:[%s15460_s7 + $0x760] sm:$0xf0]  ;;  %v9465_v46 = vld [vmem:[%s15460_s7 + $0xd7c] sm:$0xf0]  ;;  %v10288_v24 = vld [vmem:[%s15460_s7 + $0xcf4] sm:$0xf] }
 0x314   :  { %6031 = vmatpush.bf16.msra.mxu2 %v7876_v3  ;;  %v8544_v3 = vor.u32 %v10071_v58, %v8541_v62  ;;  %v8460_v58 = vor.u32 %v10050_v43, %v8457_v33  ;;  %v10043_v62 = vld [vmem:[%s15460_s7 + $0x54c] sm:$0xf]  ;;  %v9409_v25 = vld [vmem:[%s15460_s7 + $0xd0c] sm:$0xf0] }
 0x315   :  { %6002 = vmatpush.bf16.msra.mxu0 %v9244_v6  ;;  %v8771_v6 = vld [vmem:[%s15460_s7 + $0x7f0] sm:$0xf]  ;;  %v8432_v29 = vor.u32 %v10043_v62, %v8429_v54  ;;  %v10026_v62 = vld [vmem:[%s15460_s7 + $0x4c0] sm:$0xf0]  ;;  %v9023_v54 = vld [vmem:[%s15460_s7 + $0x9e8] sm:$0xf] }
 0x316   :  { %5961 = vmatpush.bf16.msrb.mxu1 %v8544_v3 }
 0x317   :  { %6045 = vmatpush.bf16.msra.mxu3 %v8100_v10  ;;  %v8743_v10 = vld [vmem:[%s15460_s7 + $0x7b8] sm:$0xf] }
 0x318   :  { %6032 = vmatpush.bf16.msra.mxu2 %v7848_v18  ;;  %v3262_v18 = vperm.slane %v14171_v38, 0 }
 0x319   :  { %6003 = vmatpush.bf16.msra.mxu0 %v9216_v4  ;;  %v9935_v4 = vld [vmem:[%s15460_s7 + $0x1e8] sm:$0xf0] }
 0x31a   :  { %5962 = vmatpush.bf16.msrb.mxu1 %v8516_v19  ;;  %v5590_v45 = vadd.f32 %v14105_v23, %v3262_v18  ;;  %v10131_v23 = vld [vmem:[%s15460_s7 + $0x808] sm:$0xf0]  ;;  %v5592_v19 = vadd.f32 %v14182_v14, %v3262_v18  ;;  %v10309_v14 = vld [vmem:[%s15460_s7 + $0xd9c] sm:$0xf]  ;;  %v9493_v18 = vld [vmem:[%s15460_s7 + $0xdb4] sm:$0xf0] }
 0x31b   :  { %6046 = vmatpush.bf16.msra.mxu3 %v8072_v20  ;;  %v8772_v3 = vor.u32 %v10131_v23, %v8771_v6  ;;  %v8744_v20 = vor.u32 %v10124_v8, %v8743_v10  ;;  %v8351_v6 = vld [vmem:[%s15460_s7 + $0x4a8] sm:$0xf]  ;;  %v10295_v10 = vld [vmem:[%s15460_s7 + $0xd2c] sm:$0xf] }
 0x31c   :  { %6033 = vmatpush.bf16.msra.mxu2 %v7820_v2  ;;  %v8799_v2 = vld [vmem:[%s15460_s7 + $0x828] sm:$0xf]  ;;  %v5606_v43 = vadd.f32 %v14200_v59, %v5592_v19 }
 0x31d   :  { %6004 = vmatpush.bf16.msra.mxu0 %v9188_v28  ;;  %v7988_v28 = vor.u32 %v9935_v4, %v7987_v27  ;;  %v10103_v27 = vld [vmem:[%s15460_s7 + $0x728] sm:$0xf0]  ;;  %v9437_v8 = vld [vmem:[%s15460_s7 + $0xd44] sm:$0xf0] }
 0x31e   :  { %5963 = vmatpush.bf16.msrb.mxu1 %v8488_v40  ;;  %v10033_v40 = vld [vmem:[%s15460_s7 + $0x4f8] sm:$0xf0]  ;;  %v5620_v23 = vadd.f32 %v14227_v39, %v5606_v43 }
 0x31f   :  { %6047 = vmatpush.bf16.msra.mxu3 %v8044_v47  ;;  %v10201_v47 = vld [vmem:[%s15460_s7 + $0xa38] sm:$0xf0]  ;;  %v8380_v57 = vor.u32 %v10033_v40, %v8379_v32  ;;  %v8967_v32 = vld [vmem:[%s15460_s7 + $0x978] sm:$0xf]  ;;  %v7933_v40 = vld [vmem:[%s15460_s7 + $0x17c] sm:$0xf0] }
 0x320   :  { %6034 = vmatpush.bf16.msra.mxu2 %v7792_v53  ;;  %v8800_v53 = vor.u32 %v10138_v35, %v8799_v2  ;;  %v5647_v35 = vpop.f32.mrf.mxu2 }
 0x321   :  { %6005 = vmatpush.bf16.msra.mxu0 %v9160_v30  ;;  %v9051_v30 = vld [vmem:[%s15460_s7 + $0xa20] sm:$0xf] }
 0x322   :  { %5964 = vmatpush.bf16.msrb.mxu1 %v8460_v58  ;;  %v9052_v59 = vor.u32 %v10201_v47, %v9051_v30  ;;  %v9412_v47 = vor.u32 %v10288_v24, %v9409_v25 }
 0x323   :  { %6048 = vmatpush.bf16.msra.mxu3 %v8016_v0 }
 0x324   :  { %6035 = vmatpush.bf16.msra.mxu2 %v7764_v60  ;;  %v5604_v60 = vadd.f32 %v14122_v44, %v5590_v45  ;;  %v9521_v44 = vld [vmem:[%s15460_s7 + $0xdec] sm:$0xf0]  ;;  %v9496_v45 = vor.u32 %v10309_v14, %v9493_v18  ;;  %v7964_v14 = vor.u32 %v9925_v42, %v7961_v17  ;;  %v10012_v18 = vld [vmem:[%s15460_s7 + $0x450] sm:$0xf0] }
 0x325   :  { %6006 = vmatpush.bf16.msra.mxu0 %v9132_v12  ;;  %v9524_v22 = vor.u32 %v10316_v11, %v9521_v44  ;;  %v10194_v12 = vld [vmem:[%s15460_s7 + $0xa00] sm:$0xf0]  ;;  %v8323_v11 = vld [vmem:[%s15460_s7 + $0x470] sm:$0xf] }
 0x326   :  { %5965 = vmatpush.bf16.msrb.mxu1 %v8432_v29  ;;  %v10187_v29 = vld [vmem:[%s15460_s7 + $0x9c8] sm:$0xf0]  ;;  %v8211_v42 = vld [vmem:[%s15460_s7 + $0x390] sm:$0xf] }
 0x327   :  { %6036 = vmatmul.bf16.vlgmr.msra.gmra.mxu2 %v12776_v37  ;;  %6049 = vmatpush.bf16.msra.mxu3 %v7988_v28  ;;  %v9440_v28 = vor.u32 %v10295_v10, %v9437_v8  ;;  %v10166_v10 = vld [vmem:[%s15460_s7 + $0x920] sm:$0xf0] }
 0x328   :  { %6084 = vmatpush.bf16.msrb.mxu2 %v8856_v48  ;;  %v5618_v48 = vadd.f32 %v14151_v63, %v5604_v60  ;;  %v9104_v63 = vor.u32 %v10211_v1, %v9101_v34  ;;  %v8659_v34 = vld [vmem:[%s15460_s7 + $0x710] sm:$0xf]  ;;  %v8352_v60 = vor.u32 %v10026_v62, %v8351_v6  ;;  %v14389_v19 = vpop.f32.mrf.mxu2  ;;  %v8939_v6 = vld [vmem:[%s15460_s7 + $0x940] sm:$0xf]  ;;  %v9911_v62 = vld [vmem:[%s15460_s7 + $0x12c] sm:$0xf] }
 0x329   :  { %5966 = vmatmul.bf16.vlgmr.msrb.gmra.mxu1 %v12854_v5 }
 0x32a   :  { %v5632_v2 = vadd.f32 %v5631_v13, %v5618_v48  ;;  %6007 = vmatpush.bf16.msra.mxu0 %v9104_v63  ;;  %v5661_v13 = vpop.f32.mrf.mxu3  ;;  %6014 = vmatpush.bf16.msra.mxu1 %v9524_v22  ;;  %v10019_v48 = vld [vmem:[%s15460_s7 + $0x488] sm:$0xf0]  ;;  %v8660_v63 = vor.u32 %v10103_v27, %v8659_v34  ;;  %v8239_v34 = vld [vmem:[%s15460_s7 + $0x3c8] sm:$0xf] }
 0x32b   :  { %6098 = vmatpush.bf16.msrb.mxu3 %v9080_v31 }
 0x32c   :  { %6085 = vmatpush.bf16.msrb.mxu2 %v8828_v26  ;;  %v5633_v26 = vpop.f32.mrf.mxu1  ;;  %v5646_v33 = vadd.f32 %v5645_v50, %v5632_v2  ;;  %v10302_v50 = vld [vmem:[%s15460_s7 + $0xd64] sm:$0xf]  ;;  %6050 = vmatmul.bf16.vlgmr.msra.gmra.mxu3 %v12745_v15  ;;  %v10180_v2 = vld [vmem:[%s15460_s7 + $0x990] sm:$0xf0] }
 0x32d   :  { %6008 = vmatmul.bf16.vlgmr.msra.gmra.mxu0 %v13345_v41  ;;  %v9468_v1 = vor.u32 %v10302_v50, %v9465_v46  ;;  %v5634_v44 = vadd.f32 %v5633_v26, %v5620_v23  ;;  %v8295_v26 = vld [vmem:[%s15460_s7 + $0x438] sm:$0xf]  ;;  %v10005_v46 = vld [vmem:[%s15460_s7 + $0x418] sm:$0xf0] }
 0x32e   :  { %6056 = vmatpush.bf16.msrb.mxu0 %v8408_v51  ;;  %v5660_v58 = vadd.f32 %v14256_v36, %v5646_v33  ;;  %v5675_v36 = vpop.f32.mrf.mxu0  ;;  %6015 = vmatpush.bf16.msra.mxu1 %v9496_v45  ;;  %v8296_v43 = vor.u32 %v10012_v18, %v8295_v26  ;;  %v8968_v33 = vor.u32 %v10180_v2, %v8967_v32  ;;  %v9381_v45 = vld [vmem:[%s15460_s7 + $0xcd4] sm:$0xf0]  ;;  %v10173_v23 = vld [vmem:[%s15460_s7 + $0x958] sm:$0xf0]  ;;  %v10096_v18 = vld [vmem:[%s15460_s7 + $0x6f0] sm:$0xf0] }
 0x32f   :  { %6099 = vmatpush.bf16.msrb.mxu3 %v9052_v59  ;;  %v5648_v49 = vadd.f32 %v5647_v35, %v5634_v44  ;;  %v9918_v35 = vld [vmem:[%s15460_s7 + $0x164] sm:$0xf]  ;;  %v7877_v44 = vld [vmem:[%s15460_s7 + $0x10c] sm:$0xf0]  ;;  %v9897_v26 = vld [vmem:[%s15460_s7 + $0xbc] sm:$0xf] }
 0x330   :  { %6086 = vmatpush.bf16.msrb.mxu2 %v8800_v53  ;;  %v8687_v53 = vld [vmem:[%s15460_s7 + $0x748] sm:$0xf]  ;;  %v5674_v39 = vadd.f32 %v5673_v7, %v5660_v58  ;;  %v8995_v7 = vld [vmem:[%s15460_s7 + $0x9b0] sm:$0xf]  ;;  %v7936_v59 = vor.u32 %v9918_v35, %v7933_v40  ;;  %v3263_v58 = vperm.slane %v14171_v38, 1  ;;  %v5703_v27 = vpop.f32.mrf.mxu2 }
 0x331   :  { %v8688_v0 = vor.u32 %v10110_v56, %v8687_v53  ;;  %v8996_v22 = vor.u32 %v10187_v29, %v8995_v7  ;;  %v5662_v51 = vadd.f32 %v5661_v13, %v5648_v49  ;;  %v8267_v53 = vld [vmem:[%s15460_s7 + $0x400] sm:$0xf]  ;;  %v10267_v7 = vld [vmem:[%s15460_s7 + $0xc4c] sm:$0xf]  ;;  %v9325_v29 = vld [vmem:[%s15460_s7 + $0xc64] sm:$0xf0] }
 0x332   :  { %6057 = vmatpush.bf16.msrb.mxu0 %v8380_v57  ;;  %6016 = vmatpush.bf16.msra.mxu1 %v9468_v1  ;;  %v5715_v31 = vpop.f32.mrf.mxu3  ;;  %v9353_v1 = vld [vmem:[%s15460_s7 + $0xc9c] sm:$0xf0]  ;;  %v5702_v8 = vadd.f32 %v14389_v19, %v3263_v58  ;;  %v9303_v32 = vld [vmem:[%s15460_s7 + $0xc18] sm:$0xf]  ;;  %v9328_v35 = vor.u32 %v10267_v7, %v9325_v29  ;;  %v10264_v40 = vld [vmem:[%s15460_s7 + $0xc30] sm:$0xf0] }
 0x333   :  { %v5676_v30 = vadd.f32 %v5675_v36, %v5662_v51  ;;  %v8940_v36 = vor.u32 %v10173_v23, %v8939_v6  ;;  %v7849_v51 = vld [vmem:[%s15460_s7 + $0xd4] sm:$0xf0]  ;;  %v8603_v6 = vld [vmem:[%s15460_s7 + $0x6a0] sm:$0xf]  ;;  %v10089_v23 = vld [vmem:[%s15460_s7 + $0x6b8] sm:$0xf0] }
 0x334   :  { %6087 = vmatpush.bf16.msrb.mxu2 %v8772_v3  ;;  %v9024_v3 = vor.u32 %v10194_v12, %v9023_v54  ;;  %v5687_v4 = vpop.f32.mrf.mxu1  ;;  %v7905_v54 = vld [vmem:[%s15460_s7 + $0x144] sm:$0xf0]  ;;  %v5716_v17 = vadd.f32 %v5715_v31, %v5702_v8  ;;  %v8631_v31 = vld [vmem:[%s15460_s7 + $0x6d8] sm:$0xf]  ;;  %v9967_v7 = vld [vmem:[%s15460_s7 + $0x2ec] sm:$0xf] }
 0x335   :  { %v5688_v55 = vadd.f32 %v5687_v4, %v5674_v39  ;;  %v8268_v39 = vor.u32 %v10005_v46, %v8267_v53  ;;  %v8911_v4 = vld [vmem:[%s15460_s7 + $0x908] sm:$0xf]  ;;  %v8632_v53 = vor.u32 %v10096_v18, %v8631_v31  ;;  %v9960_v18 = vld [vmem:[%s15460_s7 + $0x2b4] sm:$0xf] }
 0x336   :  { %6058 = vmatpush.bf16.msrb.mxu0 %v8352_v60  ;;  %6100 = vmatpush.bf16.msrb.mxu3 %v9024_v3  ;;  %v5729_v57 = vpop.f32.mrf.mxu0  ;;  %v7908_v60 = vor.u32 %v9911_v62, %v7905_v54  ;;  %v9998_v3 = vld [vmem:[%s15460_s7 + $0x3e0] sm:$0xf0]  ;;  %v8912_v19 = vor.u32 %v10166_v10, %v8911_v4  ;;  %v9275_v62 = vld [vmem:[%s15460_s7 + $0xbe0] sm:$0xf]  ;;  %v10257_v54 = vld [vmem:[%s15460_s7 + $0xbf8] sm:$0xf0] }
 0x337   :  { %10322 = vtanh.f32 %v5688_v55  ;;  %6017 = vmatpush.bf16.msra.mxu1 %v9440_v28  ;;  %v8240_v49 = vor.u32 %v9998_v3, %v8239_v34  ;;  %v9991_v28 = vld [vmem:[%s15460_s7 + $0x3a8] sm:$0xf0]  ;;  %v7793_v3 = vld [vmem:[%s15460_s7 + $0x64] sm:$0xf0]  ;;  %v9276_v10 = vor.u32 %v10257_v54, %v9275_v62  ;;  %v10142_v62 = vld [vmem:[%s15460_s7 + $0x864] sm:$0xf] }
 0x338   :  { %6088 = vmatpush.bf16.msrb.mxu2 %v8744_v20  ;;  %v8324_v20 = vor.u32 %v10019_v48, %v8323_v11  ;;  %v9904_v11 = vld [vmem:[%s15460_s7 + $0xf4] sm:$0xf]  ;;  %v8129_v29 = vld [vmem:[%s15460_s7 + $0x304] sm:$0xf0]  ;;  %v8829_v54 = vld [vmem:[%s15460_s7 + $0x87c] sm:$0xf0] }
 0x339   :  { %v7880_v25 = vor.u32 %v9904_v11, %v7877_v44  ;;  %v8575_v11 = vld [vmem:[%s15460_s7 + $0x668] sm:$0xf]  ;;  %v10082_v44 = vld [vmem:[%s15460_s7 + $0x680] sm:$0xf0] }
 0x33a   :  { %6059 = vmatpush.bf16.msrb.mxu0 %v8324_v20  ;;  %6101 = vmatpush.bf16.msrb.mxu3 %v8996_v22  ;;  %v5717_v55 = vpop.f32.mrf.mxu3  ;;  %v8883_v20 = vld [vmem:[%s15460_s7 + $0x8d0] sm:$0xf]  ;;  %v10159_v22 = vld [vmem:[%s15460_s7 + $0x8e8] sm:$0xf0] }
 0x33b   :  { %6018 = vmatpush.bf16.msra.mxu1 %v9412_v47  ;;  %v8185_v47 = vld [vmem:[%s15460_s7 + $0x374] sm:$0xf0] }
 0x33c   :  { %6089 = vmatpush.bf16.msrb.mxu2 %v8716_v21  ;;  %v5689_v13 = vpop.f32.mrf.mxu1  ;;  %v10281_v21 = vld [vmem:[%s15460_s7 + $0xcbc] sm:$0xf] }
 0x33d   :  { %v10323_v56 = vpop.eup %10322  ;;  %v5690_v50 = vadd.f32 %v5689_v13, %v5676_v30  ;;  %v9384_v12 = vor.u32 %v10281_v21, %v9381_v45  ;;  %v9981_v30 = vld [vmem:[%s15460_s7 + $0x35c] sm:$0xf]  ;;  %v8884_v13 = vor.u32 %v10159_v22, %v8883_v20  ;;  %v5757_v21 = vpop.f32.mrf.mxu2  ;;  %v7852_v45 = vor.u32 %v9897_v26, %v7849_v51  ;;  %v7765_v20 = vld [vmem:[%s15460_s7 + $0x2c] sm:$0xf0]  ;;  %v10075_v26 = vld [vmem:[%s15460_s7 + $0x648] sm:$0xf0] }
 0x33e   :  { %6378 = vst [vmem:[%s15463_s9] sm:$0xff] %v10323_v56  ;;  %6060 = vmatpush.bf16.msrb.mxu0 %v8296_v43  ;;  %6102 = vmatpush.bf16.msrb.mxu3 %v8968_v33  ;;  %v5731_v2 = vpop.f32.mrf.mxu0  ;;  %v8212_v33 = vor.u32 %v9991_v28, %v8211_v42  ;;  %v9890_v56 = vld [vmem:[%s15460_s7 + $0x84] sm:$0xf]  ;;  %v8188_v46 = vor.u32 %v9981_v30, %v8185_v47  ;;  %v9876_v28 = vld [vmem:[%s15460_s7 + $0x14] sm:$0xf]  ;;  %v9219_v51 = vld [vmem:[%s15460_s7 + $0xb70] sm:$0xf] }
 0x33f   :  { %10324 = vtanh.f32 %v5690_v50  ;;  %6019 = vmatpush.bf16.msra.mxu1 %v9384_v12  ;;  %v9304_v50 = vor.u32 %v10264_v40, %v9303_v32  ;;  %v8157_v12 = vld [vmem:[%s15460_s7 + $0x33c] sm:$0xf0]  ;;  %v8101_v32 = vld [vmem:[%s15460_s7 + $0x2cc] sm:$0xf0]  ;;  %v10149_v40 = vld [vmem:[%s15460_s7 + $0x89c] sm:$0xf]  ;;  %v7768_v47 = vor.u32 %v9876_v28, %v7765_v20 }
 0x340   :  { %6090 = vmatpush.bf16.msrb.mxu2 %v8688_v0  ;;  %v10274_v0 = vld [vmem:[%s15460_s7 + $0xc84] sm:$0xf]  ;;  %v8857_v30 = vld [vmem:[%s15460_s7 + $0x8b4] sm:$0xf0] }
 0x341   :  { %v9356_v48 = vor.u32 %v10274_v0, %v9353_v1  ;;  %v10222_v28 = vld [vmem:[%s15460_s7 + $0xae0] sm:$0xf0] }
 0x342   :  { %6061 = vmatpush.bf16.msrb.mxu0 %v8268_v39  ;;  %6103 = vmatpush.bf16.msrb.mxu3 %v8940_v36  ;;  %v5771_v1 = vpop.f32.mrf.mxu3 }
 0x343   :  { %6020 = vmatpush.bf16.msra.mxu1 %v9356_v48  ;;  %v10250_v48 = vld [vmem:[%s15460_s7 + $0xbc0] sm:$0xf0] }
 0x344   :  { %6091 = vmatpush.bf16.msrb.mxu2 %v8660_v63  ;;  %v5743_v63 = vpop.f32.mrf.mxu1 }
 0x345   :  { %v10325_v24 = vpop.eup %10324  ;;  %v5759_v31 = vpop.f32.mrf.mxu2 }
 0x346   :  { %6386 = vst [vmem:[%s15463_s9 + $0x38] sm:$0xff] %v10325_v24  ;;  %6062 = vmatpush.bf16.msrb.mxu0 %v8240_v49  ;;  %6104 = vmatpush.bf16.msrb.mxu3 %v8912_v19  ;;  %v5785_v49 = vpop.f32.mrf.mxu0  ;;  %v8132_v24 = vor.u32 %v9967_v7, %v8129_v29  ;;  %v8463_v7 = vld [vmem:[%s15460_s7 + $0x588] sm:$0xf] }
 0x347   :  { %6092 = vmatmul.bf16.vlgmr.msrb.gmra.mxu2 %v13011_v9  ;;  %6021 = vmatpush.bf16.msra.mxu1 %v9328_v35 }
 0x348   :  { %6140 = vmatpush.bf16.msra.mxu2 %v7964_v14  ;;  %v5730_v14 = vadd.f32 %v5729_v57, %v5716_v17  ;;  %v7821_v57 = vld [vmem:[%s15460_s7 + $0x9c] sm:$0xf0] }
 0x349   :  { %v7824_v34 = vor.u32 %v9890_v56, %v7821_v57  ;;  %v10068_v56 = vld [vmem:[%s15460_s7 + $0x610] sm:$0xf0]  ;;  %v9191_v57 = vld [vmem:[%s15460_s7 + $0xb38] sm:$0xf] }
 0x34a   :  { %v5744_v43 = vadd.f32 %v5743_v63, %v5730_v14  ;;  %6063 = vmatpush.bf16.msrb.mxu0 %v8212_v33  ;;  %6105 = vmatpush.bf16.msrb.mxu3 %v8884_v13  ;;  %v8576_v63 = vor.u32 %v10082_v44, %v8575_v11  ;;  %v10243_v14 = vld [vmem:[%s15460_s7 + $0xb88] sm:$0xf0]  ;;  %v8801_v44 = vld [vmem:[%s15460_s7 + $0x844] sm:$0xf0] }
 0x34b   :  { %6070 = vmatpush.bf16.msrb.mxu1 %v8632_v53  ;;  %v8519_v53 = vld [vmem:[%s15460_s7 + $0x5f8] sm:$0xf]  ;;  %v10135_v11 = vld [vmem:[%s15460_s7 + $0x82c] sm:$0xf] }
 0x34c   :  { %6141 = vmatpush.bf16.msra.mxu2 %v7936_v59  ;;  %v5704_v59 = vadd.f32 %v5703_v27, %v3263_v58  ;;  %v9974_v58 = vld [vmem:[%s15460_s7 + $0x324] sm:$0xf]  ;;  %v5758_v36 = vadd.f32 %v5757_v21, %v5744_v43  ;;  %v5745_v0 = vpop.f32.mrf.mxu1  ;;  %v8604_v27 = vor.u32 %v10089_v23, %v8603_v6  ;;  %6022 = vmatmul.bf16.vlgmr.msra.gmra.mxu1 %v13496_v16  ;;  %v9953_v6 = vld [vmem:[%s15460_s7 + $0x27c] sm:$0xf]  ;;  %v8073_v23 = vld [vmem:[%s15460_s7 + $0x294] sm:$0xf0] }
 0x34d   :  { %v8160_v8 = vor.u32 %v9974_v58, %v8157_v12  ;;  %6064 = vmatmul.bf16.vlgmr.msrb.gmra.mxu0 %v12875_v52  ;;  %6106 = vmatmul.bf16.vlgmr.msrb.gmra.mxu3 %v13181_v61  ;;  %v9220_v21 = vor.u32 %v10243_v14, %v9219_v51  ;;  %v8520_v12 = vor.u32 %v10068_v56, %v8519_v53  ;;  %v10047_v14 = vld [vmem:[%s15460_s7 + $0x568] sm:$0xf0]  ;;  %v8409_v56 = vld [vmem:[%s15460_s7 + $0x534] sm:$0xf0] }
 0x34e   :  { %v5718_v39 = vadd.f32 %v5717_v55, %v5704_v59  ;;  %6112 = vmatpush.bf16.msra.mxu0 %v9304_v50  ;;  %6154 = vmatpush.bf16.msra.mxu3 %v8188_v46  ;;  %v9247_v55 = vld [vmem:[%s15460_s7 + $0xba8] sm:$0xf]  ;;  %v5772_v17 = vadd.f32 %v5771_v1, %v5758_v36  ;;  %v5773_v59 = vpop.f32.mrf.mxu3  ;;  %v8860_v50 = vor.u32 %v10149_v40, %v8857_v30  ;;  %v10236_v46 = vld [vmem:[%s15460_s7 + $0xb50] sm:$0xf0]  ;;  %v10061_v1 = vld [vmem:[%s15460_s7 + $0x5d8] sm:$0xf0] }
 0x34f   :  { %6071 = vmatpush.bf16.msrb.mxu1 %v8604_v27  ;;  %v9248_v22 = vor.u32 %v10250_v48, %v9247_v55  ;;  %v8076_v36 = vor.u32 %v9953_v6, %v8073_v23  ;;  %v5787_v27 = vpop.f32.mrf.mxu0  ;;  %v8804_v20 = vor.u32 %v10135_v11, %v8801_v44  ;;  %v9932_v40 = vld [vmem:[%s15460_s7 + $0x1d4] sm:$0xf] }
 0x350   :  { %6142 = vmatpush.bf16.msra.mxu2 %v7908_v60  ;;  %v9883_v60 = vld [vmem:[%s15460_s7 + $0x4c] sm:$0xf]  ;;  %v5732_v4 = vadd.f32 %v5731_v2, %v5718_v39  ;;  %v5786_v35 = vadd.f32 %v5785_v49, %v5772_v17  ;;  %v9192_v39 = vor.u32 %v10236_v46, %v9191_v57  ;;  %v10205_v57 = vld [vmem:[%s15460_s7 + $0xa5c] sm:$0xf] }
 0x351   :  { %v7796_v19 = vor.u32 %v9883_v60, %v7793_v3  ;;  %v8832_v60 = vor.u32 %v10142_v62, %v8829_v54  ;;  %v10229_v3 = vld [vmem:[%s15460_s7 + $0xb18] sm:$0xf0]  ;;  %v10114_v54 = vld [vmem:[%s15460_s7 + $0x784] sm:$0xf] }
 0x352   :  { %v5746_v42 = vadd.f32 %v5745_v0, %v5732_v4  ;;  %6113 = vmatpush.bf16.msra.mxu0 %v9276_v10  ;;  %6155 = vmatpush.bf16.msra.mxu3 %v8160_v8  ;;  %v8491_v0 = vld [vmem:[%s15460_s7 + $0x5c0] sm:$0xf]  ;;  %v9946_v4 = vld [vmem:[%s15460_s7 + $0x244] sm:$0xf] }
 0x353   :  { %6072 = vmatpush.bf16.msrb.mxu1 %v8576_v63  ;;  %v8045_v10 = vld [vmem:[%s15460_s7 + $0x25c] sm:$0xf0]  ;;  %v8492_v48 = vor.u32 %v10061_v1, %v8491_v0  ;;  %v9135_v63 = vld [vmem:[%s15460_s7 + $0xac8] sm:$0xf]  ;;  %v10313_v0 = vld [vmem:[%s15460_s7 + $0xdb8] sm:$0xf0] }
 0x354   :  { %6143 = vmatpush.bf16.msra.mxu2 %v7880_v25  ;;  %v8547_v25 = vld [vmem:[%s15460_s7 + $0x630] sm:$0xf]  ;;  %v5760_v2 = vadd.f32 %v5759_v31, %v5746_v42  ;;  %v5799_v43 = vpop.f32.mrf.mxu1  ;;  %v8048_v49 = vor.u32 %v9946_v4, %v8045_v10  ;;  %v10030_v1 = vld [vmem:[%s15460_s7 + $0x4e4] sm:$0xf]  ;;  %v10107_v10 = vld [vmem:[%s15460_s7 + $0x74c] sm:$0xf] }
 0x355   :  { %v8548_v33 = vor.u32 %v10075_v26, %v8547_v25  ;;  %v5800_v13 = vadd.f32 %v5799_v43, %v5786_v35  ;;  %v10128_v25 = vld [vmem:[%s15460_s7 + $0x7f4] sm:$0xf]  ;;  %v8773_v26 = vld [vmem:[%s15460_s7 + $0x80c] sm:$0xf0]  ;;  %v10215_v35 = vld [vmem:[%s15460_s7 + $0xaa8] sm:$0xf0] }
 0x356   :  { %6114 = vmatpush.bf16.msra.mxu0 %v9248_v22  ;;  %6156 = vmatpush.bf16.msra.mxu3 %v8132_v24  ;;  %v5774_v58 = vadd.f32 %v5773_v59, %v5760_v2  ;;  %v9939_v22 = vld [vmem:[%s15460_s7 + $0x20c] sm:$0xf]  ;;  %v8017_v24 = vld [vmem:[%s15460_s7 + $0x224] sm:$0xf0]  ;;  %v8435_v31 = vld [vmem:[%s15460_s7 + $0x550] sm:$0xf]  ;;  %v8776_v30 = vor.u32 %v10128_v25, %v8773_v26 }
 0x357   :  { %10326 = vtanh.f32 %v5800_v13  ;;  %6073 = vmatpush.bf16.msrb.mxu1 %v8548_v33  ;;  %v9107_v2 = vld [vmem:[%s15460_s7 + $0xa90] sm:$0xf]  ;;  %v10121_v43 = vld [vmem:[%s15460_s7 + $0x7bc] sm:$0xf]  ;;  %v8745_v33 = vld [vmem:[%s15460_s7 + $0x7d4] sm:$0xf0]  ;;  %v8436_v53 = vor.u32 %v10047_v14, %v8435_v31 }
 0x358   :  { %6144 = vmatpush.bf16.msra.mxu2 %v7852_v45  ;;  %v8104_v45 = vor.u32 %v9960_v18, %v8101_v32  ;;  %v5788_v8 = vadd.f32 %v5787_v27, %v5774_v58  ;;  %v9136_v18 = vor.u32 %v10222_v28, %v9135_v63  ;;  %v8020_v32 = vor.u32 %v9939_v22, %v8017_v24  ;;  %v9527_v13 = vld [vmem:[%s15460_s7 + $0xdd8] sm:$0xf]  ;;  %v8717_v58 = vld [vmem:[%s15460_s7 + $0x79c] sm:$0xf0]  ;;  %v10198_v27 = vld [vmem:[%s15460_s7 + $0xa24] sm:$0xf] }
 0x359   :  { %v9081_v59 = vld [vmem:[%s15460_s7 + $0xa74] sm:$0xf0]  ;;  %v9108_v46 = vor.u32 %v10215_v35, %v9107_v2  ;;  %v8748_v23 = vor.u32 %v10121_v43, %v8745_v33  ;;  %v10100_v63 = vld [vmem:[%s15460_s7 + $0x714] sm:$0xf]  ;;  %v8661_v28 = vld [vmem:[%s15460_s7 + $0x72c] sm:$0xf0] }
 0x35a   :  { %6115 = vmatpush.bf16.msra.mxu0 %v9220_v21  ;;  %6157 = vmatpush.bf16.msra.mxu3 %v8104_v45  ;;  %v10320_v21 = vld [vmem:[%s15460_s7 + $0xdf0] sm:$0xf0]  ;;  %v10037_v45 = vld [vmem:[%s15460_s7 + $0x51c] sm:$0xf]  ;;  %v9443_v24 = vld [vmem:[%s15460_s7 + $0xd30] sm:$0xf]  ;;  %v8664_v35 = vor.u32 %v10100_v63, %v8661_v28 }
 0x35b   :  { %6074 = vmatpush.bf16.msrb.mxu1 %v8520_v12  ;;  %v9528_v62 = vor.u32 %v10320_v21, %v9527_v13  ;;  %v8412_v12 = vor.u32 %v10037_v45, %v8409_v56  ;;  %v10299_v25 = vld [vmem:[%s15460_s7 + $0xd48] sm:$0xf0]  ;;  %v10016_v26 = vld [vmem:[%s15460_s7 + $0x474] sm:$0xf]  ;;  %v8997_v14 = vld [vmem:[%s15460_s7 + $0x9cc] sm:$0xf0] }
 0x35c   :  { %6145 = vmatpush.bf16.msra.mxu2 %v7824_v34  ;;  %v9163_v34 = vld [vmem:[%s15460_s7 + $0xb00] sm:$0xf]  ;;  %v5801_v55 = vpop.f32.mrf.mxu1  ;;  %v10184_v31 = vld [vmem:[%s15460_s7 + $0x9b4] sm:$0xf]  ;;  %v9929_v2 = vld [vmem:[%s15460_s7 + $0x1b8] sm:$0xf0] }
 0x35d   :  { %v10327_v29 = vpop.eup %10326  ;;  %v5802_v42 = vadd.f32 %v5801_v55, %v5788_v8  ;;  %v9164_v17 = vor.u32 %v10229_v3, %v9163_v34  ;;  %v8381_v34 = vld [vmem:[%s15460_s7 + $0x4fc] sm:$0xf0]  ;;  %v8720_v3 = vor.u32 %v10114_v54, %v8717_v58  ;;  %v8689_v8 = vld [vmem:[%s15460_s7 + $0x764] sm:$0xf0]  ;;  %v9415_v43 = vld [vmem:[%s15460_s7 + $0xcf8] sm:$0xf] }
 0x35e   :  { %6116 = vmatpush.bf16.msra.mxu0 %v9192_v39  ;;  %6158 = vmatpush.bf16.msra.mxu3 %v8076_v36  ;;  %6379 = vst [vmem:[%s15463_s9 + $0x8] sm:$0xff] %v10327_v29  ;;  %v9084_v39 = vor.u32 %v10205_v57, %v9081_v59  ;;  %v9499_v36 = vld [vmem:[%s15460_s7 + $0xda0] sm:$0xf]  ;;  %v8384_v11 = vor.u32 %v10030_v1, %v8381_v34  ;;  %v9471_v55 = vld [vmem:[%s15460_s7 + $0xd68] sm:$0xf]  ;;  %v5827_v57 = vpop.f32.mrf.mxu3  ;;  %v5841_v34 = vpop.f32.mrf.mxu0 }
 0x35f   :  { %10328 = vtanh.f32 %v5802_v42  ;;  %6075 = vmatpush.bf16.msrb.mxu1 %v8492_v48  ;;  %v9500_v4 = vor.u32 %v10313_v0, %v9499_v36  ;;  %v10306_v48 = vld [vmem:[%s15460_s7 + $0xd80] sm:$0xf0]  ;;  %v8353_v29 = vld [vmem:[%s15460_s7 + $0x4c4] sm:$0xf0]  ;;  %v10191_v42 = vld [vmem:[%s15460_s7 + $0x9ec] sm:$0xf] }
 0x360   :  { %6146 = vmatpush.bf16.msra.mxu2 %v7796_v19  ;;  %v10054_v19 = vld [vmem:[%s15460_s7 + $0x5a0] sm:$0xf0]  ;;  %v10292_v33 = vld [vmem:[%s15460_s7 + $0xd10] sm:$0xf0]  ;;  %v10009_v13 = vld [vmem:[%s15460_s7 + $0x43c] sm:$0xf] }
 0x361   :  { %v8464_v51 = vor.u32 %v10054_v19, %v8463_v7  ;;  %v10023_v7 = vld [vmem:[%s15460_s7 + $0x4ac] sm:$0xf]  ;;  %v9472_v19 = vor.u32 %v10306_v48, %v9471_v55  ;;  %v8297_v45 = vld [vmem:[%s15460_s7 + $0x454] sm:$0xf0]  ;;  %v7939_v59 = vld [vmem:[%s15460_s7 + $0x168] sm:$0xf] }
 0x362   :  { %6117 = vmatpush.bf16.msra.mxu0 %v9164_v17  ;;  %6159 = vmatpush.bf16.msra.mxu3 %v8048_v49  ;;  %v9025_v17 = vld [vmem:[%s15460_s7 + $0xa04] sm:$0xf0]  ;;  %v8692_v49 = vor.u32 %v10107_v10, %v8689_v8  ;;  %v8969_v56 = vld [vmem:[%s15460_s7 + $0x994] sm:$0xf0]  ;;  %v9387_v54 = vld [vmem:[%s15460_s7 + $0xcc0] sm:$0xf] }
 0x363   :  { %6076 = vmatpush.bf16.msrb.mxu1 %v8464_v51  ;;  %v9028_v22 = vor.u32 %v10191_v42, %v9025_v17  ;;  %v8325_v51 = vld [vmem:[%s15460_s7 + $0x48c] sm:$0xf0]  ;;  %v10285_v58 = vld [vmem:[%s15460_s7 + $0xcd8] sm:$0xf0]  ;;  %v8269_v36 = vld [vmem:[%s15460_s7 + $0x41c] sm:$0xf0] }
 0x364   :  { %6147 = vmatpush.bf16.msra.mxu2 %v7768_v47  ;;  %v7989_v47 = vld [vmem:[%s15460_s7 + $0x1ec] sm:$0xf0]  ;;  %v10170_v0 = vld [vmem:[%s15460_s7 + $0x944] sm:$0xf]  ;;  %v8941_v1 = vld [vmem:[%s15460_s7 + $0x95c] sm:$0xf0] }
 0x365   :  { %v7992_v6 = vor.u32 %v9932_v40, %v7989_v47  ;;  %v9444_v40 = vor.u32 %v10299_v25, %v9443_v24  ;;  %v9000_v47 = vor.u32 %v10184_v31, %v8997_v14  ;;  %v8944_v8 = vor.u32 %v10170_v0, %v8941_v1  ;;  %v9995_v55 = vld [vmem:[%s15460_s7 + $0x3cc] sm:$0xf]  ;;  %v8913_v17 = vld [vmem:[%s15460_s7 + $0x924] sm:$0xf0]  ;;  %v9908_v63 = vld [vmem:[%s15460_s7 + $0x110] sm:$0xf0] }
 0x366   :  { %6118 = vmatpush.bf16.msra.mxu0 %v9136_v18  ;;  %6160 = vmatpush.bf16.msra.mxu3 %v8020_v32  ;;  %v5813_v18 = vpop.f32.mrf.mxu2  ;;  %v7967_v32 = vld [vmem:[%s15460_s7 + $0x1a0] sm:$0xf]  ;;  %v10163_v42 = vld [vmem:[%s15460_s7 + $0x90c] sm:$0xf]  ;;  %v5829_v25 = vpop.f32.mrf.mxu3  ;;  %v9988_v31 = vld [vmem:[%s15460_s7 + $0x394] sm:$0xf] }
 0x367   :  { %6148 = vmatmul.bf16.vlgmr.msra.gmra.mxu2 %v12776_v37  ;;  %6077 = vmatpush.bf16.msrb.mxu1 %v8436_v53  ;;  %v7968_v21 = vor.u32 %v9929_v2, %v7967_v32  ;;  %v10177_v53 = vld [vmem:[%s15460_s7 + $0x97c] sm:$0xf]  ;;  %v10271_v24 = vld [vmem:[%s15460_s7 + $0xc68] sm:$0xf0]  ;;  %v8213_v14 = vld [vmem:[%s15460_s7 + $0x3ac] sm:$0xf0] }
 0x368   :  { %6196 = vmatpush.bf16.msrb.mxu2 %v8860_v50  ;;  %v10329_v50 = vpop.eup %10328  ;;  %v10086_v0 = vld [vmem:[%s15460_s7 + $0x6a4] sm:$0xf] }
 0x369   :  { %6387 = vst [vmem:[%s15463_s9 + $0x40] sm:$0xff] %v10329_v50  ;;  %v9922_v50 = vld [vmem:[%s15460_s7 + $0x180] sm:$0xf0] }
 0x36a   :  { %6119 = vmatpush.bf16.msra.mxu0 %v9108_v46  ;;  %6161 = vmatpush.bf16.msra.mxu3 %v7992_v6  ;;  %v3264_v46 = vperm.slane %v14171_v38, 2  ;;  %v9416_v6 = vor.u32 %v10292_v33, %v9415_v43  ;;  %v8633_v43 = vld [vmem:[%s15460_s7 + $0x6f4] sm:$0xf0]  ;;  %v10261_v33 = vld [vmem:[%s15460_s7 + $0xc1c] sm:$0xf] }
 0x36b   :  { %6126 = vmatpush.bf16.msra.mxu1 %v9528_v62  ;;  %v8972_v62 = vor.u32 %v10177_v53, %v8969_v56  ;;  %v8191_v53 = vld [vmem:[%s15460_s7 + $0x360] sm:$0xf]  ;;  %v9985_v56 = vld [vmem:[%s15460_s7 + $0x378] sm:$0xf0] }
 0x36c   :  { %6197 = vmatpush.bf16.msrb.mxu2 %v8832_v60  ;;  %v9053_v60 = vld [vmem:[%s15460_s7 + $0xa3c] sm:$0xf0]  ;;  %6078 = vmatmul.bf16.vlgmr.msrb.gmra.mxu1 %v12854_v5  ;;  %v5814_v48 = vadd.f32 %v5813_v18, %v3264_v46  ;;  %v10156_v18 = vld [vmem:[%s15460_s7 + $0x8d4] sm:$0xf] }
 0x36d   :  { %v9056_v44 = vor.u32 %v10198_v27, %v9053_v60  ;;  %6120 = vmatmul.bf16.vlgmr.msra.gmra.mxu0 %v13345_v41  ;;  %6162 = vmatmul.bf16.vlgmr.msra.gmra.mxu3 %v12745_v15  ;;  %v7911_v27 = vld [vmem:[%s15460_s7 + $0x130] sm:$0xf]  ;;  %v9915_v60 = vld [vmem:[%s15460_s7 + $0x148] sm:$0xf0]  ;;  %v8605_v38 = vld [vmem:[%s15460_s7 + $0x6bc] sm:$0xf0] }
 0x36e   :  { %6168 = vmatpush.bf16.msrb.mxu0 %v8412_v12  ;;  %6210 = vmatpush.bf16.msrb.mxu3 %v9084_v39  ;;  %v10002_v12 = vld [vmem:[%s15460_s7 + $0x404] sm:$0xf]  ;;  %v7940_v39 = vor.u32 %v9922_v50, %v7939_v59  ;;  %v5828_v28 = vadd.f32 %v5827_v57, %v5814_v48  ;;  %v5843_v59 = vpop.f32.mrf.mxu0  ;;  %v8216_v50 = vor.u32 %v9988_v31, %v8213_v14  ;;  %v9887_v48 = vld [vmem:[%s15460_s7 + $0x68] sm:$0xf0]  ;;  %v9880_v31 = vld [vmem:[%s15460_s7 + $0x30] sm:$0xf0] }
 0x36f   :  { %6127 = vmatpush.bf16.msra.mxu1 %v9500_v4  ;;  %v5815_v4 = vpop.f32.mrf.mxu2  ;;  %v8272_v10 = vor.u32 %v10002_v12, %v8269_v36  ;;  %v9894_v12 = vld [vmem:[%s15460_s7 + $0xa0] sm:$0xf0]  ;;  %v8192_v36 = vor.u32 %v9985_v56, %v8191_v53  ;;  %v10153_v53 = vld [vmem:[%s15460_s7 + $0x8b8] sm:$0xf0] }
 0x370   :  { %6198 = vmatpush.bf16.msrb.mxu2 %v8804_v20  ;;  %v8356_v20 = vor.u32 %v10023_v7, %v8353_v29  ;;  %v7912_v7 = vor.u32 %v9915_v60, %v7911_v27  ;;  %v8241_v29 = vld [vmem:[%s15460_s7 + $0x3e4] sm:$0xf0]  ;;  %v5842_v32 = vadd.f32 %v5841_v34, %v5828_v28  ;;  %v9277_v27 = vld [vmem:[%s15460_s7 + $0xbfc] sm:$0xf0] }
 0x371   :  { %v8163_v60 = vld [vmem:[%s15460_s7 + $0x328] sm:$0xf] }
 0x372   :  { %6169 = vmatpush.bf16.msrb.mxu0 %v8384_v11  ;;  %6211 = vmatpush.bf16.msrb.mxu3 %v9056_v44  ;;  %v9359_v11 = vld [vmem:[%s15460_s7 + $0xc88] sm:$0xf]  ;;  %v10278_v44 = vld [vmem:[%s15460_s7 + $0xca0] sm:$0xf0] }
 0x373   :  { %6128 = vmatpush.bf16.msra.mxu1 %v9472_v19  ;;  %v7883_v19 = vld [vmem:[%s15460_s7 + $0xf8] sm:$0xf]  ;;  %v9249_v28 = vld [vmem:[%s15460_s7 + $0xbc4] sm:$0xf0] }
 0x374   :  { %6199 = vmatpush.bf16.msrb.mxu2 %v8776_v30  ;;  %v8328_v30 = vor.u32 %v10016_v26, %v8325_v51  ;;  %v8244_v26 = vor.u32 %v9995_v55, %v8241_v29  ;;  %v8916_v51 = vor.u32 %v10163_v42, %v8913_v17  ;;  %v7884_v2 = vor.u32 %v9908_v63, %v7883_v19  ;;  %v7799_v55 = vld [vmem:[%s15460_s7 + $0x50] sm:$0xf]  ;;  %v10079_v42 = vld [vmem:[%s15460_s7 + $0x66c] sm:$0xf]  ;;  %v8577_v17 = vld [vmem:[%s15460_s7 + $0x684] sm:$0xf0] }
 0x376   :  { %6170 = vmatpush.bf16.msrb.mxu0 %v8356_v20  ;;  %6212 = vmatpush.bf16.msrb.mxu3 %v9028_v22  ;;  %v9360_v20 = vor.u32 %v10278_v44, %v9359_v11  ;;  %v9331_v22 = vld [vmem:[%s15460_s7 + $0xc50] sm:$0xf]  ;;  %v8608_v44 = vor.u32 %v10086_v0, %v8605_v38  ;;  %v8079_v0 = vld [vmem:[%s15460_s7 + $0x280] sm:$0xf]  ;;  %v9957_v38 = vld [vmem:[%s15460_s7 + $0x298] sm:$0xf0] }
 0x377   :  { %6129 = vmatpush.bf16.msra.mxu1 %v9444_v40  ;;  %v7855_v40 = vld [vmem:[%s15460_s7 + $0xc0] sm:$0xf]  ;;  %v5869_v57 = vpop.f32.mrf.mxu2 }
 0x378   :  { %6200 = vmatpush.bf16.msrb.mxu2 %v8748_v23  ;;  %v8300_v23 = vor.u32 %v10009_v13, %v8297_v45  ;;  %v9305_v45 = vld [vmem:[%s15460_s7 + $0xc34] sm:$0xf0] }
 0x37a   :  { %6171 = vmatpush.bf16.msrb.mxu0 %v8328_v30  ;;  %6213 = vmatpush.bf16.msrb.mxu3 %v9000_v47  ;;  %v9901_v30 = vld [vmem:[%s15460_s7 + $0xd8] sm:$0xf0] }
 0x37b   :  { %6130 = vmatpush.bf16.msra.mxu1 %v9416_v6  ;;  %v10093_v47 = vld [vmem:[%s15460_s7 + $0x6dc] sm:$0xf] }
 0x37c   :  { %6201 = vmatpush.bf16.msrb.mxu2 %v8720_v3  ;;  %v9388_v3 = vor.u32 %v10285_v58, %v9387_v54  ;;  %v8636_v54 = vor.u32 %v10093_v47, %v8633_v43  ;;  %v7827_v58 = vld [vmem:[%s15460_s7 + $0x88] sm:$0xf]  ;;  %v9221_v43 = vld [vmem:[%s15460_s7 + $0xb8c] sm:$0xf0] }
 0x37d   :  { %v7828_v11 = vor.u32 %v9894_v12, %v7827_v58  ;;  %v10233_v58 = vld [vmem:[%s15460_s7 + $0xb3c] sm:$0xf] }
 0x37e   :  { %6172 = vmatpush.bf16.msrb.mxu0 %v8300_v23  ;;  %6214 = vmatpush.bf16.msrb.mxu3 %v8972_v62  ;;  %v5816_v23 = vadd.f32 %v5815_v4, %v3264_v46  ;;  %v7856_v62 = vor.u32 %v9901_v30, %v7855_v40  ;;  %v10254_v46 = vld [vmem:[%s15460_s7 + $0xbe4] sm:$0xf]  ;;  %v5883_v4 = vpop.f32.mrf.mxu3  ;;  %v10240_v40 = vld [vmem:[%s15460_s7 + $0xb74] sm:$0xf] }
 0x37f   :  { %6131 = vmatpush.bf16.msra.mxu1 %v9388_v3  ;;  %v9978_v3 = vld [vmem:[%s15460_s7 + $0x340] sm:$0xf0]  ;;  %v5871_v14 = vpop.f32.mrf.mxu2 }
 0x380   :  { %6202 = vmatpush.bf16.msrb.mxu2 %v8692_v49  ;;  %v5855_v49 = vpop.f32.mrf.mxu1  ;;  %v5830_v1 = vadd.f32 %v5829_v25, %v5816_v23  ;;  %v8164_v29 = vor.u32 %v9978_v3, %v8163_v60  ;;  %v7800_v25 = vor.u32 %v9887_v48, %v7799_v55  ;;  %v8080_v3 = vor.u32 %v9957_v38, %v8079_v0  ;;  %v9165_v55 = vld [vmem:[%s15460_s7 + $0xb1c] sm:$0xf0]  ;;  %v8051_v48 = vld [vmem:[%s15460_s7 + $0x248] sm:$0xf]  ;;  %v10118_v38 = vld [vmem:[%s15460_s7 + $0x7a0] sm:$0xf0] }
 0x381   :  { %v5856_v13 = vadd.f32 %v5855_v49, %v5842_v32  ;;  %v10247_v49 = vld [vmem:[%s15460_s7 + $0xbac] sm:$0xf]  ;;  %v8723_v0 = vld [vmem:[%s15460_s7 + $0x788] sm:$0xf] }
 0x382   :  { %6173 = vmatpush.bf16.msrb.mxu0 %v8272_v10  ;;  %6215 = vmatpush.bf16.msrb.mxu3 %v8944_v8  ;;  %v5844_v8 = vadd.f32 %v5843_v59, %v5830_v1  ;;  %v10146_v1 = vld [vmem:[%s15460_s7 + $0x880] sm:$0xf0] }
 0x383   :  { %6132 = vmatpush.bf16.msra.mxu1 %v9360_v20  ;;  %v5870_v34 = vadd.f32 %v5869_v57, %v5856_v13  ;;  %v8135_v20 = vld [vmem:[%s15460_s7 + $0x2f0] sm:$0xf]  ;;  %v9964_v13 = vld [vmem:[%s15460_s7 + $0x2d0] sm:$0xf0] }
 0x384   :  { %6203 = vmatpush.bf16.msrb.mxu2 %v8664_v35  ;;  %v8885_v35 = vld [vmem:[%s15460_s7 + $0x8ec] sm:$0xf0] }
 0x385   :  { %v8888_v6 = vor.u32 %v10156_v18, %v8885_v35  ;;  %v5884_v19 = vadd.f32 %v5883_v4, %v5870_v34  ;;  %v9252_v18 = vor.u32 %v10247_v49, %v9249_v28  ;;  %v8549_v35 = vld [vmem:[%s15460_s7 + $0x64c] sm:$0xf0]  ;;  %v10058_v4 = vld [vmem:[%s15460_s7 + $0x5c4] sm:$0xf]  ;;  %v10051_v28 = vld [vmem:[%s15460_s7 + $0x58c] sm:$0xf] }
 0x386   :  { %6174 = vmatpush.bf16.msrb.mxu0 %v8244_v26  ;;  %6216 = vmatpush.bf16.msrb.mxu3 %v8916_v51  ;;  %v8580_v26 = vor.u32 %v10079_v42, %v8577_v17  ;;  %v7771_v51 = vld [vmem:[%s15460_s7 + $0x18] sm:$0xf]  ;;  %v8807_v42 = vld [vmem:[%s15460_s7 + $0x830] sm:$0xf]  ;;  %v10139_v17 = vld [vmem:[%s15460_s7 + $0x848] sm:$0xf0] }
 0x387   :  { %6204 = vmatmul.bf16.vlgmr.msrb.gmra.mxu2 %v13011_v9  ;;  %v7772_v57 = vor.u32 %v9880_v31, %v7771_v51  ;;  %v8023_v51 = vld [vmem:[%s15460_s7 + $0x210] sm:$0xf]  ;;  %v9943_v31 = vld [vmem:[%s15460_s7 + $0x228] sm:$0xf0] }
 0x388   :  { %6252 = vmatpush.bf16.msra.mxu2 %v7968_v21  ;;  %v9332_v21 = vor.u32 %v10271_v24, %v9331_v22  ;;  %v5857_v10 = vpop.f32.mrf.mxu1  ;;  %v9971_v22 = vld [vmem:[%s15460_s7 + $0x308] sm:$0xf0]  ;;  %v5897_v24 = vpop.f32.mrf.mxu0 }
 0x389   :  { %v5858_v63 = vadd.f32 %v5857_v10, %v5844_v8  ;;  %v8136_v32 = vor.u32 %v9971_v22, %v8135_v20  ;;  %v5898_v30 = vadd.f32 %v5897_v24, %v5884_v19  ;;  %v8493_v10 = vld [vmem:[%s15460_s7 + $0x5dc] sm:$0xf0]  ;;  %v10226_v8 = vld [vmem:[%s15460_s7 + $0xb04] sm:$0xf]  ;;  %v8465_v22 = vld [vmem:[%s15460_s7 + $0x5a4] sm:$0xf0] }
 0x38a   :  { %6133 = vmatpush.bf16.msra.mxu1 %v9332_v21  ;;  %6175 = vmatpush.bf16.msrb.mxu0 %v8216_v50  ;;  %v5885_v50 = vpop.f32.mrf.mxu3  ;;  %v10219_v24 = vld [vmem:[%s15460_s7 + $0xacc] sm:$0xf] }
 0x38b   :  { %6217 = vmatpush.bf16.msrb.mxu3 %v8888_v6  ;;  %v5872_v47 = vadd.f32 %v5871_v14, %v5858_v63  ;;  %v9224_v6 = vor.u32 %v10240_v40, %v9221_v43  ;;  %v8496_v63 = vor.u32 %v10058_v4, %v8493_v10  ;;  %v8779_v14 = vld [vmem:[%s15460_s7 + $0x7f8] sm:$0xf]  ;;  %v9109_v43 = vld [vmem:[%s15460_s7 + $0xaac] sm:$0xf0]  ;;  %v9059_v4 = vld [vmem:[%s15460_s7 + $0xa28] sm:$0xf] }
 0x38c   :  { %6253 = vmatpush.bf16.msra.mxu2 %v7940_v39  ;;  %v9308_v39 = vor.u32 %v10261_v33, %v9305_v45  ;;  %v8107_v33 = vld [vmem:[%s15460_s7 + $0x2b8] sm:$0xf]  ;;  %v8863_v45 = vld [vmem:[%s15460_s7 + $0x8a0] sm:$0xf]  ;;  %v10202_v10 = vld [vmem:[%s15460_s7 + $0xa40] sm:$0xf0] }
 0x38d   :  { %6134 = vmatmul.bf16.vlgmr.msra.gmra.mxu1 %v13496_v16  ;;  %6176 = vmatmul.bf16.vlgmr.msrb.gmra.mxu0 %v12875_v52  ;;  %v8108_v23 = vor.u32 %v9964_v13, %v8107_v33  ;;  %v5886_v12 = vadd.f32 %v5885_v50, %v5872_v47  ;;  %v10212_v47 = vld [vmem:[%s15460_s7 + $0xa94] sm:$0xf]  ;;  %v7995_v33 = vld [vmem:[%s15460_s7 + $0x1d8] sm:$0xf] }
 0x38e   :  { %6182 = vmatpush.bf16.msrb.mxu1 %v8636_v54  ;;  %6224 = vmatpush.bf16.msra.mxu0 %v9308_v39  ;;  %v8521_v54 = vld [vmem:[%s15460_s7 + $0x614] sm:$0xf0]  ;;  %v8864_v39 = vor.u32 %v10153_v53, %v8863_v45  ;;  %v8751_v45 = vld [vmem:[%s15460_s7 + $0x7c0] sm:$0xf]  ;;  %v10125_v53 = vld [vmem:[%s15460_s7 + $0x7d8] sm:$0xf0] }
 0x38f   :  { %6266 = vmatpush.bf16.msra.mxu3 %v8192_v36  ;;  %v9193_v36 = vld [vmem:[%s15460_s7 + $0xb54] sm:$0xf0] }
 0x390   :  { %6254 = vmatpush.bf16.msra.mxu2 %v7912_v7  ;;  %v9280_v7 = vor.u32 %v10254_v46, %v9277_v27  ;;  %6218 = vmatmul.bf16.vlgmr.msrb.gmra.mxu3 %v13181_v61  ;;  %v5911_v21 = vpop.f32.mrf.mxu1  ;;  %v8835_v46 = vld [vmem:[%s15460_s7 + $0x868] sm:$0xf]  ;;  %v5899_v27 = vpop.f32.mrf.mxu0  ;;  %v9196_v60 = vor.u32 %v10233_v58, %v9193_v36  ;;  %v9112_v58 = vor.u32 %v10212_v47, %v9109_v43  ;;  %v10289_v47 = vld [vmem:[%s15460_s7 + $0xcfc] sm:$0xf]  ;;  %v9417_v43 = vld [vmem:[%s15460_s7 + $0xd14] sm:$0xf0] }
 0x391   :  { %v5912_v56 = vadd.f32 %v5911_v21, %v5898_v30  ;;  %v8024_v30 = vor.u32 %v9943_v31, %v8023_v51  ;;  %v9936_v21 = vld [vmem:[%s15460_s7 + $0x1f0] sm:$0xf0]  ;;  %v8331_v51 = vld [vmem:[%s15460_s7 + $0x478] sm:$0xf] }
 0x392   :  { %6183 = vmatpush.bf16.msrb.mxu1 %v8608_v44  ;;  %6225 = vmatpush.bf16.msra.mxu0 %v9280_v7  ;;  %v8836_v44 = vor.u32 %v10146_v1, %v8835_v46  ;;  %v9950_v7 = vld [vmem:[%s15460_s7 + $0x260] sm:$0xf0]  ;;  %v10020_v31 = vld [vmem:[%s15460_s7 + $0x490] sm:$0xf0] }
 0x393   :  { %6267 = vmatpush.bf16.msra.mxu3 %v8164_v29  ;;  %10330 = vtanh.f32 %v5912_v56  ;;  %v8052_v20 = vor.u32 %v9950_v7, %v8051_v48  ;;  %v10317_v56 = vld [vmem:[%s15460_s7 + $0xddc] sm:$0xf]  ;;  %v9060_v7 = vor.u32 %v10202_v10, %v9059_v4  ;;  %v8919_v4 = vld [vmem:[%s15460_s7 + $0x910] sm:$0xf]  ;;  %v10167_v10 = vld [vmem:[%s15460_s7 + $0x928] sm:$0xf0] }
 0x394   :  { %6255 = vmatpush.bf16.msra.mxu2 %v7884_v2  ;;  %v10072_v2 = vld [vmem:[%s15460_s7 + $0x634] sm:$0xf] }
 0x395   :  { %v8552_v59 = vor.u32 %v10072_v2, %v8549_v35  ;;  %v10044_v2 = vld [vmem:[%s15460_s7 + $0x554] sm:$0xf]  ;;  %v8437_v35 = vld [vmem:[%s15460_s7 + $0x56c] sm:$0xf0] }
 0x396   :  { %6184 = vmatpush.bf16.msrb.mxu1 %v8580_v26  ;;  %6226 = vmatpush.bf16.msra.mxu0 %v9252_v18  ;;  %v9137_v26 = vld [vmem:[%s15460_s7 + $0xae4] sm:$0xf0]  ;;  %v10132_v18 = vld [vmem:[%s15460_s7 + $0x810] sm:$0xf0] }
 0x397   :  { %6268 = vmatpush.bf16.msra.mxu3 %v8136_v32  ;;  %v8468_v32 = vor.u32 %v10051_v28, %v8465_v22  ;;  %v9140_v40 = vor.u32 %v10219_v24, %v9137_v26  ;;  %v8780_v13 = vor.u32 %v10132_v18, %v8779_v14  ;;  %v10104_v22 = vld [vmem:[%s15460_s7 + $0x730] sm:$0xf0]  ;;  %v9445_v26 = vld [vmem:[%s15460_s7 + $0xd4c] sm:$0xf0]  ;;  %v9003_v14 = vld [vmem:[%s15460_s7 + $0x9b8] sm:$0xf] }
 0x398   :  { %6256 = vmatpush.bf16.msra.mxu2 %v7856_v62  ;;  %v10065_v62 = vld [vmem:[%s15460_s7 + $0x5fc] sm:$0xf]  ;;  %v5913_v29 = vpop.f32.mrf.mxu1  ;;  %v10188_v18 = vld [vmem:[%s15460_s7 + $0x9d0] sm:$0xf0] }
 0x399   :  { %v8524_v34 = vor.u32 %v10065_v62, %v8521_v54  ;;  %v10331_v49 = vpop.eup %10330  ;;  %v9087_v62 = vld [vmem:[%s15460_s7 + $0xa60] sm:$0xf]  ;;  %v10209_v54 = vld [vmem:[%s15460_s7 + $0xa78] sm:$0xf0] }
 0x39a   :  { %6185 = vmatpush.bf16.msrb.mxu1 %v8552_v59  ;;  %6227 = vmatpush.bf16.msra.mxu0 %v9224_v6  ;;  %6380 = vst [vmem:[%s15463_s9 + $0x10] sm:$0xff] %v10331_v49  ;;  %v8415_v59 = vld [vmem:[%s15460_s7 + $0x520] sm:$0xf]  ;;  %v8440_v6 = vor.u32 %v10044_v2, %v8437_v35  ;;  %v9088_v1 = vor.u32 %v10209_v54, %v9087_v62  ;;  %v10027_v49 = vld [vmem:[%s15460_s7 + $0x4c8] sm:$0xf0] }
 0x39b   :  { %6269 = vmatpush.bf16.msra.mxu3 %v8108_v23  ;;  %v10041_v23 = vld [vmem:[%s15460_s7 + $0x538] sm:$0xf0]  ;;  %v9389_v62 = vld [vmem:[%s15460_s7 + $0xcdc] sm:$0xf0]  ;;  %v8275_v54 = vld [vmem:[%s15460_s7 + $0x408] sm:$0xf] }
 0x39c   :  { %6257 = vmatpush.bf16.msra.mxu2 %v7828_v11  ;;  %v5900_v11 = vadd.f32 %v5899_v27, %v5886_v12  ;;  %v7996_v12 = vor.u32 %v9936_v21, %v7995_v33  ;;  %v8416_v46 = vor.u32 %v10041_v23, %v8415_v59  ;;  %v9501_v27 = vld [vmem:[%s15460_s7 + $0xdbc] sm:$0xf0]  ;;  %v9420_v59 = vor.u32 %v10289_v47, %v9417_v43  ;;  %v10282_v23 = vld [vmem:[%s15460_s7 + $0xcc4] sm:$0xf] }
 0x39d   :  { %v8303_v33 = vld [vmem:[%s15460_s7 + $0x440] sm:$0xf]  ;;  %v10258_v47 = vld [vmem:[%s15460_s7 + $0xc00] sm:$0xf0] }
 0x39e   :  { %6186 = vmatpush.bf16.msrb.mxu1 %v8524_v34  ;;  %v5914_v19 = vadd.f32 %v5913_v29, %v5900_v11  ;;  %6228 = vmatpush.bf16.msra.mxu0 %v9196_v60  ;;  %v10310_v34 = vld [vmem:[%s15460_s7 + $0xda4] sm:$0xf]  ;;  %v8387_v60 = vld [vmem:[%s15460_s7 + $0x4e8] sm:$0xf]  ;;  %v10303_v29 = vld [vmem:[%s15460_s7 + $0xd6c] sm:$0xf] }
 0x39f   :  { %6270 = vmatpush.bf16.msra.mxu3 %v8080_v3  ;;  %v10034_v3 = vld [vmem:[%s15460_s7 + $0x500] sm:$0xf0]  ;;  %v9504_v11 = vor.u32 %v10310_v34, %v9501_v27  ;;  %v8975_v21 = vld [vmem:[%s15460_s7 + $0x980] sm:$0xf]  ;;  %v10275_v34 = vld [vmem:[%s15460_s7 + $0xc8c] sm:$0xf] }
 0x3a0   :  { %6258 = vmatpush.bf16.msra.mxu2 %v7800_v25  ;;  %10332 = vtanh.f32 %v5914_v19  ;;  %v8808_v25 = vor.u32 %v10139_v17, %v8807_v42  ;;  %v8388_v48 = vor.u32 %v10034_v3, %v8387_v60  ;;  %v9473_v42 = vld [vmem:[%s15460_s7 + $0xd84] sm:$0xf0]  ;;  %v8359_v17 = vld [vmem:[%s15460_s7 + $0x4b0] sm:$0xf]  ;;  %v9999_v3 = vld [vmem:[%s15460_s7 + $0x3e8] sm:$0xf0] }
 0x3a1   :  { %v9031_v19 = vld [vmem:[%s15460_s7 + $0x9f0] sm:$0xf]  ;;  %v8360_v24 = vor.u32 %v10027_v49, %v8359_v17  ;;  %v9361_v27 = vld [vmem:[%s15460_s7 + $0xca4] sm:$0xf0]  ;;  %v8219_v17 = vld [vmem:[%s15460_s7 + $0x398] sm:$0xf] }
 0x3a2   :  { %6187 = vmatpush.bf16.msrb.mxu1 %v8496_v63  ;;  %v10195_v63 = vld [vmem:[%s15460_s7 + $0xa08] sm:$0xf0]  ;;  %v8247_v60 = vld [vmem:[%s15460_s7 + $0x3d0] sm:$0xf]  ;;  %v9992_v49 = vld [vmem:[%s15460_s7 + $0x3b0] sm:$0xf0] }
 0x3a3   :  { %6271 = vmatpush.bf16.msra.mxu3 %v8052_v20  ;;  %v8667_v20 = vld [vmem:[%s15460_s7 + $0x718] sm:$0xf] }
 0x3a4   :  { %6259 = vmatpush.bf16.msra.mxu2 %v7772_v57  ;;  %v9529_v57 = vld [vmem:[%s15460_s7 + $0xdf4] sm:$0xf0]  ;;  %v8668_v2 = vor.u32 %v10104_v22, %v8667_v20  ;;  %v10097_v20 = vld [vmem:[%s15460_s7 + $0x6f8] sm:$0xf0]  ;;  %v9311_v22 = vld [vmem:[%s15460_s7 + $0xc20] sm:$0xf] }
 0x3a5   :  { %v9532_v36 = vor.u32 %v10317_v56, %v9529_v57  ;;  %v15219_v56 = vld [vmem:[%s15462_s8] sm:$0x7f] }
 0x3a6   :  { %v10333_v50 = vpop.eup %10332  ;;  %6188 = vmatpush.bf16.msrb.mxu1 %v8468_v32  ;;  %v5925_v32 = vpop.f32.mrf.mxu2  ;;  %v3265_v57 = vperm.slane %v15219_v56, 3 }
 0x3a7   :  { %6260 = vmatmul.bf16.vlgmr.msra.gmra.mxu2 %v12776_v37  ;;  %v9168_v37 = vor.u32 %v10226_v8, %v9165_v55  ;;  %6388 = vst [vmem:[%s15463_s9 + $0x48] sm:$0xff] %v10333_v50  ;;  %6272 = vmatpush.bf16.msra.mxu3 %v8024_v30  ;;  %v8724_v8 = vor.u32 %v10118_v38, %v8723_v0  ;;  %v10111_v55 = vld [vmem:[%s15460_s7 + $0x768] sm:$0xf0] }
 0x3a8   :  { %6308 = vmatpush.bf16.msrb.mxu2 %v8864_v39  ;;  %v8752_v39 = vor.u32 %v10125_v53, %v8751_v45  ;;  %v9004_v30 = vor.u32 %v10188_v18, %v9003_v14  ;;  %v10181_v45 = vld [vmem:[%s15460_s7 + $0x998] sm:$0xf0]  ;;  %v5939_v53 = vpop.f32.mrf.mxu3  ;;  %v9392_v0 = vor.u32 %v10282_v23, %v9389_v62  ;;  %v10251_v23 = vld [vmem:[%s15460_s7 + $0xbc8] sm:$0xf0] }
 0x3a9   :  { %6229 = vmatpush.bf16.msra.mxu0 %v9168_v37  ;;  %v9476_v37 = vor.u32 %v10303_v29, %v9473_v42  ;;  %v8920_v29 = vor.u32 %v10167_v10, %v8919_v4  ;;  %v9333_v42 = vld [vmem:[%s15460_s7 + $0xc6c] sm:$0xf0]  ;;  %v10069_v10 = vld [vmem:[%s15460_s7 + $0x618] sm:$0xf0] }
 0x3aa   :  { %6189 = vmatpush.bf16.msrb.mxu1 %v8440_v6  ;;  %v8976_v6 = vor.u32 %v10181_v45, %v8975_v21 }
 0x3ab   :  { %6273 = vmatpush.bf16.msra.mxu3 %v7996_v12  ;;  %v8947_v12 = vld [vmem:[%s15460_s7 + $0x948] sm:$0xf] }
 0x3ac   :  { %6309 = vmatpush.bf16.msrb.mxu2 %v8836_v44  ;;  %v8695_v44 = vld [vmem:[%s15460_s7 + $0x750] sm:$0xf] }
 0x3ad   :  { %6230 = vmatpush.bf16.msra.mxu0 %v9140_v40  ;;  %6190 = vmatmul.bf16.vlgmr.msrb.gmra.mxu1 %v12854_v5  ;;  %v8696_v28 = vor.u32 %v10111_v55, %v8695_v44  ;;  %v8332_v40 = vor.u32 %v10020_v31, %v8331_v51  ;;  %v9364_v44 = vor.u32 %v10275_v34, %v9361_v27  ;;  %v10268_v55 = vld [vmem:[%s15460_s7 + $0xc54] sm:$0xf] }
 0x3ae   :  { %6238 = vmatpush.bf16.msra.mxu1 %v9532_v36  ;;  %6274 = vmatmul.bf16.vlgmr.msra.gmra.mxu3 %v12745_v15  ;;  %v10296_v15 = vld [vmem:[%s15460_s7 + $0xd34] sm:$0xf]  ;;  %v5953_v36 = vpop.f32.mrf.mxu0  ;;  %v5927_v38 = vpop.f32.mrf.mxu2  ;;  %v8220_v31 = vor.u32 %v9992_v49, %v8219_v17  ;;  %v9171_v17 = vld [vmem:[%s15460_s7 + $0xb08] sm:$0xf]  ;;  %v10230_v49 = vld [vmem:[%s15460_s7 + $0xb20] sm:$0xf0] }
 0x3af   :  { %6322 = vmatpush.bf16.msrb.mxu3 %v9088_v1  ;;  %v9448_v35 = vor.u32 %v10296_v15, %v9445_v26  ;;  %v9336_v15 = vor.u32 %v10268_v55, %v9333_v42  ;;  %v5928_v18 = vadd.f32 %v5927_v38, %v3265_v57  ;;  %v10076_v38 = vld [vmem:[%s15460_s7 + $0x650] sm:$0xf0]  ;;  %v10062_v42 = vld [vmem:[%s15460_s7 + $0x5e0] sm:$0xf0] }
 0x3b0   :  { %6310 = vmatpush.bf16.msrb.mxu2 %v8808_v25  ;;  %v9032_v25 = vor.u32 %v10195_v63, %v9031_v19  ;;  %v8891_v63 = vld [vmem:[%s15460_s7 + $0x8d8] sm:$0xf] }
 0x3b1   :  { %6231 = vmatpush.bf16.msra.mxu0 %v9112_v58  ;;  %v10006_v58 = vld [vmem:[%s15460_s7 + $0x420] sm:$0xf0] }
 0x3b2   :  { %6239 = vmatpush.bf16.msra.mxu1 %v9504_v11 }
 0x3b3   :  { %6323 = vmatpush.bf16.msrb.mxu3 %v9060_v7  ;;  %v8248_v7 = vor.u32 %v9999_v3, %v8247_v60  ;;  %v8527_v3 = vld [vmem:[%s15460_s7 + $0x600] sm:$0xf] }
 0x3b4   :  { %6311 = vmatpush.bf16.msrb.mxu2 %v8780_v13  ;;  %6232 = vmatmul.bf16.vlgmr.msra.gmra.mxu0 %v13345_v41  ;;  %v10013_v13 = vld [vmem:[%s15460_s7 + $0x458] sm:$0xf0]  ;;  %v8528_v55 = vor.u32 %v10069_v10, %v8527_v3  ;;  %v10272_v3 = vld [vmem:[%s15460_s7 + $0xc70] sm:$0xf0] }
 0x3b5   :  { %6280 = vmatpush.bf16.msrb.mxu0 %v8416_v46  ;;  %v8304_v50 = vor.u32 %v10013_v13, %v8303_v33  ;;  %v8276_v46 = vor.u32 %v10006_v58, %v8275_v54 }
 0x3b6   :  { %6240 = vmatpush.bf16.msra.mxu1 %v9476_v37  ;;  %v8639_v37 = vld [vmem:[%s15460_s7 + $0x6e0] sm:$0xf]  ;;  %v5981_v26 = vpop.f32.mrf.mxu2  ;;  %v5955_v51 = vpop.f32.mrf.mxu0 }
 0x3b7   :  { %6324 = vmatpush.bf16.msrb.mxu3 %v9032_v25 }
 0x3b8   :  { %6312 = vmatpush.bf16.msrb.mxu2 %v8752_v39  ;;  %v10174_v39 = vld [vmem:[%s15460_s7 + $0x960] sm:$0xf0] }
 0x3b9   :  { %6281 = vmatpush.bf16.msrb.mxu0 %v8388_v48  ;;  %v8948_v1 = vor.u32 %v10174_v39, %v8947_v12  ;;  %v5941_v48 = vpop.f32.mrf.mxu3 }
 0x3ba   :  { %6241 = vmatpush.bf16.msra.mxu1 %v9448_v35  ;;  %v8611_v35 = vld [vmem:[%s15460_s7 + $0x6a8] sm:$0xf]  ;;  %v5942_v43 = vadd.f32 %v5941_v48, %v5928_v18  ;;  %v10048_v18 = vld [vmem:[%s15460_s7 + $0x570] sm:$0xf0] }
 0x3bb   :  { %6325 = vmatpush.bf16.msrb.mxu3 %v9004_v30  ;;  %v9283_v30 = vld [vmem:[%s15460_s7 + $0xbe8] sm:$0xf] }
 0x3bc   :  { %6313 = vmatpush.bf16.msrb.mxu2 %v8724_v8  ;;  %v5967_v8 = vpop.f32.mrf.mxu1  ;;  %v5956_v45 = vadd.f32 %v5955_v51, %v5942_v43 }
 0x3bd   :  { %6282 = vmatpush.bf16.msrb.mxu0 %v8360_v24  ;;  %v10265_v24 = vld [vmem:[%s15460_s7 + $0xc38] sm:$0xf0] }
 0x3be   :  { %6242 = vmatpush.bf16.msra.mxu1 %v9420_v59  ;;  %v8583_v59 = vld [vmem:[%s15460_s7 + $0x670] sm:$0xf]  ;;  %v6009_v58 = vpop.f32.mrf.mxu0 }
 0x3bf   :  { %6326 = vmatpush.bf16.msrb.mxu3 %v8976_v6  ;;  %v9255_v6 = vld [vmem:[%s15460_s7 + $0xbb0] sm:$0xf] }
 0x3c0   :  { %6314 = vmatpush.bf16.msrb.mxu2 %v8696_v28  ;;  %v10160_v28 = vld [vmem:[%s15460_s7 + $0x8f0] sm:$0xf0]  ;;  %v9256_v39 = vor.u32 %v10251_v23, %v9255_v6 }
 0x3c1   :  { %6283 = vmatpush.bf16.msrb.mxu0 %v8332_v40  ;;  %v8892_v14 = vor.u32 %v10160_v28, %v8891_v63  ;;  %v10090_v40 = vld [vmem:[%s15460_s7 + $0x6c0] sm:$0xf0]  ;;  %v5995_v13 = vpop.f32.mrf.mxu3  ;;  %v10300_v6 = vld [vmem:[%s15460_s7 + $0xd50] sm:$0xf0] }
 0x3c2   :  { %6243 = vmatpush.bf16.msra.mxu1 %v9392_v0  ;;  %v5983_v0 = vpop.f32.mrf.mxu2 }
 0x3c3   :  { %6327 = vmatpush.bf16.msrb.mxu3 %v8948_v1 }
 0x3c4   :  { %6315 = vmatpush.bf16.msrb.mxu2 %v8668_v2  ;;  %v9312_v2 = vor.u32 %v10265_v24, %v9311_v22  ;;  %v5969_v21 = vpop.f32.mrf.mxu1  ;;  %v9172_v22 = vor.u32 %v10230_v49, %v9171_v17  ;;  %v8471_v24 = vld [vmem:[%s15460_s7 + $0x590] sm:$0xf] }
 0x3c5   :  { %6284 = vmatpush.bf16.msrb.mxu0 %v8304_v50  ;;  %v10083_v50 = vld [vmem:[%s15460_s7 + $0x688] sm:$0xf0]  ;;  %v5970_v54 = vadd.f32 %v5969_v21, %v5956_v45  ;;  %v10314_v21 = vld [vmem:[%s15460_s7 + $0xdc0] sm:$0xf0] }
 0x3c6   :  { %6244 = vmatpush.bf16.msra.mxu1 %v9364_v44  ;;  %v8584_v12 = vor.u32 %v10083_v50, %v8583_v59  ;;  %v9451_v50 = vld [vmem:[%s15460_s7 + $0xd38] sm:$0xf] }
 0x3c7   :  { %6316 = vmatmul.bf16.vlgmr.msrb.gmra.mxu2 %v13011_v9  ;;  %v5926_v9 = vadd.f32 %v5925_v32, %v3265_v57  ;;  %6328 = vmatpush.bf16.msrb.mxu3 %v8920_v29  ;;  %v8640_v32 = vor.u32 %v10097_v20, %v8639_v37  ;;  %v9284_v57 = vor.u32 %v10258_v47, %v9283_v30  ;;  %v6011_v29 = vpop.f32.mrf.mxu0 }
 0x3c8   :  { %v5984_v1 = vadd.f32 %v5983_v0, %v5970_v54  ;;  %v9423_v54 = vld [vmem:[%s15460_s7 + $0xd00] sm:$0xf] }
 0x3c9   :  { %v5940_v11 = vadd.f32 %v5939_v53, %v5926_v9  ;;  %6285 = vmatpush.bf16.msrb.mxu0 %v8276_v46  ;;  %v8612_v53 = vor.u32 %v10090_v40, %v8611_v35  ;;  %v5997_v4 = vpop.f32.mrf.mxu3  ;;  %v9535_v35 = vld [vmem:[%s15460_s7 + $0xde0] sm:$0xf]  ;;  %v10321_v40 = vld [vmem:[%s15460_s7 + $0xdf8] sm:$0xf0] }
 0x3ca   :  { %6245 = vmatpush.bf16.msra.mxu1 %v9336_v15  ;;  %v5998_v44 = vadd.f32 %v5997_v4, %v5984_v1  ;;  %v9143_v15 = vld [vmem:[%s15460_s7 + $0xad0] sm:$0xf]  ;;  %v6037_v23 = vpop.f32.mrf.mxu2 }
 0x3cb   :  { %v5954_v19 = vadd.f32 %v5953_v36, %v5940_v11  ;;  %6329 = vmatpush.bf16.msrb.mxu3 %v8892_v14  ;;  %v8555_v36 = vld [vmem:[%s15460_s7 + $0x638] sm:$0xf]  ;;  %v10237_v11 = vld [vmem:[%s15460_s7 + $0xb58] sm:$0xf0] }
 0x3cc   :  { %v6023_v34 = vpop.f32.mrf.mxu1  ;;  %v8556_v60 = vor.u32 %v10076_v38, %v8555_v36  ;;  %v8443_v14 = vld [vmem:[%s15460_s7 + $0x558] sm:$0xf]  ;;  %v3266_v36 = vperm.slane %v15219_v56, 4 }
 0x3cd   :  { %v5968_v25 = vadd.f32 %v5967_v8, %v5954_v19  ;;  %6286 = vmatpush.bf16.msrb.mxu0 %v8248_v7  ;;  %6246 = vmatmul.bf16.vlgmr.msra.gmra.mxu1 %v13496_v16  ;;  %v9199_v8 = vld [vmem:[%s15460_s7 + $0xb40] sm:$0xf]  ;;  %v8499_v7 = vld [vmem:[%s15460_s7 + $0x5c8] sm:$0xf]  ;;  %v6012_v19 = vadd.f32 %v6011_v29, %v5998_v44  ;;  %v8444_v47 = vor.u32 %v10048_v18, %v8443_v14 }
 0x3ce   :  { %6294 = vmatpush.bf16.msrb.mxu1 %v8640_v32  ;;  %6330 = vmatmul.bf16.vlgmr.msrb.gmra.mxu3 %v13181_v61  ;;  %v10244_v61 = vld [vmem:[%s15460_s7 + $0xb90] sm:$0xf0]  ;;  %v9200_v48 = vor.u32 %v10237_v11, %v9199_v8  ;;  %v8500_v20 = vor.u32 %v10062_v42, %v8499_v7  ;;  %v9115_v32 = vld [vmem:[%s15460_s7 + $0xa98] sm:$0xf]  ;;  %v6038_v1 = vadd.f32 %v6037_v23, %v3266_v36 }
 0x3cf   :  { %v5982_v33 = vadd.f32 %v5981_v26, %v5968_v25  ;;  %v10055_v25 = vld [vmem:[%s15460_s7 + $0x5a8] sm:$0xf0]  ;;  %v6065_v0 = vpop.f32.mrf.mxu0 }
 0x3d0   :  { %v10223_v26 = vld [vmem:[%s15460_s7 + $0xae8] sm:$0xf0]  ;;  %v8472_v51 = vor.u32 %v10055_v25, %v8471_v24 }
 0x3d1   :  { %6287 = vmatpush.bf16.msrb.mxu0 %v8220_v31  ;;  %v5996_v62 = vadd.f32 %v5995_v13, %v5982_v33  ;;  %v9144_v31 = vor.u32 %v10223_v26, %v9143_v15  ;;  %v9536_v33 = vor.u32 %v10321_v40, %v9535_v35  ;;  %v9507_v13 = vld [vmem:[%s15460_s7 + $0xda8] sm:$0xf]  ;;  %v3267_v40 = vperm.slane %v15219_v56, 5 }
 0x3d2   :  { %6295 = vmatpush.bf16.msrb.mxu1 %v8612_v53  ;;  %v9508_v45 = vor.u32 %v10314_v21, %v9507_v13  ;;  %v9479_v53 = vld [vmem:[%s15460_s7 + $0xd70] sm:$0xf] }
 0x3d3   :  { %v6010_v46 = vadd.f32 %v6009_v58, %v5996_v62  ;;  %v9452_v62 = vor.u32 %v10300_v6, %v9451_v50 }
 0x3d4   :  { %6288 = vmatmul.bf16.vlgmr.msrb.gmra.mxu0 %v12875_v52  ;;  %v9227_v52 = vld [vmem:[%s15460_s7 + $0xb78] sm:$0xf]  ;;  %v6025_v63 = vpop.f32.mrf.mxu1 }
 0x3d5   :  { %6336 = vmatpush.bf16.msra.mxu0 %v9312_v2  ;;  %v6024_v27 = vadd.f32 %v6023_v34, %v6010_v46  ;;  %v9228_v9 = vor.u32 %v10244_v61, %v9227_v52  ;;  %v6026_v37 = vadd.f32 %v6025_v63, %v6012_v19  ;;  %v10216_v2 = vld [vmem:[%s15460_s7 + $0xab0] sm:$0xf0]  ;;  %v9367_v52 = vld [vmem:[%s15460_s7 + $0xc90] sm:$0xf]  ;;  %v10279_v61 = vld [vmem:[%s15460_s7 + $0xca8] sm:$0xf0]  ;;  %v6039_v46 = vpop.f32.mrf.mxu2 }
 0x3d6   :  { %6296 = vmatpush.bf16.msrb.mxu1 %v8584_v12  ;;  %v9116_v43 = vor.u32 %v10216_v2, %v9115_v32  ;;  %v9395_v12 = vld [vmem:[%s15460_s7 + $0xcc8] sm:$0xf] }
 0x3d7   :  { %10334 = vtanh.f32 %v6024_v27  ;;  %v9368_v27 = vor.u32 %v10279_v61, %v9367_v52 }
 0x3d8   :  { %10336 = vtanh.f32 %v6026_v37 }
 0x3d9   :  { %6337 = vmatpush.bf16.msra.mxu0 %v9284_v57  ;;  %v10307_v57 = vld [vmem:[%s15460_s7 + $0xd88] sm:$0xf0] }
 0x3da   :  { %6297 = vmatpush.bf16.msrb.mxu1 %v8556_v60  ;;  %v9480_v59 = vor.u32 %v10307_v57, %v9479_v53 }
 0x3dd   :  { %6338 = vmatpush.bf16.msra.mxu0 %v9256_v39  ;;  %v10335_v28 = vpop.eup %10334  ;;  %v10286_v39 = vld [vmem:[%s15460_s7 + $0xce0] sm:$0xf0]  ;;  %v6093_v44 = vpop.f32.mrf.mxu2 }
 0x3de   :  { %6298 = vmatpush.bf16.msrb.mxu1 %v8528_v55  ;;  %6381 = vst [vmem:[%s15463_s9 + $0x18] sm:$0xff] %v10335_v28  ;;  %v10337_v30 = vpop.eup %10336  ;;  %v9396_v38 = vor.u32 %v10286_v39, %v9395_v12  ;;  %v6067_v55 = vpop.f32.mrf.mxu0 }
 0x3df   :  { %6389 = vst [vmem:[%s15463_s9 + $0x50] sm:$0xff] %v10337_v30 }
 0x3e1   :  { %6339 = vmatpush.bf16.msra.mxu0 %v9228_v9  ;;  %v9339_v9 = vld [vmem:[%s15460_s7 + $0xc58] sm:$0xf] }
 0x3e2   :  { %6299 = vmatpush.bf16.msrb.mxu1 %v8500_v20  ;;  %v9340_v8 = vor.u32 %v10272_v3, %v9339_v9 }
 0x3e5   :  { %6340 = vmatpush.bf16.msra.mxu0 %v9200_v48  ;;  %v6040_v48 = vadd.f32 %v6039_v46, %v3266_v36  ;;  %v6095_v37 = vpop.f32.mrf.mxu2 }
 0x3e6   :  { %6300 = vmatpush.bf16.msrb.mxu1 %v8472_v51 }
 0x3e9   :  { %6341 = vmatpush.bf16.msra.mxu0 %v9172_v22  ;;  %v6079_v34 = vpop.f32.mrf.mxu1 }
 0x3ea   :  { %6301 = vmatpush.bf16.msrb.mxu1 %v8444_v47  ;;  %v6121_v28 = vpop.f32.mrf.mxu0 }
 0x3ed   :  { %6342 = vmatpush.bf16.msra.mxu0 %v9144_v31  ;;  %6302 = vmatmul.bf16.vlgmr.msrb.gmra.mxu1 %v12854_v5  ;;  %v10293_v5 = vld [vmem:[%s15460_s7 + $0xd18] sm:$0xf0]  ;;  %v6149_v2 = vpop.f32.mrf.mxu2 }
 0x3ee   :  { %6350 = vmatpush.bf16.msra.mxu1 %v9536_v33  ;;  %v9424_v58 = vor.u32 %v10293_v5, %v9423_v54 }
 0x3f1   :  { %6343 = vmatpush.bf16.msra.mxu0 %v9116_v43  ;;  %v6081_v17 = vpop.f32.mrf.mxu1  ;;  %v6150_v43 = vadd.f32 %v6149_v2, %v3267_v40 }
 0x3f2   :  { %6351 = vmatpush.bf16.msra.mxu1 %v9508_v45  ;;  %v6123_v51 = vpop.f32.mrf.mxu0 }
 0x3f4   :  { %6344 = vmatmul.bf16.vlgmr.msra.gmra.mxu0 %v13345_v41  ;;  %v6051_v41 = vpop.f32.mrf.mxu3 }
 0x3f5   :  { %v6052_v60 = vadd.f32 %v6051_v41, %v6038_v1  ;;  %v6151_v47 = vpop.f32.mrf.mxu2 }
 0x3f6   :  { %6352 = vmatpush.bf16.msra.mxu1 %v9480_v59  ;;  %v6152_v50 = vadd.f32 %v6151_v47, %v3267_v40 }
 0x3f7   :  { %v6066_v10 = vadd.f32 %v6065_v0, %v6052_v60 }
 0x3f9   :  { %v6080_v11 = vadd.f32 %v6079_v34, %v6066_v10 }
 0x3fa   :  { %6353 = vmatpush.bf16.msra.mxu1 %v9452_v62 }
 0x3fb   :  { %v6094_v29 = vadd.f32 %v6093_v44, %v6080_v11 }
 0x3fc   :  { %v6053_v4 = vpop.f32.mrf.mxu3 }
 0x3fd   :  { %v6054_v7 = vadd.f32 %v6053_v4, %v6040_v48 }
 0x3fe   :  { %6354 = vmatpush.bf16.msra.mxu1 %v9424_v58 }
 0x3ff   :  { %v6068_v49 = vadd.f32 %v6067_v55, %v6054_v7 }
 0x401   :  { %v6082_v63 = vadd.f32 %v6081_v17, %v6068_v49 }
 0x402   :  { %6355 = vmatpush.bf16.msra.mxu1 %v9396_v38 }
 0x403   :  { %v6096_v22 = vadd.f32 %v6095_v37, %v6082_v63 }
 0x404   :  { %v6107_v42 = vpop.f32.mrf.mxu3 }
 0x405   :  { %v6108_v19 = vadd.f32 %v6107_v42, %v6094_v29 }
 0x406   :  { %6356 = vmatpush.bf16.msra.mxu1 %v9368_v27 }
 0x407   :  { %v6122_v20 = vadd.f32 %v6121_v28, %v6108_v19 }
 0x40a   :  { %6357 = vmatpush.bf16.msra.mxu1 %v9340_v8  ;;  %v6135_v24 = vpop.f32.mrf.mxu1  ;;  %v6177_v30 = vpop.f32.mrf.mxu0  ;;  %v3268_v8 = vperm.slane %v15219_v56, 6 }
 0x40b   :  { %v6136_v25 = vadd.f32 %v6135_v24, %v6122_v20  ;;  %v6205_v57 = vpop.f32.mrf.mxu2 }
 0x40c   :  { %v6109_v15 = vpop.f32.mrf.mxu3 }
 0x40d   :  { %6358 = vmatmul.bf16.vlgmr.msra.gmra.mxu1 %v13496_v16  ;;  %v6110_v26 = vadd.f32 %v6109_v15, %v6096_v22  ;;  %10338 = vtanh.f32 %v6136_v25 }
 0x40f   :  { %v6124_v31 = vadd.f32 %v6123_v51, %v6110_v26 }
 0x412   :  { %v6137_v14 = vpop.f32.mrf.mxu1  ;;  %v6179_v59 = vpop.f32.mrf.mxu0 }
 0x413   :  { %v10339_v18 = vpop.eup %10338  ;;  %v6138_v32 = vadd.f32 %v6137_v14, %v6124_v31  ;;  %v6207_v39 = vpop.f32.mrf.mxu2 }
 0x414   :  { %6382 = vst [vmem:[%s15463_s9 + $0x20] sm:$0xff] %v10339_v18  ;;  %v6163_v35 = vpop.f32.mrf.mxu3 }
 0x415   :  { %10340 = vtanh.f32 %v6138_v32  ;;  %v6164_v13 = vadd.f32 %v6163_v35, %v6150_v43 }
 0x417   :  { %v6178_v45 = vadd.f32 %v6177_v30, %v6164_v13 }
 0x41b   :  { %v10341_v16 = vpop.eup %10340 }
 0x41c   :  { %6390 = vst [vmem:[%s15463_s9 + $0x58] sm:$0xff] %v10341_v16  ;;  %v6165_v21 = vpop.f32.mrf.mxu3 }
 0x41d   :  { %v6166_v6 = vadd.f32 %v6165_v21, %v6152_v50 }
 0x41f   :  { %v6180_v5 = vadd.f32 %v6179_v59, %v6166_v6 }
 0x424   :  { %v6219_v62 = vpop.f32.mrf.mxu3 }
 0x42a   :  { %v6191_v33 = vpop.f32.mrf.mxu1  ;;  %v6261_v4 = vpop.f32.mrf.mxu2 }
 0x42b   :  { %v6192_v53 = vadd.f32 %v6191_v33, %v6178_v45  ;;  %v6262_v55 = vadd.f32 %v6261_v4, %v3268_v8 }
 0x42c   :  { %v6221_v61 = vpop.f32.mrf.mxu3 }
 0x42d   :  { %v6206_v23 = vadd.f32 %v6205_v57, %v6192_v53 }
 0x42f   :  { %v6220_v41 = vadd.f32 %v6219_v62, %v6206_v23 }
 0x431   :  { %v6233_v12 = vpop.f32.mrf.mxu0 }
 0x432   :  { %v6193_v54 = vpop.f32.mrf.mxu1  ;;  %v6234_v36 = vadd.f32 %v6233_v12, %v6220_v41  ;;  %v6263_v44 = vpop.f32.mrf.mxu2 }
 0x433   :  { %v6194_v58 = vadd.f32 %v6193_v54, %v6180_v5  ;;  %v6264_v63 = vadd.f32 %v6263_v44, %v3268_v8 }
 0x434   :  { %v6275_v10 = vpop.f32.mrf.mxu3 }
 0x435   :  { %v6208_v0 = vadd.f32 %v6207_v39, %v6194_v58  ;;  %v6276_v7 = vadd.f32 %v6275_v10, %v6262_v55 }
 0x437   :  { %v6222_v46 = vadd.f32 %v6221_v61, %v6208_v0 }
 0x439   :  { %v6235_v1 = vpop.f32.mrf.mxu0 }
 0x43a   :  { %v6236_v34 = vadd.f32 %v6235_v1, %v6222_v46 }
 0x43c   :  { %v6277_v29 = vpop.f32.mrf.mxu3 }
 0x43d   :  { %v6278_v28 = vadd.f32 %v6277_v29, %v6264_v63 }
 0x44a   :  { %v6247_v38 = vpop.f32.mrf.mxu1  ;;  %v6317_v49 = vpop.f32.mrf.mxu2 }
 0x44b   :  { %v6248_v52 = vadd.f32 %v6247_v38, %v6234_v36 }
 0x44d   :  { %10342 = vtanh.f32 %v6248_v52 }
 0x451   :  { %v6289_v11 = vpop.f32.mrf.mxu0  ;;  %v6331_v20 = vpop.f32.mrf.mxu3 }
 0x452   :  { %v6249_v27 = vpop.f32.mrf.mxu1  ;;  %v6290_v42 = vadd.f32 %v6289_v11, %v6276_v7  ;;  %v6319_v56 = vpop.f32.mrf.mxu2 }
 0x453   :  { %v10343_v60 = vpop.eup %10342  ;;  %v6250_v9 = vadd.f32 %v6249_v27, %v6236_v34 }
 0x454   :  { %6383 = vst [vmem:[%s15463_s9 + $0x28] sm:$0xff] %v10343_v60 }
 0x455   :  { %10344 = vtanh.f32 %v6250_v9 }
 0x459   :  { %v6291_v19 = vpop.f32.mrf.mxu0  ;;  %v6333_v32 = vpop.f32.mrf.mxu3 }
 0x45a   :  { %v6292_v24 = vadd.f32 %v6291_v19, %v6278_v28 }
 0x45b   :  { %v10345_v3 = vpop.eup %10344 }
 0x45c   :  { %6391 = vst [vmem:[%s15463_s9 + $0x60] sm:$0xff] %v10345_v3 }
 0x46a   :  { %v6303_v48 = vpop.f32.mrf.mxu1 }
 0x46b   :  { %v6304_v17 = vadd.f32 %v6303_v48, %v6290_v42 }
 0x46d   :  { %v6318_v37 = vadd.f32 %v6317_v49, %v6304_v17 }
 0x46f   :  { %v6332_v25 = vadd.f32 %v6331_v20, %v6318_v37 }
 0x471   :  { %v6345_v26 = vpop.f32.mrf.mxu0 }
 0x472   :  { %v6305_v22 = vpop.f32.mrf.mxu1  ;;  %v6346_v51 = vadd.f32 %v6345_v26, %v6332_v25 }
 0x473   :  { %v6306_v15 = vadd.f32 %v6305_v22, %v6292_v24 }
 0x475   :  { %v6320_v31 = vadd.f32 %v6319_v56, %v6306_v15 }
 0x477   :  { %v6334_v16 = vadd.f32 %v6333_v32, %v6320_v31 }
 0x479   :  { %v6347_v2 = vpop.f32.mrf.mxu0 }
 0x47a   :  { %v6348_v35 = vadd.f32 %v6347_v2, %v6334_v16 }
 0x48a   :  { %v6359_v14 = vpop.f32.mrf.mxu1 }
 0x48b   :  { %v6360_v18 = vadd.f32 %v6359_v14, %v6346_v51 }
 0x48d   :  { %10346 = vtanh.f32 %v6360_v18 }
 0x492   :  { %v6361_v40 = vpop.f32.mrf.mxu1 }
 0x493   :  { %v10347_v30 = vpop.eup %10346  ;;  %v6362_v47 = vadd.f32 %v6361_v40, %v6348_v35 }
 0x494   :  { %6385 = vst.msk [vmem:[%s15463_s9 + $0x30] sm:$0xff] %vm6384_vm0, %v10347_v30 }
 0x495   :  { %10348 = vtanh.f32 %v6362_v47 }
 0x49b   :  { %v10349_v43 = vpop.eup %10348 }
 0x49c   :  { %6392 = vst.msk [vmem:[%s15463_s9 + $0x68] sm:$0xff] %vm6384_vm0, %v10349_v43 }

</bundles_post_ra>
